<compile_context>
chip_gen: v6e
topology: v6e:2x2x1
jax: 0.10.0
libtpu: 0.0.40
codegen_flags: <defaults>
</compile_context>

<pallas_src>
import functools

import jax
import jax.numpy as jnp
from jax.experimental import pallas as pl
from jax.experimental.pallas import tpu as pltpu

LN_EPS = 1e-6


def _round_up(x, m):
    return ((x + m - 1) // m) * m


def _default_batch_tile():
    # v7x has 64 MiB VMEM per TensorCore -> smaller batch tiles; v5e/v6e
    # (128 MiB) can afford ~2x larger tiles.
    try:
        vmem = pltpu.get_tpu_info().vmem_capacity_bytes
    except Exception:
        vmem = 0
    return 64 if vmem >= 96 * 1024 * 1024 else 32


def _head_kernel(x_ref, w_ref, b_ref, o_ref, acc_ref, *, inv_patch_tokens):
    """Grid: (batch tiles, token tiles).

    x_ref:   [tb, tT, D]   token block (token 0 of token-block 0 is CLS)
    w_ref:   [D, C_pad]    LN-affine-folded head weight (VMEM resident)
    b_ref:   [1, C_pad]    LN-affine-folded head bias   (VMEM resident)
    o_ref:   [tb, C_pad]   logits (written on the last token step)
    acc_ref: [tb, D] f32   running sum of patch tokens
    """
    t = pl.program_id(1)

    x = x_ref[...].astype(jnp.float32)       # [tb, tT, D]
    blk_sum = jnp.sum(x, axis=1)             # [tb, D] aligned sublane reduce

    @pl.when(t == 0)
    def _():
        # Sum all tokens of the first block, then subtract CLS (token 0):
        # avoids the misaligned x[:, 1:, :] offset-1 sublane slice.
        acc_ref[...] = blk_sum - x[:, 0, :]

    @pl.when(t != 0)
    def _():
        acc_ref[...] += blk_sum

    @pl.when(t == pl.num_programs(1) - 1)
    def _():
        pooled = acc_ref[...] * inv_patch_tokens          # mean over T-1 patch tokens
        mu = jnp.mean(pooled, axis=-1, keepdims=True)
        xc = pooled - mu
        var = jnp.mean(xc * xc, axis=-1, keepdims=True)
        normed = xc * jax.lax.rsqrt(var + LN_EPS)         # LN stats in f32
        logits = jnp.dot(normed.astype(w_ref.dtype), w_ref[...],
                         preferred_element_type=jnp.float32)
        o_ref[...] = logits + b_ref[...]


def classification_head(x, gamma, beta, w_head, b_head, *, num_classes,
                        batch_tile=None, token_tile=None,
                        compute_dtype=jnp.bfloat16):
    """mean_pooling -> LayerNorm(768, eps=1e-6) -> Linear(768, num_classes)."""
    B, T, D = x.shape
    C = num_classes

    # ---- parameter prep (once, in f32) ------------------------------------
    # Fold the LayerNorm affine into the head:  (z*g + b) @ W + c
    #   = z @ (g[:, None] * W) + (b @ W + c)
    w32 = w_head.astype(jnp.float32)
    w_fold = gamma.reshape(D, 1).astype(jnp.float32) * w32
    b_fold = (beta.reshape(1, D).astype(jnp.float32) @ w32
              + b_head.reshape(1, C).astype(jnp.float32))

    # Pad classes to a multiple of 128: lane-dense stores, exact MXU N tiles.
    C_pad = _round_up(C, 128)
    if C_pad != C:
        w_fold = jnp.pad(w_fold, ((0, 0), (0, C_pad - C)))
        b_fold = jnp.pad(b_fold, ((0, 0), (0, C_pad - C)))
    w_fold = w_fold.astype(compute_dtype)

    # ---- tiling ------------------------------------------------------------
    if batch_tile is None:
        batch_tile = _default_batch_tile()
    tb = _round_up(min(batch_tile, _round_up(B, 8)), 8)
    B_pad = _round_up(B, tb)

    if token_tile is None or token_tile >= T:
        tT = T
    else:
        tT = _round_up(token_tile, 8)
    T_pad = _round_up(T, tT)

    if (B_pad, T_pad) != (B, T):
        # Zero padding is exact: padded tokens add 0 to the pooling sum and
        # padded batch rows are sliced off below.
        x = jnp.pad(x, ((0, B_pad - B), (0, T_pad - T), (0, 0)))

    grid = (B_pad // tb, T_pad // tT)
    kernel = functools.partial(_head_kernel, inv_patch_tokens=1.0 / (T - 1))

    out = pl.pallas_call(
        kernel,
        out_shape=jax.ShapeDtypeStruct((B_pad, C_pad), jnp.float32),
        grid_spec=pltpu.PrefetchScalarGridSpec(
            num_scalar_prefetch=0,
            grid=grid,
            in_specs=[
                pl.BlockSpec((tb, tT, D), lambda i, t: (i, t, 0)),   # x: streamed
                pl.BlockSpec((D, C_pad), lambda i, t: (0, 0)),       # w: resident
                pl.BlockSpec((1, C_pad), lambda i, t: (0, 0)),       # b: resident
            ],
            out_specs=pl.BlockSpec((tb, C_pad), lambda i, t: (i, 0)),
            scratch_shapes=[pltpu.VMEM((tb, D), jnp.float32)],
        ),
        compiler_params=pltpu.CompilerParams(
            dimension_semantics=("parallel", "arbitrary"),
            vmem_limit_bytes=64 * 1024 * 1024,
        ),
    )(x, w_fold, b_fold)

    return out[:B, :C]


def init_head_params(key, dim=768, num_classes=1000):
    """Deterministic parameter init matching the module's __init__."""
    # head_norm: weight=1, bias=0
    gamma = jnp.ones((dim,), dtype=jnp.float32)
    beta = jnp.zeros((dim,), dtype=jnp.float32)
    # head: trunc_normal_(std=0.02) weight, zero bias. Stored (D, C) = W^T.
    w = jax.random.truncated_normal(key, -2.0, 2.0, (dim, num_classes),
                                    jnp.float32) * 0.02
    b = jnp.zeros((num_classes,), dtype=jnp.float32)
    return gamma, beta, w, b


def fake_backbone_tokens(image, key, dim=768, patch=16):
    """Stand-in for self.model_call_fn(image)['x'] -> tokens [B, 1+N, D].
    # TODO(synk): real backbone is a checkpoint-loaded model from MODEL_REGISTRY;
    # it has no Pallas equivalent here, so a deterministic patch-embed is used.
    """
    B, C, H, W = image.shape
    nh, nw = H // patch, W // patch
    patches = image.reshape(B, C, nh, patch, nw, patch)
    patches = jnp.transpose(patches, (0, 2, 4, 1, 3, 5)).reshape(
        B, nh * nw, C * patch * patch)
    k1, k2 = jax.random.split(key)
    w_embed = jax.random.normal(k1, (C * patch * patch, dim), jnp.float32) * 0.02
    cls_tok = jax.random.normal(k2, (1, 1, dim), jnp.float32) * 0.02
    tokens = patches @ w_embed                                   # [B, N, D]
    cls = jnp.broadcast_to(cls_tok, (B, 1, dim))
    return jnp.concatenate([cls, tokens], axis=1)                # [B, 1+N, D]


def reference_head(x, gamma, beta, w_head, b_head):
    pooled = jnp.mean(x[:, 1:, :], axis=1)
    mu = jnp.mean(pooled, axis=-1, keepdims=True)
    var = jnp.mean((pooled - mu) ** 2, axis=-1, keepdims=True)
    normed = (pooled - mu) / jnp.sqrt(var + LN_EPS) * gamma + beta
    return normed @ w_head + b_head


if __name__ == "__main__":
    DIM = 768
    NUM_CLASSES = 1000

    key = jax.random.PRNGKey(0)
    k_img, k_backbone, k_head, k_tok = jax.random.split(key, 4)

    # Small image consistent with a ViT-style backbone: [B=2, C=3, H=32, W=32]
    image = jax.random.normal(k_img, (2, 3, 32, 32), jnp.float32)

    # glue: x = model_call_fn(image)['x'] -> [2, 5, 768]
    x = fake_backbone_tokens(image, k_backbone, dim=DIM, patch=16)
    gamma, beta, w_head, b_head = init_head_params(k_head, dim=DIM,
                                                   num_classes=NUM_CLASSES)
    ref = reference_head(x, gamma, beta, w_head, b_head)

    # f32 MXU path: strict numerical check.
    logits_f32 = jax.block_until_ready(
        classification_head(x, gamma, beta, w_head, b_head,
                            num_classes=NUM_CLASSES,
                            compute_dtype=jnp.float32))
    assert logits_f32.shape == (2, NUM_CLASSES)
    assert jnp.allclose(logits_f32, ref, atol=1e-4, rtol=1e-4)

    # bf16 MXU path (default / perf): looser tolerance vs the f32 reference.
    logits_bf16 = jax.block_until_ready(
        classification_head(x, gamma, beta, w_head, b_head,
                            num_classes=NUM_CLASSES))
    assert logits_bf16.shape == (2, NUM_CLASSES)
    assert jnp.allclose(logits_bf16, ref, atol=3e-2, rtol=3e-2)

    # Multi-tile path: larger batch + token tiling exercises the batch grid,
    # the pooling accumulator and the batch/token padding logic.
    x_big = jax.random.normal(k_tok, (20, 33, DIM), jnp.float32) * 0.5
    ref_big = reference_head(x_big, gamma, beta, w_head, b_head)
    logits_big = jax.block_until_ready(
        classification_head(x_big, gamma, beta, w_head, b_head,
                            num_classes=NUM_CLASSES,
                            batch_tile=8, token_tile=8,
                            compute_dtype=jnp.float32))
    assert logits_big.shape == (20, NUM_CLASSES)
    assert jnp.allclose(logits_big, ref_big, atol=1e-4, rtol=1e-4)

    print("KERNEL_OK")
</pallas_src>

<mosaic_0001>
module attributes {stable_mosaic.version = 11 : i64} {
  func.func @_head_kernel(%arg0: i32, %arg1: i32, %arg2: memref<8x5x768xf32, #tpu.memory_space<vmem>>, %arg3: memref<768x1024xf32, #tpu.memory_space<vmem>>, %arg4: memref<1x1024xf32, #tpu.memory_space<vmem>>, %arg5: memref<8x1024xf32, #tpu.memory_space<vmem>>, %arg6: memref<8x768xf32, #tpu.memory_space<vmem>>) attributes {dimension_semantics = [#tpu.dimension_semantics<parallel>, #tpu.dimension_semantics<arbitrary>], iteration_bounds = array<i64: 1, 1>, scalar_prefetch = 0 : i64, scratch_operands = 1 : i64, tpu.core_type = #tpu.core_type<tc>, window_params = [{transform_indices = @transform_0, window_bounds = array<i64: 8, 5, 768>}, {pipeline_mode = #tpu.pipeline_mode<synchronous>, transform_indices = @transform_1, window_bounds = array<i64: 768, 1024>}, {pipeline_mode = #tpu.pipeline_mode<synchronous>, transform_indices = @transform_2, window_bounds = array<i64: 1, 1024>}, {transform_indices = @transform_3, window_bounds = array<i64: 8, 1024>}]} {
    %c0 = arith.constant 0 : index
    %c0_0 = arith.constant 0 : index
    %c0_1 = arith.constant 0 : index
    %0 = vector.load %arg2[%c0, %c0_0, %c0_1] : memref<8x5x768xf32, #tpu.memory_space<vmem>>, vector<8x5x768xf32>
    %cst = arith.constant dense<0.000000e+00> : vector<8x768xf32>
    %1 = vector.multi_reduction <add>, %0, %cst [1] : vector<8x5x768xf32> to vector<8x768xf32>
    %c0_i32 = arith.constant 0 : i32
    %2 = arith.cmpi eq, %arg1, %c0_i32 : i32
    %3 = arith.extui %2 : i1 to i32
    %c0_i32_2 = arith.constant 0 : i32
    %4 = arith.cmpi ne, %3, %c0_i32_2 : i32
    scf.if %4 {
      %11 = vector.extract_strided_slice %0 {offsets = [0, 0, 0], sizes = [8, 1, 768], strides = [1, 1, 1]} : vector<8x5x768xf32> to vector<8x1x768xf32>
      %12 = vector.shape_cast %11 : vector<8x1x768xf32> to vector<8x768xf32>
      %13 = arith.subf %1, %12 : vector<8x768xf32>
      %c0_7 = arith.constant 0 : index
      %c0_8 = arith.constant 0 : index
      %14 = vector.load %arg6[%c0_7, %c0_8] : memref<8x768xf32, #tpu.memory_space<vmem>>, vector<8x768xf32>
      tpu.vector_store %arg6[%c0_7, %c0_8], %13 {strides = array<i32>} : memref<8x768xf32, #tpu.memory_space<vmem>>, vector<8x768xf32>,
    } else {
    }
    %c0_i32_3 = arith.constant 0 : i32
    %5 = arith.cmpi ne, %arg1, %c0_i32_3 : i32
    %6 = arith.extui %5 : i1 to i32
    %c0_i32_4 = arith.constant 0 : i32
    %7 = arith.cmpi ne, %6, %c0_i32_4 : i32
    scf.if %7 {
      %c0_7 = arith.constant 0 : index
      %c0_8 = arith.constant 0 : index
      %11 = vector.load %arg6[%c0_7, %c0_8] : memref<8x768xf32, #tpu.memory_space<vmem>>, vector<8x768xf32>
      %12 = arith.addf %11, %1 : vector<8x768xf32>
      %c0_9 = arith.constant 0 : index
      %c0_10 = arith.constant 0 : index
      %13 = vector.load %arg6[%c0_9, %c0_10] : memref<8x768xf32, #tpu.memory_space<vmem>>, vector<8x768xf32>
      tpu.vector_store %arg6[%c0_9, %c0_10], %12 {strides = array<i32>} : memref<8x768xf32, #tpu.memory_space<vmem>>, vector<8x768xf32>,
    } else {
    }
    %c0_i32_5 = arith.constant 0 : i32
    %8 = arith.cmpi eq, %arg1, %c0_i32_5 : i32
    %9 = arith.extui %8 : i1 to i32
    %c0_i32_6 = arith.constant 0 : i32
    %10 = arith.cmpi ne, %9, %c0_i32_6 : i32
    scf.if %10 {
      %c0_7 = arith.constant 0 : index
      %c0_8 = arith.constant 0 : index
      %11 = vector.load %arg6[%c0_7, %c0_8] : memref<8x768xf32, #tpu.memory_space<vmem>>, vector<8x768xf32>
      %cst_9 = arith.constant 2.500000e-01 : f32
      %12 = vector.broadcast %cst_9 : f32 to vector<8x768xf32>
      %13 = arith.mulf %11, %12 : vector<8x768xf32>
      %cst_10 = arith.constant dense<0.000000e+00> : vector<8xf32>
      %14 = vector.multi_reduction <add>, %13, %cst_10 [1] : vector<8x768xf32> to vector<8xf32>
      %15 = vector.shape_cast %14 : vector<8xf32> to vector<8x1xf32>
      %cst_11 = arith.constant 7.680000e+02 : f32
      %16 = vector.broadcast %cst_11 : f32 to vector<8x1xf32>
      %17 = arith.divf %15, %16 : vector<8x1xf32>
      %18 = vector.broadcast %17 : vector<8x1xf32> to vector<8x768xf32>
      %19 = arith.subf %13, %18 : vector<8x768xf32>
      %20 = arith.mulf %19, %19 : vector<8x768xf32>
      %cst_12 = arith.constant dense<0.000000e+00> : vector<8xf32>
      %21 = vector.multi_reduction <add>, %20, %cst_12 [1] : vector<8x768xf32> to vector<8xf32>
      %22 = vector.shape_cast %21 : vector<8xf32> to vector<8x1xf32>
      %cst_13 = arith.constant 7.680000e+02 : f32
      %23 = vector.broadcast %cst_13 : f32 to vector<8x1xf32>
      %24 = arith.divf %22, %23 : vector<8x1xf32>
      %cst_14 = arith.constant 9.99999997E-7 : f32
      %25 = vector.broadcast %cst_14 : f32 to vector<8x1xf32>
      %26 = arith.addf %24, %25 : vector<8x1xf32>
      %27 = math.rsqrt %26 : vector<8x1xf32>
      %28 = vector.broadcast %27 : vector<8x1xf32> to vector<8x768xf32>
      %29 = arith.mulf %19, %28 : vector<8x768xf32>
      %c0_15 = arith.constant 0 : index
      %c0_16 = arith.constant 0 : index
      %30 = vector.load %arg3[%c0_15, %c0_16] : memref<768x1024xf32, #tpu.memory_space<vmem>>, vector<768x1024xf32>
      %cst_17 = arith.constant dense<0.000000e+00> : vector<8x1024xf32>
      %31 = tpu.matmul %29, %30, %cst_17 {dimension_numbers = #tpu.dot_dimension_numbers<[1], [0], [0], [1], [0, 0, 1, 1], [], []>} : vector<8x768xf32>, vector<768x1024xf32>, vector<8x1024xf32> -> vector<8x1024xf32>
      %c0_18 = arith.constant 0 : index
      %c0_19 = arith.constant 0 : index
      %32 = vector.load %arg4[%c0_18, %c0_19] : memref<1x1024xf32, #tpu.memory_space<vmem>>, vector<1x1024xf32>
      %33 = vector.broadcast %32 : vector<1x1024xf32> to vector<8x1024xf32>
      %34 = arith.addf %31, %33 : vector<8x1024xf32>
      %c0_20 = arith.constant 0 : index
      %c0_21 = arith.constant 0 : index
      %35 = vector.load %arg5[%c0_20, %c0_21] : memref<8x1024xf32, #tpu.memory_space<vmem>>, vector<8x1024xf32>
      tpu.vector_store %arg5[%c0_20, %c0_21], %34 {strides = array<i32>} : memref<8x1024xf32, #tpu.memory_space<vmem>>, vector<8x1024xf32>,
    } else {
    }
    return
  }
  func.func @transform_0(%arg0: i32, %arg1: i32) -> (i32, i32, i32) {
    %c0_i32 = arith.constant 0 : i32
    %c0_i32_0 = arith.constant 0 : i32
    return %arg0, %arg1, %c0_i32 : i32, i32, i32
  }
  func.func @transform_1(%arg0: i32, %arg1: i32) -> (i32, i32) {
    %c0_i32 = arith.constant 0 : i32
    %c0_i32_0 = arith.constant 0 : i32
    %c0_i32_1 = arith.constant 0 : i32
    return %c0_i32, %c0_i32_0 : i32, i32
  }
  func.func @transform_2(%arg0: i32, %arg1: i32) -> (i32, i32) {
    %c0_i32 = arith.constant 0 : i32
    %c0_i32_0 = arith.constant 0 : i32
    %c0_i32_1 = arith.constant 0 : i32
    return %c0_i32, %c0_i32_0 : i32, i32
  }
  func.func @transform_3(%arg0: i32, %arg1: i32) -> (i32, i32) {
    %c0_i32 = arith.constant 0 : i32
    %c0_i32_0 = arith.constant 0 : i32
    return %arg0, %c0_i32 : i32, i32
  }
}

</mosaic_0001>

<bundles_post_ra>
// kernel: tpu_custom_call.1
= control target key start
LH: loop header
LB: loop body
LE: loop exit
PB: predicated region body
PF: predicated region fallthrough
CT: control target
= control target key end

     0   :  { %8 = vsyncpa [#allocation4], 0  ;;  %s3368_s0 = inlined_call_operand.vmem [shape: f32[8,5,768], index: 0, kind: input, shape index: {}]   ;;  %s3369_s1 = inlined_call_operand.hbm [shape: f32[768,1024], index: 1, kind: input, shape index: {}]   ;;  %s3370_s2 = inlined_call_operand.hbm [shape: f32[1,1024], index: 2, kind: input, shape index: {}]   ;;  %s3371_s3 = inlined_call_operand.hbm [shape: f32[8,1024], index: 3, kind: output, shape index: {}]  }
   0x1   :  { %9 = vsyncpa [#allocation7], 0 }
   0x2   :  { %10 = vsyncpa [#allocation5], 0  ;;  %s2565_s12 = smov [#allocation3]  }
   0x3   :  { %s18_s13 = sshll.u32 %s2565_s12, 4  ;;  %s19_s13 = int_to_ptr.vmem [resolvable:$true] %s18_s13 }
   0x4   :  { %s2507_s14 = scalar_lea.vmem %s19_s13, 98304  ;;  %p2512_p1 = scmp.lt.s32.totalorder %s19_s13, %s19_s13 }
   0x5   :  { %p2508_p0 = scmp.ne.s32.totalorder %s19_s13, %s2507_s14  ;;  %p2513_p2 = scmp.lt.s32.totalorder %s2507_s14, %s2507_s14 }
   0x7   :  { %p2514_p3 = por %p2513_p2, %p2512_p1 }
   0x9   :  { %p2515_p4 = pnand %p2514_p3, %p2508_p0 }
   0xb   :  { %2518 = shalt.err (!%p2515_p4)
}
   0xc   :  { %s2566_s15 = smov 1024   ;;  %s2567_s16 = smov 64  }
   0xd   :  { %24 = dma.hbm_to_vmem [thread:$0]  %s3369_s1, 98304, %s19_s13, [#allocation4], %s2566_s15, %s2566_s15, %s2567_s16  }
   0xe   :  { %s2568_s19 = smov [#allocation6]  }
   0xf   :  { %s31_s20 = sshll.u32 %s2568_s19, 4  ;;  %s32_s20 = int_to_ptr.vmem [resolvable:$true] %s31_s20 }
  0x10   :  { %s2527_s21 = scalar_lea.vmem %s32_s20, 128  ;;  %p2532_p6 = scmp.lt.s32.totalorder %s32_s20, %s32_s20 }
  0x11   :  { %p2528_p5 = scmp.ne.s32.totalorder %s32_s20, %s2527_s21  ;;  %p2533_p7 = scmp.lt.s32.totalorder %s2527_s21, %s2527_s21 }
  0x13   :  { %p2534_p8 = por %p2533_p7, %p2532_p6 }
  0x15   :  { %p2535_p9 = pnand %p2534_p8, %p2528_p5 }
  0x17   :  { %2538 = shalt.err (!%p2535_p9)
}
  0x18   :  { %34 = dma.hbm_to_vmem [thread:$0]  %s3370_s2, 128, %s32_s20, [#allocation7]  }
  0x19   :  { %2559 = dma.done.wait [#allocation4], 98304  }
  0x1a   :  { %2560 = vsyncadd [#allocation4], 4294868992 }
  0x1b   :  { %2561 = dma.done.wait [#allocation7], 128  }
  0x1c   :  { %2562 = vsyncadd [#allocation7], 4294967168  ;;  %v2599_v0 = vld [vmem:[%s3368_s0] sm:$0x1f]  ;;  %v2604_v1 = vld [vmem:[%s3368_s0 + $0x8] sm:$0x1f] }
  0x1d   :  { %v2609_v2 = vld [vmem:[%s3368_s0 + $0x10] sm:$0x1f]  ;;  %v2614_v3 = vld [vmem:[%s3368_s0 + $0x18] sm:$0x1f]  ;;  %v2619_v4 = vld [vmem:[%s3368_s0 + $0x20] sm:$0x1f] }
  0x1e   :  { %3444 = vst [vmem:[#allocation12_spill] sm:$0xff] %v2619_v4  ;;  %vm89_vm0 = vcmask 1044480   ;;  %v2624_v5 = vld [vmem:[%s3368_s0 + $0x28] sm:$0x1f]  ;;  %v2629_v6 = vld [vmem:[%s3368_s0 + $0x30] sm:$0x1f] }
  0x1f   :  { %3445 = vst [vmem:[#allocation13_spill] sm:$0xff] %v2624_v5  ;;  %v2634_v7 = vld [vmem:[%s3368_s0 + $0x38] sm:$0x1f]  ;;  %v90_v8 = vsel %vm89_vm0, %v2599_v0, 0.0  ;;  %v97_v9 = vsel %vm89_vm0, %v2604_v1, 0.0  ;;  %v104_v10 = vsel %vm89_vm0, %v2609_v2, 0.0 }
  0x20   :  { %v111_v11 = vsel %vm89_vm0, %v2614_v3, 0.0  ;;  %v91_v12 = vrot.slane %v90_v8, 4  ;;  %v98_v13 = vrot.slane %v97_v9, 4  ;;  %v105_v14 = vrot.slane %v104_v10, 4  ;;  %v2655_v44 = vld [vmem:[%s3368_s0 + $0x40] sm:$0x1f] }
  0x21   :  { %v112_v15 = vrot.slane %v111_v11, 4  ;;  %v118_v16 = vsel %vm89_vm0, %v2619_v4, 0.0  ;;  %v125_v17 = vsel %vm89_vm0, %v2624_v5, 0.0  ;;  %v132_v18 = vsel %vm89_vm0, %v2629_v6, 0.0  ;;  %v2660_v49 = vld [vmem:[%s3368_s0 + $0x48] sm:$0x1f] }
  0x22   :  { %v139_v19 = vsel %vm89_vm0, %v2634_v7, 0.0  ;;  %v92_v20 = vadd.f32 %v91_v12, %v90_v8  ;;  %v99_v21 = vadd.f32 %v98_v13, %v97_v9  ;;  %v106_v22 = vadd.f32 %v105_v14, %v104_v10  ;;  %v2665_v50 = vld [vmem:[%s3368_s0 + $0x50] sm:$0x1f]  ;;  %v2670_v51 = vld [vmem:[%s3368_s0 + $0x58] sm:$0x1f] }
  0x23   :  { %v113_v23 = vadd.f32 %v112_v15, %v111_v11  ;;  %v119_v24 = vrot.slane %v118_v16, 4  ;;  %v126_v25 = vrot.slane %v125_v17, 4  ;;  %v133_v26 = vrot.slane %v132_v18, 4  ;;  %3446 = vst [vmem:[#allocation14_spill] sm:$0xff] %v2670_v51  ;;  %v2675_v56 = vld [vmem:[%s3368_s0 + $0x60] sm:$0x1f] }
  0x24   :  { %v140_v27 = vrot.slane %v139_v19, 4  ;;  %v93_v28 = vrot.slane %v92_v20, 2  ;;  %v100_v29 = vrot.slane %v99_v21, 2  ;;  %v107_v30 = vrot.slane %v106_v22, 2  ;;  %v2680_v57 = vld [vmem:[%s3368_s0 + $0x68] sm:$0x1f] }
  0x25   :  { %v114_v31 = vrot.slane %v113_v23, 2  ;;  %v120_v32 = vadd.f32 %v119_v24, %v118_v16  ;;  %v127_v33 = vadd.f32 %v126_v25, %v125_v17  ;;  %v134_v34 = vadd.f32 %v133_v26, %v132_v18  ;;  %v2693_v62 = vld [vmem:[%s3368_s0 + $0x70] sm:$0x1f]  ;;  %v2698_v11 = vld [vmem:[%s3368_s0 + $0x78] sm:$0x1f] }
  0x26   :  { %v141_v35 = vadd.f32 %v140_v27, %v139_v19  ;;  %v94_v36 = vadd.f32 %v93_v28, %v92_v20  ;;  %v101_v37 = vadd.f32 %v100_v29, %v99_v21  ;;  %v108_v38 = vadd.f32 %v107_v30, %v106_v22  ;;  %3447 = vst [vmem:[#allocation15_spill] sm:$0xff] %v2693_v62 }
  0x27   :  { %v115_v39 = vadd.f32 %v114_v31, %v113_v23  ;;  %v121_v40 = vrot.slane %v120_v32, 2  ;;  %v128_v41 = vrot.slane %v127_v33, 2  ;;  %v135_v42 = vrot.slane %v134_v34, 2  ;;  %3448 = vst [vmem:[#allocation16_spill] sm:$0xff] %v2698_v11 }
  0x28   :  { %v142_v43 = vrot.slane %v141_v35, 2  ;;  %v95_v45 = vrot.slane %v94_v36, 1  ;;  %v102_v46 = vrot.slane %v101_v37, 1  ;;  %v109_v47 = vrot.slane %v108_v38, 1 }
  0x29   :  { %v116_v48 = vrot.slane %v115_v39, 1  ;;  %v122_v52 = vadd.f32 %v121_v40, %v120_v32  ;;  %v129_v53 = vadd.f32 %v128_v41, %v127_v33  ;;  %v136_v54 = vadd.f32 %v135_v42, %v134_v34 }
  0x2a   :  { %v143_v55 = vadd.f32 %v142_v43, %v141_v35  ;;  %v2682_v58 = vadd.f32 %v95_v45, %v94_v36  ;;  %v2684_v59 = vadd.f32 %v102_v46, %v101_v37  ;;  %v2686_v60 = vadd.f32 %v109_v47, %v108_v38 }
  0x2b   :  { %v2688_v61 = vadd.f32 %v116_v48, %v115_v39  ;;  %v123_v63 = vrot.slane %v122_v52, 1  ;;  %v130_v8 = vrot.slane %v129_v53, 1  ;;  %v137_v9 = vrot.slane %v136_v54, 1 }
  0x2c   :  { %v144_v10 = vrot.slane %v143_v55, 1  ;;  %v146_v12 = vsel %vm89_vm0, %v2655_v44, 0.0  ;;  %v153_v13 = vsel %vm89_vm0, %v2660_v49, 0.0  ;;  %v160_v14 = vsel %vm89_vm0, %v2665_v50, 0.0 }
  0x2d   :  { %v167_v15 = vsel %vm89_vm0, %v2670_v51, 0.0  ;;  %v2708_v16 = vadd.f32 %v123_v63, %v122_v52  ;;  %v2710_v17 = vadd.f32 %v130_v8, %v129_v53  ;;  %v2712_v18 = vadd.f32 %v137_v9, %v136_v54  ;;  %v2727_v63 = vld [vmem:[%s3368_s0 + $0x80] sm:$0x1f] }
  0x2e   :  { %v2714_v19 = vadd.f32 %v144_v10, %v143_v55  ;;  %v147_v20 = vrot.slane %v146_v12, 4  ;;  %v154_v21 = vrot.slane %v153_v13, 4  ;;  %v161_v22 = vrot.slane %v160_v14, 4  ;;  %3451 = vst [vmem:[#allocation19_spill] sm:$0xff] %v2727_v63 }
  0x2f   :  { %3449 = vst [vmem:[#allocation17_spill] sm:$0xff] %v2708_v16  ;;  %3450 = vst [vmem:[#allocation18_spill] sm:$0xff] %v2710_v17  ;;  %v168_v23 = vrot.slane %v167_v15, 4  ;;  %v174_v24 = vsel %vm89_vm0, %v2675_v56, 0.0  ;;  %v181_v25 = vsel %vm89_vm0, %v2680_v57, 0.0  ;;  %v188_v26 = vsel %vm89_vm0, %v2693_v62, 0.0 }
  0x30   :  { %v195_v27 = vsel %vm89_vm0, %v2698_v11, 0.0  ;;  %v148_v28 = vadd.f32 %v147_v20, %v146_v12  ;;  %v155_v29 = vadd.f32 %v154_v21, %v153_v13  ;;  %v162_v30 = vadd.f32 %v161_v22, %v160_v14  ;;  %v2732_v13 = vld [vmem:[%s3368_s0 + $0x88] sm:$0x1f]  ;;  %v2737_v14 = vld [vmem:[%s3368_s0 + $0x90] sm:$0x1f] }
  0x31   :  { %v169_v31 = vadd.f32 %v168_v23, %v167_v15  ;;  %v175_v32 = vrot.slane %v174_v24, 4  ;;  %v182_v33 = vrot.slane %v181_v25, 4  ;;  %v189_v34 = vrot.slane %v188_v26, 4  ;;  %3452 = vst [vmem:[#allocation20_spill] sm:$0xff] %v2732_v13  ;;  %3453 = vst [vmem:[#allocation21_spill] sm:$0xff] %v2737_v14 }
  0x32   :  { %v196_v35 = vrot.slane %v195_v27, 4  ;;  %v149_v36 = vrot.slane %v148_v28, 2  ;;  %v156_v37 = vrot.slane %v155_v29, 2  ;;  %v163_v38 = vrot.slane %v162_v30, 2  ;;  %v2742_v15 = vld [vmem:[%s3368_s0 + $0x98] sm:$0x1f] }
  0x33   :  { %v170_v39 = vrot.slane %v169_v31, 2  ;;  %v176_v40 = vadd.f32 %v175_v32, %v174_v24  ;;  %v183_v41 = vadd.f32 %v182_v33, %v181_v25  ;;  %v190_v42 = vadd.f32 %v189_v34, %v188_v26  ;;  %3454 = vst [vmem:[#allocation22_spill] sm:$0xff] %v2742_v15  ;;  %v2747_v24 = vld [vmem:[%s3368_s0 + $0xa0] sm:$0x1f]  ;;  %v2752_v25 = vld [vmem:[%s3368_s0 + $0xa8] sm:$0x1f] }
  0x34   :  { %v197_v43 = vadd.f32 %v196_v35, %v195_v27  ;;  %v150_v45 = vadd.f32 %v149_v36, %v148_v28  ;;  %v157_v46 = vadd.f32 %v156_v37, %v155_v29  ;;  %v164_v47 = vadd.f32 %v163_v38, %v162_v30  ;;  %3455 = vst [vmem:[#allocation23_spill] sm:$0xff] %v2747_v24  ;;  %v2765_v30 = vld [vmem:[%s3368_s0 + $0xb0] sm:$0x1f]  ;;  %v2770_v35 = vld [vmem:[%s3368_s0 + $0xb8] sm:$0x1f] }
  0x35   :  { %v171_v48 = vadd.f32 %v170_v39, %v169_v31  ;;  %v177_v52 = vrot.slane %v176_v40, 2  ;;  %v184_v53 = vrot.slane %v183_v41, 2  ;;  %v191_v54 = vrot.slane %v190_v42, 2  ;;  %3456 = vst [vmem:[#allocation24_spill] sm:$0xff] %v2752_v25  ;;  %3458 = vst [vmem:[#allocation26_spill] sm:$0xff] %v2765_v30 }
  0x36   :  { %v198_v55 = vrot.slane %v197_v43, 2  ;;  %v151_v8 = vrot.slane %v150_v45, 1  ;;  %v158_v9 = vrot.slane %v157_v46, 1  ;;  %v165_v10 = vrot.slane %v164_v47, 1  ;;  %3459 = vst [vmem:[#allocation27_spill] sm:$0xff] %v2770_v35 }
  0x37   :  { %v172_v12 = vrot.slane %v171_v48, 1  ;;  %v178_v20 = vadd.f32 %v177_v52, %v176_v40  ;;  %v185_v21 = vadd.f32 %v184_v53, %v183_v41  ;;  %v192_v22 = vadd.f32 %v191_v54, %v190_v42 }
  0x38   :  { %v199_v23 = vadd.f32 %v198_v55, %v197_v43  ;;  %v2754_v26 = vadd.f32 %v151_v8, %v150_v45  ;;  %v2756_v27 = vadd.f32 %v158_v9, %v157_v46  ;;  %v2758_v28 = vadd.f32 %v165_v10, %v164_v47 }
  0x39   :  { %v2760_v29 = vadd.f32 %v172_v12, %v171_v48  ;;  %v179_v31 = vrot.slane %v178_v20, 1  ;;  %v186_v32 = vrot.slane %v185_v21, 1  ;;  %v193_v33 = vrot.slane %v192_v22, 1 }
  0x3a   :  { %v200_v34 = vrot.slane %v199_v23, 1  ;;  %v202_v36 = vsel %vm89_vm0, %v2727_v63, 0.0  ;;  %v209_v37 = vsel %vm89_vm0, %v2732_v13, 0.0  ;;  %v216_v38 = vsel %vm89_vm0, %v2737_v14, 0.0 }
  0x3b   :  { %3457 = vst [vmem:[#allocation25_spill] sm:$0xff] %v2760_v29  ;;  %v223_v39 = vsel %vm89_vm0, %v2742_v15, 0.0  ;;  %v2780_v40 = vadd.f32 %v179_v31, %v178_v20  ;;  %v2782_v41 = vadd.f32 %v186_v32, %v185_v21  ;;  %v2784_v42 = vadd.f32 %v193_v33, %v192_v22 }
  0x3c   :  { %v2786_v43 = vadd.f32 %v200_v34, %v199_v23  ;;  %v203_v45 = vrot.slane %v202_v36, 4  ;;  %v210_v46 = vrot.slane %v209_v37, 4  ;;  %v217_v47 = vrot.slane %v216_v38, 4 }
  0x3d   :  { %3460 = vst [vmem:[#allocation28_spill] sm:$0xff] %v2784_v42  ;;  %v224_v48 = vrot.slane %v223_v39, 4  ;;  %v230_v52 = vsel %vm89_vm0, %v2747_v24, 0.0  ;;  %v237_v53 = vsel %vm89_vm0, %v2752_v25, 0.0  ;;  %v244_v54 = vsel %vm89_vm0, %v2765_v30, 0.0 }
  0x3e   :  { %3461 = vst [vmem:[#allocation29_spill] sm:$0xff] %v2786_v43  ;;  %v251_v55 = vsel %vm89_vm0, %v2770_v35, 0.0  ;;  %v204_v8 = vadd.f32 %v203_v45, %v202_v36  ;;  %v211_v9 = vadd.f32 %v210_v46, %v209_v37  ;;  %v218_v10 = vadd.f32 %v217_v47, %v216_v38  ;;  %v2799_v45 = vld [vmem:[%s3368_s0 + $0xc0] sm:$0x1f] }
  0x3f   :  { %v225_v12 = vadd.f32 %v224_v48, %v223_v39  ;;  %v231_v20 = vrot.slane %v230_v52, 4  ;;  %v238_v21 = vrot.slane %v237_v53, 4  ;;  %v245_v22 = vrot.slane %v244_v54, 4  ;;  %3462 = vst [vmem:[#allocation30_spill] sm:$0xff] %v2799_v45 }
  0x40   :  { %v252_v23 = vrot.slane %v251_v55, 4  ;;  %v205_v31 = vrot.slane %v204_v8, 2  ;;  %v212_v32 = vrot.slane %v211_v9, 2  ;;  %v219_v33 = vrot.slane %v218_v10, 2 }
  0x41   :  { %v226_v34 = vrot.slane %v225_v12, 2  ;;  %v232_v24 = vadd.f32 %v231_v20, %v230_v52  ;;  %v239_v25 = vadd.f32 %v238_v21, %v237_v53  ;;  %v246_v15 = vadd.f32 %v245_v22, %v244_v54  ;;  %v2804_v53 = vld [vmem:[%s3368_s0 + $0xc8] sm:$0x1f]  ;;  %v2809_v54 = vld [vmem:[%s3368_s0 + $0xd0] sm:$0x1f] }
  0x42   :  { %v253_v14 = vadd.f32 %v252_v23, %v251_v55  ;;  %v206_v30 = vadd.f32 %v205_v31, %v204_v8  ;;  %v213_v13 = vadd.f32 %v212_v32, %v211_v9  ;;  %v220_v63 = vadd.f32 %v219_v33, %v218_v10  ;;  %3463 = vst [vmem:[#allocation31_spill] sm:$0xff] %v2804_v53  ;;  %v2814_v55 = vld [vmem:[%s3368_s0 + $0xd8] sm:$0x1f]  ;;  %v2819_v20 = vld [vmem:[%s3368_s0 + $0xe0] sm:$0x1f] }
  0x43   :  { %v227_v35 = vadd.f32 %v226_v34, %v225_v12  ;;  %v233_v36 = vrot.slane %v232_v24, 2  ;;  %v240_v37 = vrot.slane %v239_v25, 2  ;;  %v247_v38 = vrot.slane %v246_v15, 2  ;;  %3464 = vst [vmem:[#allocation32_spill] sm:$0xff] %v2809_v54  ;;  %3465 = vst [vmem:[#allocation33_spill] sm:$0xff] %v2814_v55 }
  0x44   :  { %v254_v39 = vrot.slane %v253_v14, 2  ;;  %v207_v46 = vrot.slane %v206_v30, 1  ;;  %v214_v47 = vrot.slane %v213_v13, 1  ;;  %v221_v48 = vrot.slane %v220_v63, 1  ;;  %3466 = vst [vmem:[#allocation34_spill] sm:$0xff] %v2819_v20 }
  0x45   :  { %v228_v52 = vrot.slane %v227_v35, 1  ;;  %v234_v8 = vadd.f32 %v233_v36, %v232_v24  ;;  %v241_v9 = vadd.f32 %v240_v37, %v239_v25  ;;  %v248_v10 = vadd.f32 %v247_v38, %v246_v15  ;;  %v2824_v21 = vld [vmem:[%s3368_s0 + $0xe8] sm:$0x1f] }
  0x46   :  { %v255_v12 = vadd.f32 %v254_v39, %v253_v14  ;;  %3467 = vst [vmem:[#allocation35_spill] sm:$0xff] %v2824_v21  ;;  %v2826_v22 = vadd.f32 %v207_v46, %v206_v30  ;;  %v2828_v23 = vadd.f32 %v214_v47, %v213_v13  ;;  %v2830_v31 = vadd.f32 %v221_v48, %v220_v63  ;;  %v2837_v14 = vld [vmem:[%s3368_s0 + $0xf0] sm:$0x1f]  ;;  %v2842_v30 = vld [vmem:[%s3368_s0 + $0xf8] sm:$0x1f] }
  0x47   :  { %v2832_v24 = vadd.f32 %v228_v52, %v227_v35  ;;  %3472 = vst [vmem:[#allocation40_spill] sm:$0xff] %v2837_v14  ;;  %v235_v15 = vrot.slane %v234_v8, 1  ;;  %v242_v25 = vrot.slane %v241_v9, 1  ;;  %v249_v32 = vrot.slane %v248_v10, 1  ;;  %3473 = vst [vmem:[#allocation41_spill] sm:$0xff] %v2842_v30 }
  0x48   :  { %3468 = vst [vmem:[#allocation36_spill] sm:$0xff] %v2826_v22  ;;  %3469 = vst [vmem:[#allocation37_spill] sm:$0xff] %v2828_v23  ;;  %v256_v33 = vrot.slane %v255_v12, 1  ;;  %v258_v63 = vsel %vm89_vm0, %v2799_v45, 0.0  ;;  %v265_v13 = vsel %vm89_vm0, %v2804_v53, 0.0  ;;  %v272_v35 = vsel %vm89_vm0, %v2809_v54, 0.0 }
  0x49   :  { %3470 = vst [vmem:[#allocation38_spill] sm:$0xff] %v2830_v31  ;;  %3471 = vst [vmem:[#allocation39_spill] sm:$0xff] %v2832_v24  ;;  %v279_v34 = vsel %vm89_vm0, %v2814_v55, 0.0  ;;  %v2852_v36 = vadd.f32 %v235_v15, %v234_v8  ;;  %v2854_v37 = vadd.f32 %v242_v25, %v241_v9  ;;  %v2856_v38 = vadd.f32 %v249_v32, %v248_v10 }
  0x4a   :  { %v2858_v39 = vadd.f32 %v256_v33, %v255_v12  ;;  %v259_v46 = vrot.slane %v258_v63, 4  ;;  %v266_v47 = vrot.slane %v265_v13, 4  ;;  %v273_v48 = vrot.slane %v272_v35, 4 }
  0x4b   :  { %3474 = vst [vmem:[#allocation42_spill] sm:$0xff] %v2852_v36  ;;  %3475 = vst [vmem:[#allocation43_spill] sm:$0xff] %v2854_v37  ;;  %v280_v52 = vrot.slane %v279_v34, 4  ;;  %v286_v53 = vsel %vm89_vm0, %v2819_v20, 0.0  ;;  %v293_v54 = vsel %vm89_vm0, %v2824_v21, 0.0  ;;  %v300_v8 = vsel %vm89_vm0, %v2837_v14, 0.0 }
  0x4c   :  { %3476 = vst [vmem:[#allocation44_spill] sm:$0xff] %v2856_v38  ;;  %3477 = vst [vmem:[#allocation45_spill] sm:$0xff] %v2858_v39  ;;  %v307_v9 = vsel %vm89_vm0, %v2842_v30, 0.0  ;;  %v260_v10 = vadd.f32 %v259_v46, %v258_v63  ;;  %v267_v15 = vadd.f32 %v266_v47, %v265_v13  ;;  %v274_v12 = vadd.f32 %v273_v48, %v272_v35  ;;  %v2871_v46 = vld [vmem:[%s3368_s0 + $0x100] sm:$0x1f] }
  0x4d   :  { %v281_v25 = vadd.f32 %v280_v52, %v279_v34  ;;  %v287_v32 = vrot.slane %v286_v53, 4  ;;  %v294_v33 = vrot.slane %v293_v54, 4  ;;  %v301_v55 = vrot.slane %v300_v8, 4  ;;  %3478 = vst [vmem:[#allocation46_spill] sm:$0xff] %v2871_v46 }
  0x4e   :  { %v308_v45 = vrot.slane %v307_v9, 4  ;;  %v261_v39 = vrot.slane %v260_v10, 2  ;;  %v268_v38 = vrot.slane %v267_v15, 2  ;;  %v275_v20 = vrot.slane %v274_v12, 2 }
  0x4f   :  { %v282_v37 = vrot.slane %v281_v25, 2  ;;  %v288_v36 = vadd.f32 %v287_v32, %v286_v53  ;;  %v295_v21 = vadd.f32 %v294_v33, %v293_v54  ;;  %v302_v24 = vadd.f32 %v301_v55, %v300_v8  ;;  %v2881_v54 = vld [vmem:[%s3368_s0 + $0x110] sm:$0x1f]  ;;  %v2886_v55 = vld [vmem:[%s3368_s0 + $0x118] sm:$0x1f] }
  0x50   :  { %v309_v31 = vadd.f32 %v308_v45, %v307_v9  ;;  %v262_v14 = vadd.f32 %v261_v39, %v260_v10  ;;  %v269_v23 = vadd.f32 %v268_v38, %v267_v15  ;;  %v276_v22 = vadd.f32 %v275_v20, %v274_v12  ;;  %v2876_v45 = vld [vmem:[%s3368_s0 + $0x108] sm:$0x1f]  ;;  %3480 = vst [vmem:[#allocation48_spill] sm:$0xff] %v2881_v54  ;;  %v2891_v8 = vld [vmem:[%s3368_s0 + $0x120] sm:$0x1f] }
  0x51   :  { %v283_v30 = vadd.f32 %v282_v37, %v281_v25  ;;  %v289_v63 = vrot.slane %v288_v36, 2  ;;  %v296_v13 = vrot.slane %v295_v21, 2  ;;  %v303_v35 = vrot.slane %v302_v24, 2  ;;  %3479 = vst [vmem:[#allocation47_spill] sm:$0xff] %v2876_v45  ;;  %3481 = vst [vmem:[#allocation49_spill] sm:$0xff] %v2886_v55 }
  0x52   :  { %v310_v34 = vrot.slane %v309_v31, 2  ;;  %v263_v47 = vrot.slane %v262_v14, 1  ;;  %v270_v48 = vrot.slane %v269_v23, 1  ;;  %v277_v52 = vrot.slane %v276_v22, 1  ;;  %3482 = vst [vmem:[#allocation50_spill] sm:$0xff] %v2891_v8 }
  0x53   :  { %v284_v53 = vrot.slane %v283_v30, 1  ;;  %v290_v20 = vadd.f32 %v289_v63, %v288_v36  ;;  %v297_v37 = vadd.f32 %v296_v13, %v295_v21  ;;  %v304_v38 = vadd.f32 %v303_v35, %v302_v24  ;;  %v2896_v9 = vld [vmem:[%s3368_s0 + $0x128] sm:$0x1f]  ;;  %v2909_v21 = vld [vmem:[%s3368_s0 + $0x130] sm:$0x1f] }
  0x54   :  { %v311_v39 = vadd.f32 %v310_v34, %v309_v31  ;;  %3483 = vst [vmem:[#allocation51_spill] sm:$0xff] %v2896_v9  ;;  %v2898_v10 = vadd.f32 %v263_v47, %v262_v14  ;;  %v2900_v15 = vadd.f32 %v270_v48, %v269_v23  ;;  %v2902_v12 = vadd.f32 %v277_v52, %v276_v22  ;;  %v2914_v14 = vld [vmem:[%s3368_s0 + $0x138] sm:$0x1f] }
  0x55   :  { %v2904_v36 = vadd.f32 %v284_v53, %v283_v30  ;;  %3488 = vst [vmem:[#allocation56_spill] sm:$0xff] %v2909_v21  ;;  %v291_v31 = vrot.slane %v290_v20, 1  ;;  %v298_v24 = vrot.slane %v297_v37, 1  ;;  %v305_v25 = vrot.slane %v304_v38, 1  ;;  %3489 = vst [vmem:[#allocation57_spill] sm:$0xff] %v2914_v14 }
  0x56   :  { %3484 = vst [vmem:[#allocation52_spill] sm:$0xff] %v2898_v10  ;;  %3485 = vst [vmem:[#allocation53_spill] sm:$0xff] %v2900_v15  ;;  %v312_v32 = vrot.slane %v311_v39, 1  ;;  %v314_v22 = vsel %vm89_vm0, %v2871_v46, 0.0  ;;  %v321_v23 = vsel %vm89_vm0, %v2876_v45, 0.0  ;;  %v328_v30 = vsel %vm89_vm0, %v2881_v54, 0.0 }
  0x57   :  { %3486 = vst [vmem:[#allocation54_spill] sm:$0xff] %v2902_v12  ;;  %3487 = vst [vmem:[#allocation55_spill] sm:$0xff] %v2904_v36  ;;  %v335_v33 = vsel %vm89_vm0, %v2886_v55, 0.0  ;;  %v2924_v63 = vadd.f32 %v291_v31, %v290_v20  ;;  %v2926_v13 = vadd.f32 %v298_v24, %v297_v37  ;;  %v2928_v35 = vadd.f32 %v305_v25, %v304_v38 }
  0x58   :  { %v2930_v34 = vadd.f32 %v312_v32, %v311_v39  ;;  %v315_v47 = vrot.slane %v314_v22, 4  ;;  %v322_v48 = vrot.slane %v321_v23, 4  ;;  %v329_v52 = vrot.slane %v328_v30, 4 }
  0x59   :  { %3490 = vst [vmem:[#allocation58_spill] sm:$0xff] %v2924_v63  ;;  %3491 = vst [vmem:[#allocation59_spill] sm:$0xff] %v2926_v13  ;;  %v336_v53 = vrot.slane %v335_v33, 4  ;;  %v342_v45 = vsel %vm89_vm0, %v2891_v8, 0.0  ;;  %v349_v54 = vsel %vm89_vm0, %v2896_v9, 0.0  ;;  %v356_v20 = vsel %vm89_vm0, %v2909_v21, 0.0 }
  0x5a   :  { %3492 = vst [vmem:[#allocation60_spill] sm:$0xff] %v2928_v35  ;;  %3493 = vst [vmem:[#allocation61_spill] sm:$0xff] %v2930_v34  ;;  %v363_v37 = vsel %vm89_vm0, %v2914_v14, 0.0  ;;  %v316_v38 = vadd.f32 %v315_v47, %v314_v22  ;;  %v323_v31 = vadd.f32 %v322_v48, %v321_v23  ;;  %v330_v39 = vadd.f32 %v329_v52, %v328_v30  ;;  %v2943_v47 = vld [vmem:[%s3368_s0 + $0x140] sm:$0x1f] }
  0x5b   :  { %v337_v24 = vadd.f32 %v336_v53, %v335_v33  ;;  %v343_v25 = vrot.slane %v342_v45, 4  ;;  %v350_v32 = vrot.slane %v349_v54, 4  ;;  %v357_v55 = vrot.slane %v356_v20, 4  ;;  %3494 = vst [vmem:[#allocation62_spill] sm:$0xff] %v2943_v47 }
  0x5c   :  { %v364_v46 = vrot.slane %v363_v37, 4  ;;  %v317_v34 = vrot.slane %v316_v38, 2  ;;  %v324_v35 = vrot.slane %v323_v31, 2  ;;  %v331_v8 = vrot.slane %v330_v39, 2 }
  0x5d   :  { %v338_v13 = vrot.slane %v337_v24, 2  ;;  %v344_v63 = vadd.f32 %v343_v25, %v342_v45  ;;  %v351_v9 = vadd.f32 %v350_v32, %v349_v54  ;;  %v358_v36 = vadd.f32 %v357_v55, %v356_v20  ;;  %v2953_v54 = vld [vmem:[%s3368_s0 + $0x150] sm:$0x1f]  ;;  %v2958_v55 = vld [vmem:[%s3368_s0 + $0x158] sm:$0x1f] }
  0x5e   :  { %v365_v12 = vadd.f32 %v364_v46, %v363_v37  ;;  %v318_v21 = vadd.f32 %v317_v34, %v316_v38  ;;  %v325_v15 = vadd.f32 %v324_v35, %v323_v31  ;;  %v332_v10 = vadd.f32 %v331_v8, %v330_v39  ;;  %v2948_v46 = vld [vmem:[%s3368_s0 + $0x148] sm:$0x1f]  ;;  %3496 = vst [vmem:[#allocation64_spill] sm:$0xff] %v2953_v54  ;;  %v2963_v20 = vld [vmem:[%s3368_s0 + $0x160] sm:$0x1f] }
  0x5f   :  { %v339_v14 = vadd.f32 %v338_v13, %v337_v24  ;;  %v345_v22 = vrot.slane %v344_v63, 2  ;;  %v352_v23 = vrot.slane %v351_v9, 2  ;;  %v359_v30 = vrot.slane %v358_v36, 2  ;;  %3495 = vst [vmem:[#allocation63_spill] sm:$0xff] %v2948_v46  ;;  %3497 = vst [vmem:[#allocation65_spill] sm:$0xff] %v2958_v55 }
  0x60   :  { %v366_v33 = vrot.slane %v365_v12, 2  ;;  %v319_v48 = vrot.slane %v318_v21, 1  ;;  %v326_v52 = vrot.slane %v325_v15, 1  ;;  %v333_v53 = vrot.slane %v332_v10, 1  ;;  %3498 = vst [vmem:[#allocation66_spill] sm:$0xff] %v2963_v20 }
  0x61   :  { %v340_v45 = vrot.slane %v339_v14, 1  ;;  %v346_v8 = vadd.f32 %v345_v22, %v344_v63  ;;  %v353_v13 = vadd.f32 %v352_v23, %v351_v9  ;;  %v360_v35 = vadd.f32 %v359_v30, %v358_v36  ;;  %v2968_v37 = vld [vmem:[%s3368_s0 + $0x168] sm:$0x1f]  ;;  %v2981_v9 = vld [vmem:[%s3368_s0 + $0x170] sm:$0x1f] }
  0x62   :  { %v367_v34 = vadd.f32 %v366_v33, %v365_v12  ;;  %3499 = vst [vmem:[#allocation67_spill] sm:$0xff] %v2968_v37  ;;  %v2970_v38 = vadd.f32 %v319_v48, %v318_v21  ;;  %v2972_v31 = vadd.f32 %v326_v52, %v325_v15  ;;  %v2974_v39 = vadd.f32 %v333_v53, %v332_v10  ;;  %v2986_v21 = vld [vmem:[%s3368_s0 + $0x178] sm:$0x1f]  ;;  %s2569_s0 = smov [#allocation8]  }
  0x63   :  { %v2976_v63 = vadd.f32 %v340_v45, %v339_v14  ;;  %3504 = vst [vmem:[#allocation72_spill] sm:$0xff] %v2981_v9  ;;  %v347_v12 = vrot.slane %v346_v8, 1  ;;  %v354_v36 = vrot.slane %v353_v13, 1  ;;  %v361_v24 = vrot.slane %v360_v35, 1  ;;  %3505 = vst [vmem:[#allocation73_spill] sm:$0xff] %v2986_v21  ;;  %s2482_s4 = sshll.u32 %s2569_s0, 4  ;;  %s2483_s4 = int_to_ptr.vmem [resolvable:$true] %s2482_s4 }
  0x64   :  { %3500 = vst [vmem:[#allocation68_spill] sm:$0xff] %v2970_v38  ;;  %3501 = vst [vmem:[#allocation69_spill] sm:$0xff] %v2972_v31  ;;  %v368_v25 = vrot.slane %v367_v34, 1  ;;  %v370_v10 = vsel %vm89_vm0, %v2943_v47, 0.0  ;;  %v377_v15 = vsel %vm89_vm0, %v2948_v46, 0.0  ;;  %v384_v14 = vsel %vm89_vm0, %v2953_v54, 0.0  ;;  %p2544_p11 = scmp.lt.s32.totalorder %s2483_s4, %s2483_s4 }
  0x65   :  { %3502 = vst [vmem:[#allocation70_spill] sm:$0xff] %v2974_v39  ;;  %3503 = vst [vmem:[#allocation71_spill] sm:$0xff] %v2976_v63  ;;  %v391_v32 = vsel %vm89_vm0, %v2958_v55, 0.0  ;;  %v2996_v22 = vadd.f32 %v347_v12, %v346_v8  ;;  %v2998_v23 = vadd.f32 %v354_v36, %v353_v13  ;;  %v3000_v30 = vadd.f32 %v361_v24, %v360_v35  ;;  %s2539_s5 = scalar_lea.vmem %s2483_s4, 1024 }
  0x66   :  { %v3002_v33 = vadd.f32 %v368_v25, %v367_v34  ;;  %v371_v48 = vrot.slane %v370_v10, 4  ;;  %v378_v52 = vrot.slane %v377_v15, 4  ;;  %v385_v53 = vrot.slane %v384_v14, 4  ;;  %p2540_p10 = scmp.ne.s32.totalorder %s2483_s4, %s2539_s5  ;;  %p2545_p12 = scmp.lt.s32.totalorder %s2539_s5, %s2539_s5 }
  0x67   :  { %3506 = vst [vmem:[#allocation74_spill] sm:$0xff] %v2996_v22  ;;  %3507 = vst [vmem:[#allocation75_spill] sm:$0xff] %v2998_v23  ;;  %v392_v45 = vrot.slane %v391_v32, 4  ;;  %v398_v46 = vsel %vm89_vm0, %v2963_v20, 0.0  ;;  %v405_v54 = vsel %vm89_vm0, %v2968_v37, 0.0  ;;  %v412_v8 = vsel %vm89_vm0, %v2981_v9, 0.0 }
  0x68   :  { %3508 = vst [vmem:[#allocation76_spill] sm:$0xff] %v3000_v30  ;;  %3509 = vst [vmem:[#allocation77_spill] sm:$0xff] %v3002_v33  ;;  %v419_v13 = vsel %vm89_vm0, %v2986_v21, 0.0  ;;  %v372_v35 = vadd.f32 %v371_v48, %v370_v10  ;;  %v379_v12 = vadd.f32 %v378_v52, %v377_v15  ;;  %v386_v34 = vadd.f32 %v385_v53, %v384_v14  ;;  %p2546_p13 = por %p2545_p12, %p2544_p11 }
  0x69   :  { %v393_v36 = vadd.f32 %v392_v45, %v391_v32  ;;  %v399_v24 = vrot.slane %v398_v46, 4  ;;  %v406_v25 = vrot.slane %v405_v54, 4  ;;  %v413_v55 = vrot.slane %v412_v8, 4 }
  0x6a   :  { %v420_v47 = vrot.slane %v419_v13, 4  ;;  %v373_v33 = vrot.slane %v372_v35, 2  ;;  %v380_v30 = vrot.slane %v379_v12, 2  ;;  %v387_v20 = vrot.slane %v386_v34, 2  ;;  %v3571_v16 = vld [vmem:[#allocation73_spill] sm:$0xff]  ;;  %p2547_p0 = pnand %p2546_p13, %p2540_p10 }
  0x6b   :  { %v394_v23 = vrot.slane %v393_v36, 2  ;;  %v400_v22 = vadd.f32 %v399_v24, %v398_v46  ;;  %v407_v37 = vadd.f32 %v406_v25, %v405_v54  ;;  %v414_v63 = vadd.f32 %v413_v55, %v412_v8  ;;  %v3515_v24 = vld [vmem:[#allocation29_spill] sm:$0xff]  ;;  %v3545_v25 = vld [vmem:[#allocation60_spill] sm:$0xff] }
  0x6c   :  { %v421_v39 = vadd.f32 %v420_v47, %v419_v13  ;;  %v374_v9 = vadd.f32 %v373_v33, %v372_v35  ;;  %v381_v31 = vadd.f32 %v380_v30, %v379_v12  ;;  %v388_v38 = vadd.f32 %v387_v20, %v386_v34  ;;  %v3527_v13 = vld [vmem:[#allocation43_spill] sm:$0xff]  ;;  %v3551_v29 = vld [vmem:[#allocation69_spill] sm:$0xff] }
  0x6d   :  { %v395_v21 = vadd.f32 %v394_v23, %v393_v36  ;;  %v401_v10 = vrot.slane %v400_v22, 2  ;;  %v408_v15 = vrot.slane %v407_v37, 2  ;;  %v415_v14 = vrot.slane %v414_v63, 2  ;;  %v3514_v36 = vld [vmem:[#allocation16_spill] sm:$0xff] }
  0x6e   :  { %v422_v32 = vrot.slane %v421_v39, 2  ;;  %v375_v48 = vrot.slane %v374_v9, 1  ;;  %v382_v52 = vrot.slane %v381_v31, 1  ;;  %v389_v53 = vrot.slane %v388_v38, 1  ;;  %v3557_v17 = vld [vmem:[#allocation74_spill] sm:$0xff] }
  0x6f   :  { %v396_v45 = vrot.slane %v395_v21, 1  ;;  %v402_v43 = vadd.f32 %v401_v10, %v400_v22  ;;  %v409_v11 = vadd.f32 %v408_v15, %v407_v37  ;;  %v416_v42 = vadd.f32 %v415_v14, %v414_v63  ;;  %v3544_v14 = vld [vmem:[#allocation40_spill] sm:$0xff] }
  0x70   :  { %v423_v62 = vadd.f32 %v422_v32, %v421_v39  ;;  %v3012_v46 = vadd.f32 %v375_v48, %v374_v9  ;;  %v3014_v54 = vadd.f32 %v382_v52, %v381_v31  ;;  %v3016_v47 = vadd.f32 %v389_v53, %v388_v38  ;;  %v3520_v53 = vld [vmem:[#allocation21_spill] sm:$0xff]  ;;  %v3532_v52 = vld [vmem:[#allocation30_spill] sm:$0xff]  ;;  %v3533_v39 = vld [vmem:[#allocation52_spill] sm:$0xff] }
  0x71   :  { %v3018_v55 = vadd.f32 %v396_v45, %v395_v21  ;;  %v403_v20 = vrot.slane %v402_v43, 1  ;;  %v410_v23 = vrot.slane %v409_v11, 1  ;;  %v417_v30 = vrot.slane %v416_v42, 1  ;;  %v3521_v45 = vld [vmem:[#allocation38_spill] sm:$0xff]  ;;  %v3559_v32 = vld [vmem:[#allocation75_spill] sm:$0xff]  ;;  %v3566_v31 = vld [vmem:[#allocation64_spill] sm:$0xff] }
  0x72   :  { %3510 = vst [vmem:[#allocation78_spill] sm:$0xff] %v3012_v46  ;;  %3511 = vst [vmem:[#allocation79_spill] sm:$0xff] %v3014_v54  ;;  %v424_v33 = vrot.slane %v423_v62, 1  ;;  %v436_v35 = vsub.f32 %v2712_v18, %v2629_v6  ;;  %v437_v12 = vsub.f32 %v2714_v19, %v2634_v7  ;;  %v442_v34 = vsub.f32 %v2780_v40, %v2675_v56  ;;  %v3512_v18 = vld [vmem:[#allocation15_spill] sm:$0xff]  ;;  %v3513_v7 = vld [vmem:[#allocation28_spill] sm:$0xff] }
  0x73   :  { %v3028_v38 = vadd.f32 %v403_v20, %v402_v43  ;;  %v3030_v63 = vadd.f32 %v410_v23, %v409_v11  ;;  %v3032_v9 = vadd.f32 %v417_v30, %v416_v42  ;;  %v443_v6 = vsub.f32 %v2782_v41, %v2680_v57  ;;  %v3522_v56 = vld [vmem:[#allocation22_spill] sm:$0xff]  ;;  %v3523_v40 = vld [vmem:[#allocation39_spill] sm:$0xff]  ;;  %v3535_v19 = vld [vmem:[#allocation53_spill] sm:$0xff] }
  0x74   :  { %v3034_v21 = vadd.f32 %v424_v33, %v423_v62  ;;  %vm527_vm1 = vcmask 1041409   ;;  %v448_v20 = vsub.f32 %v3521_v45, %v3520_v53  ;;  %v449_v23 = vsub.f32 %v3523_v40, %v3522_v56  ;;  %v3524_v57 = vld [vmem:[#allocation23_spill] sm:$0xff]  ;;  %v3525_v41 = vld [vmem:[#allocation42_spill] sm:$0xff]  ;;  %v3526_v33 = vld [vmem:[#allocation24_spill] sm:$0xff] }
  0x75   :  { %vm530_vm2 = vcmask 1042434   ;;  %v450_v30 = vsub.f32 %v3525_v41, %v3524_v57  ;;  %vm533_vm3 = vcmask 1043459   ;;  %v454_v53 = vsub.f32 %v3533_v39, %v3532_v52  ;;  %v3534_v45 = vld [vmem:[#allocation31_spill] sm:$0xff]  ;;  %v3536_v40 = vld [vmem:[#allocation32_spill] sm:$0xff]  ;;  %v3537_v11 = vld [vmem:[#allocation54_spill] sm:$0xff] }
  0x76   :  { %v455_v56 = vsub.f32 %v3535_v19, %v3534_v45  ;;  %v456_v37 = vsub.f32 %v3537_v11, %v3536_v40  ;;  %v3538_v57 = vld [vmem:[#allocation33_spill] sm:$0xff]  ;;  %v3539_v41 = vld [vmem:[#allocation55_spill] sm:$0xff]  ;;  %vm536_vm4 = vcmask 1044484   ;;  %v460_v48 = vsub.f32 %v3545_v25, %v3544_v14  ;;  %v3548_v19 = vld [vmem:[#allocation46_spill] sm:$0xff] }
  0x77   :  { %v3546_v39 = vld [vmem:[#allocation41_spill] sm:$0xff]  ;;  %vm539_vm5 = vcmask 1045509   ;;  %v3549_v45 = vld [vmem:[#allocation68_spill] sm:$0xff]  ;;  %v3550_v40 = vld [vmem:[#allocation47_spill] sm:$0xff]  ;;  %vm542_vm6 = vcmask 1046534   ;;  %vm545_vm7 = vcmask 1047559   ;;  %v472_v43 = vsub.f32 %v3016_v47, %v3566_v31 }
  0x78   :  { %v3547_v52 = vld [vmem:[#allocation61_spill] sm:$0xff]  ;;  %v462_v11 = vsub.f32 %v3549_v45, %v3548_v19  ;;  %v3556_v42 = vld [vmem:[#allocation50_spill] sm:$0xff]  ;;  %v3558_v14 = vld [vmem:[#allocation51_spill] sm:$0xff]  ;;  %v477_v22 = vsub.f32 %v3034_v21, %v3571_v16  ;;  %v526_v8 = vrot.slane %v436_v35, 7  ;;  %v529_v5 = vrot.slane %v442_v34, 6 }
  0x79   :  { %v461_v51 = vsub.f32 %v3547_v52, %v3546_v39  ;;  %v466_v25 = vsub.f32 %v3557_v17, %v3556_v42  ;;  %v467_v39 = vsub.f32 %v3559_v32, %v3558_v14  ;;  %v3560_v52 = vld [vmem:[#allocation56_spill] sm:$0xff]  ;;  %v3562_v19 = vld [vmem:[#allocation57_spill] sm:$0xff]  ;;  %v3568_v32 = vld [vmem:[#allocation66_spill] sm:$0xff]  ;;  %v532_v4 = vrot.slane %v448_v20, 5 }
  0x7a   :  { %v3561_v62 = vld [vmem:[#allocation76_spill] sm:$0xff]  ;;  %v3563_v45 = vld [vmem:[#allocation77_spill] sm:$0xff]  ;;  %v474_v14 = vsub.f32 %v3028_v38, %v3568_v32  ;;  %v535_v54 = vrot.slane %v454_v53, 4  ;;  %v538_v47 = vrot.slane %v460_v48, 3  ;;  %v544_v46 = vrot.slane %v472_v43, 1 }
  0x7b   :  { %v468_v10 = vsub.f32 %v3561_v62, %v3560_v52  ;;  %v469_v15 = vsub.f32 %v3563_v45, %v3562_v19  ;;  %v3567_v17 = vld [vmem:[#allocation65_spill] sm:$0xff]  ;;  %v3569_v62 = vld [vmem:[#allocation67_spill] sm:$0xff]  ;;  %v3570_v19 = vld [vmem:[#allocation72_spill] sm:$0xff]  ;;  %v541_v31 = vrot.slane %v466_v25, 2  ;;  %v3572_v38 = vsub.f32 %v2682_v58, %v2599_v0 }
  0x7c   :  { %v473_v42 = vsub.f32 %v3018_v55, %v3567_v17  ;;  %v475_v52 = vsub.f32 %v3030_v63, %v3569_v62  ;;  %v547_v55 = vrot.slane %v437_v12, 7  ;;  %v549_v63 = vrot.slane %v443_v6, 6 }
  0x7d   :  { %v528_v17 = vsel %vm527_vm1, %v526_v8, %v3572_v38  ;;  %v551_v32 = vrot.slane %v449_v23, 5  ;;  %v553_v62 = vrot.slane %v455_v56, 4  ;;  %v3573_v35 = vsub.f32 %v2684_v59, %v2604_v1 }
  0x7e   :  { %v531_v45 = vsel %vm530_vm2, %v529_v5, %v528_v17  ;;  %v555_v20 = vrot.slane %v461_v51, 3  ;;  %v557_v48 = vrot.slane %v467_v39, 2  ;;  %v559_v53 = vrot.slane %v473_v42, 1 }
  0x7f   :  { %v548_v34 = vsel %vm527_vm1, %v547_v55, %v3573_v35  ;;  %v534_v43 = vsel %vm533_vm3, %v532_v4, %v531_v45  ;;  %v3574_v0 = vsub.f32 %v2754_v26, %v2655_v44  ;;  %v3575_v1 = vsub.f32 %v3513_v7, %v3512_v18  ;;  %v3584_v35 = vld [vmem:[#allocation36_spill] sm:$0xff] }
  0x80   :  { %v550_v12 = vsel %vm530_vm2, %v549_v63, %v548_v34  ;;  %v537_v8 = vsel %vm536_vm4, %v535_v54, %v534_v43  ;;  %v565_v6 = vrot.slane %v450_v30, 5  ;;  %v3576_v23 = vsub.f32 %v2686_v60, %v2609_v2  ;;  %v3591_v43 = vld [vmem:[#allocation34_spill] sm:$0xff] }
  0x81   :  { %v561_v58 = vrot.slane %v3574_v0, 7  ;;  %v552_v5 = vsel %vm533_vm3, %v551_v32, %v550_v12  ;;  %v563_v59 = vrot.slane %v3575_v1, 6  ;;  %v540_v51 = vsel %vm539_vm5, %v538_v47, %v537_v8  ;;  %v3593_v0 = vld [vmem:[#allocation17_spill] sm:$0xff]  ;;  %v3596_v8 = vld [vmem:[#allocation70_spill] sm:$0xff] }
  0x82   :  { %v554_v4 = vsel %vm536_vm4, %v553_v62, %v552_v5  ;;  %v567_v44 = vrot.slane %v456_v37, 4  ;;  %v543_v26 = vsel %vm542_vm6, %v541_v31, %v540_v51  ;;  %v569_v39 = vrot.slane %v462_v11, 3  ;;  %v3597_v5 = vld [vmem:[#allocation48_spill] sm:$0xff]  ;;  %v3600_v51 = vld [vmem:[#allocation62_spill] sm:$0xff] }
  0x83   :  { %v562_v56 = vsel %vm527_vm1, %v561_v58, %v3576_v23  ;;  %v556_v54 = vsel %vm539_vm5, %v555_v20, %v554_v4  ;;  %v546_v18 = vsel %vm545_vm7, %v544_v46, %v543_v26  ;;  %v571_v42 = vrot.slane %v468_v10, 2  ;;  %v3587_v20 = vld [vmem:[#allocation44_spill] sm:$0xff] }
  0x84   :  { %v564_v25 = vsel %vm530_vm2, %v563_v59, %v562_v56  ;;  %v558_v7 = vsel %vm542_vm6, %v557_v48, %v556_v54  ;;  %v573_v60 = vrot.slane %v474_v14, 1  ;;  %v3577_v37 = vsub.f32 %v2756_v27, %v2660_v49  ;;  %v3588_v48 = vld [vmem:[#allocation26_spill] sm:$0xff]  ;;  %v3594_v58 = vld [vmem:[#allocation12_spill] sm:$0xff] }
  0x85   :  { %v566_v30 = vsel %vm533_vm3, %v565_v6, %v564_v25  ;;  %v560_v45 = vsel %vm545_vm7, %v559_v53, %v558_v7  ;;  %v3578_v11 = vsub.f32 %v3515_v24, %v3514_v36  ;;  %v3579_v55 = vsub.f32 %v3527_v13, %v3526_v33  ;;  %v3599_v6 = vld [vmem:[#allocation78_spill] sm:$0xff]  ;;  %v3603_v25 = vld [vmem:[#allocation25_spill] sm:$0xff] }
  0x86   :  { %v568_v2 = vsel %vm536_vm4, %v567_v44, %v566_v30  ;;  %v575_v47 = vrot.slane %v3577_v37, 7  ;;  %v3580_v10 = vsub.f32 %v3539_v41, %v3538_v57  ;;  %v3581_v49 = vsub.f32 %v2688_v61, %v2614_v3  ;;  %v3585_v3 = vld [vmem:[#allocation19_spill] sm:$0xff]  ;;  %v3607_v37 = vld [vmem:[#allocation20_spill] sm:$0xff] }
  0x87   :  { %v570_v31 = vsel %vm539_vm5, %v569_v39, %v568_v2  ;;  %v577_v46 = vrot.slane %v3578_v11, 6  ;;  %v579_v38 = vrot.slane %v3579_v55, 5  ;;  %v3582_v63 = vsub.f32 %v3551_v29, %v3550_v40  ;;  %v3604_v39 = vld [vmem:[#allocation14_spill] sm:$0xff]  ;;  %v3609_v11 = vld [vmem:[#allocation45_spill] sm:$0xff] }
  0x88   :  { %v581_v17 = vrot.slane %v3580_v10, 4  ;;  %v572_v14 = vsel %vm542_vm6, %v571_v42, %v570_v31  ;;  %v576_v27 = vsel %vm527_vm1, %v575_v47, %v3581_v49  ;;  %v585_v24 = vrot.slane %v469_v15, 2  ;;  %v3590_v15 = vld [vmem:[#allocation58_spill] sm:$0xff] }
  0x89   :  { %v583_v36 = vrot.slane %v3582_v63, 3  ;;  %v574_v32 = vsel %vm545_vm7, %v573_v60, %v572_v14  ;;  %v578_v13 = vsel %vm530_vm2, %v577_v46, %v576_v27  ;;  %v587_v33 = vrot.slane %v475_v52, 1  ;;  %v3606_v60 = vld [vmem:[#allocation37_spill] sm:$0xff]  ;;  %v3610_v46 = vld [vmem:[#allocation27_spill] sm:$0xff] }
  0x8a   :  { %v3583_v57 = vsub.f32 %v2758_v28, %v2665_v50  ;;  %v580_v62 = vsel %vm533_vm3, %v579_v38, %v578_v13  ;;  %v3586_v61 = vsub.f32 %v3584_v35, %v3585_v3  ;;  %v3589_v29 = vsub.f32 %v3587_v20, %v3588_v48  ;;  %v3615_v27 = vld [vmem:[#allocation59_spill] sm:$0xff] }
  0x8b   :  { %v3592_v12 = vsub.f32 %v3590_v15, %v3591_v43  ;;  %v582_v52 = vsel %vm536_vm4, %v581_v17, %v580_v62  ;;  %v3595_v50 = vsub.f32 %v3593_v0, %v3594_v58  ;;  %v3598_v1 = vsub.f32 %v3596_v8, %v3597_v5  ;;  %v3613_v17 = vld [vmem:[#allocation13_spill] sm:$0xff]  ;;  %v3616_v63 = vld [vmem:[#allocation35_spill] sm:$0xff]  ;;  %v927_v5 = vld [vmem:[#allocation3 + $0x3c8] sm:$0xff] }
  0x8c   :  { %v589_v41 = vrot.slane %v3583_v57, 7  ;;  %v591_v34 = vrot.slane %v3586_v61, 6  ;;  %v593_v40 = vrot.slane %v3589_v29, 5  ;;  %v3601_v4 = vsub.f32 %v3599_v6, %v3600_v51  ;;  %v3619_v62 = vld [vmem:[#allocation49_spill] sm:$0xff]  ;;  %v3622_v61 = vld [vmem:[#allocation63_spill] sm:$0xff]  ;;  %1616 = vmatprep.subr.mxu0 %v927_v5  ;;  %v919_v51 = vld [vmem:[#allocation3 + $0x388] sm:$0xff] }
  0x8d   :  { %v595_v53 = vrot.slane %v3592_v12, 4  ;;  %v597_v59 = vrot.slane %v3598_v1, 3  ;;  %v584_v56 = vsel %vm539_vm5, %v583_v36, %v582_v52  ;;  %v3602_v26 = vsub.f32 %v3032_v9, %v3570_v19  ;;  %v3612_v19 = vld [vmem:[#allocation18_spill] sm:$0xff]  ;;  %v1183_v1 = vld [vmem:[#allocation3 + $0xbc8] sm:$0xff]  ;;  %v1182_v6 = vld [vmem:[#allocation3 + $0xbc0] sm:$0xff] }
  0x8e   :  { %v590_v28 = vsel %vm527_vm1, %v589_v41, %v3595_v50  ;;  %v599_v23 = vrot.slane %v3601_v4, 2  ;;  %v3605_v7 = vsub.f32 %v3603_v25, %v3604_v39  ;;  %v586_v42 = vsel %vm542_vm6, %v585_v24, %v584_v56  ;;  %v3618_v41 = vld [vmem:[#allocation71_spill] sm:$0xff]  ;;  %1687 = vmatprep.subr.mxu1 %v1183_v1  ;;  %v1175_v4 = vld [vmem:[#allocation3 + $0xb88] sm:$0xff] }
  0x8f   :  { %v592_v44 = vsel %vm530_vm2, %v591_v34, %v590_v28  ;;  %v601_v54 = vrot.slane %v3602_v26, 1  ;;  %v3608_v47 = vsub.f32 %v3606_v60, %v3607_v37  ;;  %v3611_v55 = vsub.f32 %v3609_v11, %v3610_v46  ;;  %1688 = vmatpush1.msra.mxu1 %v1182_v6  ;;  %v1174_v56 = vld [vmem:[#allocation3 + $0xb80] sm:$0xff]  ;;  %v1167_v26 = vld [vmem:[#allocation3 + $0xb48] sm:$0xff] }
  0x90   :  { %v603_v30 = vrot.slane %v3605_v7, 7  ;;  %v594_v2 = vsel %vm533_vm3, %v593_v40, %v592_v44  ;;  %v588_v10 = vsel %vm545_vm7, %v587_v33, %v586_v42  ;;  %v3614_v14 = vsub.f32 %v3612_v19, %v3613_v17  ;;  %v3621_v33 = vld [vmem:[#allocation79_spill] sm:$0xff]  ;;  %v911_v44 = vld [vmem:[#allocation3 + $0x348] sm:$0xff]  ;;  %1689 = vmatprep.subr.mxu1 %v1175_v4 }
  0x91   :  { %v605_v31 = vrot.slane %v3608_v47, 6  ;;  %v607_v38 = vrot.slane %v3611_v55, 5  ;;  %v596_v9 = vsel %vm536_vm4, %v595_v53, %v594_v2  ;;  %v3617_v36 = vsub.f32 %v3615_v27, %v3616_v63  ;;  %v1166_v25 = vld [vmem:[#allocation3 + $0xb40] sm:$0xff]  ;;  %1690 = vmatpush1.msra.mxu1 %v1174_v56  ;;  %v903_v39 = vld [vmem:[#allocation3 + $0x308] sm:$0xff] }
  0x92   :  { %v604_v49 = vsel %vm527_vm1, %v603_v30, %v3614_v14  ;;  %v598_v13 = vsel %vm539_vm5, %v597_v59, %v596_v9  ;;  %v3620_v35 = vsub.f32 %v3618_v41, %v3619_v62  ;;  %v3623_v34 = vsub.f32 %v3621_v33, %v3622_v61  ;;  %v926_v59 = vld [vmem:[#allocation3 + $0x3c0] sm:$0xff]  ;;  %v1159_v7 = vld [vmem:[#allocation3 + $0xb08] sm:$0xff]  ;;  %1691 = vmatprep.subr.mxu1 %v1167_v26 }
  0x93   :  { %v609_v24 = vrot.slane %v3617_v36, 4  ;;  %v606_v57 = vsel %vm530_vm2, %v605_v31, %v604_v49  ;;  %v600_v48 = vsel %vm542_vm6, %v599_v23, %v598_v13  ;;  %v615_v40 = vrot.slane %v477_v22, 1  ;;  %1617 = vmatpush1.msra.mxu0 %v926_v59  ;;  %v918_v23 = vld [vmem:[#allocation3 + $0x380] sm:$0xff]  ;;  %1692 = vmatpush1.msra.mxu1 %v1166_v25  ;;  %v895_v2 = vld [vmem:[#allocation3 + $0x2c8] sm:$0xff] }
  0x94   :  { %v611_v3 = vrot.slane %v3620_v35, 3  ;;  %v613_v20 = vrot.slane %v3623_v34, 2  ;;  %v608_v29 = vsel %vm533_vm3, %v607_v38, %v606_v57  ;;  %v3242_v15 = vmul.f32 0.25, %v546_v18  ;;  %1618 = vmatprep.subr.mxu0 %v919_v51  ;;  %v902_v30 = vld [vmem:[#allocation3 + $0x300] sm:$0xff]  ;;  %v1151_v60 = vld [vmem:[#allocation3 + $0xac8] sm:$0xff]  ;;  %1693 = vmatprep.subr.mxu1 %v1159_v7 }
  0x95   :  { %v610_v43 = vsel %vm536_vm4, %v609_v24, %v608_v29  ;;  %v3245_v12 = vmul.f32 0.25, %v560_v45  ;;  %v3247_v53 = vmul.f32 0.25, %v574_v32  ;;  %v602_v52 = vsel %vm545_vm7, %v601_v54, %v600_v48  ;;  %v910_v54 = vld [vmem:[#allocation3 + $0x340] sm:$0xff]  ;;  %1619 = vmatpush1.msra.mxu0 %v918_v23  ;;  %v887_v31 = vld [vmem:[#allocation3 + $0x288] sm:$0xff] }
  0x96   :  { %v612_v0 = vsel %vm539_vm5, %v611_v3, %v610_v43  ;;  %v3252_v50 = vmul.f32 0.25, %v588_v10  ;;  %v3257_v22 = vmul.f32 0.25, %v602_v52  ;;  %1620 = vmatprep.subr.mxu0 %v911_v44  ;;  %v1158_v42 = vld [vmem:[#allocation3 + $0xb00] sm:$0xff]  ;;  %v1143_v11 = vld [vmem:[#allocation3 + $0xa88] sm:$0xff] }
  0x97   :  { %v614_v58 = vsel %vm542_vm6, %v613_v20, %v612_v0  ;;  %v769_v16 = vadd.f32 %v3245_v12, %v3242_v15  ;;  %1621 = vmatpush1.msra.mxu0 %v910_v54  ;;  %v894_v37 = vld [vmem:[#allocation3 + $0x2c0] sm:$0xff]  ;;  %1694 = vmatpush1.msra.mxu1 %v1158_v42  ;;  %v879_v38 = vld [vmem:[#allocation3 + $0x248] sm:$0xff] }
  0x98   :  { %v616_v21 = vsel %vm545_vm7, %v615_v40, %v614_v58  ;;  %1622 = vmatprep.subr.mxu0 %v903_v39  ;;  %v1150_v47 = vld [vmem:[#allocation3 + $0xac0] sm:$0xff]  ;;  %1695 = vmatprep.subr.mxu1 %v1151_v60  ;;  %v1135_v10 = vld [vmem:[#allocation3 + $0xa48] sm:$0xff] }
  0x99   :  { %v770_v18 = vadd.f32 %v769_v16, %v3247_v53  ;;  %v3260_v45 = vmul.f32 0.25, %v616_v21  ;;  %1623 = vmatpush1.msra.mxu0 %v902_v30  ;;  %v886_v46 = vld [vmem:[#allocation3 + $0x280] sm:$0xff]  ;;  %1696 = vmatpush1.msra.mxu1 %v1150_v47  ;;  %v871_v17 = vld [vmem:[#allocation3 + $0x208] sm:$0xff] }
  0x9a   :  { %1624 = vmatprep.subr.mxu0 %v895_v2  ;;  %v1142_v55 = vld [vmem:[#allocation3 + $0xa80] sm:$0xff]  ;;  %1697 = vmatprep.subr.mxu1 %v1143_v11  ;;  %v1127_v14 = vld [vmem:[#allocation3 + $0xa08] sm:$0xff] }
  0x9b   :  { %v771_v32 = vadd.f32 %v770_v18, %v3252_v50  ;;  %1625 = vmatpush1.msra.mxu0 %v894_v37  ;;  %v878_v9 = vld [vmem:[#allocation3 + $0x240] sm:$0xff]  ;;  %1698 = vmatpush1.msra.mxu1 %v1142_v55  ;;  %v863_v63 = vld [vmem:[#allocation3 + $0x1c8] sm:$0xff] }
  0x9c   :  { %1626 = vmatprep.subr.mxu0 %v887_v31  ;;  %v1134_v19 = vld [vmem:[#allocation3 + $0xa40] sm:$0xff]  ;;  %1699 = vmatprep.subr.mxu1 %v1135_v10  ;;  %v1119_v36 = vld [vmem:[#allocation3 + $0x9c8] sm:$0xff] }
  0x9d   :  { %v772_v28 = vadd.f32 %v771_v32, %v3257_v22  ;;  %1627 = vmatpush1.msra.mxu0 %v886_v46  ;;  %v870_v49 = vld [vmem:[#allocation3 + $0x200] sm:$0xff]  ;;  %1700 = vmatpush1.msra.mxu1 %v1134_v19  ;;  %v855_v57 = vld [vmem:[#allocation3 + $0x188] sm:$0xff] }
  0x9e   :  { %1628 = vmatprep.subr.mxu0 %v879_v38  ;;  %v1126_v27 = vld [vmem:[#allocation3 + $0xa00] sm:$0xff]  ;;  %1701 = vmatprep.subr.mxu1 %v1127_v14  ;;  %v1111_v41 = vld [vmem:[#allocation3 + $0x988] sm:$0xff] }
  0x9f   :  { %v773_v8 = vadd.f32 %v772_v28, %v3260_v45  ;;  %1629 = vmatpush1.msra.mxu0 %v878_v9  ;;  %v862_v24 = vld [vmem:[#allocation3 + $0x1c0] sm:$0xff]  ;;  %1702 = vmatpush1.msra.mxu1 %v1126_v27  ;;  %v847_v3 = vld [vmem:[#allocation3 + $0x148] sm:$0xff] }
  0xa0   :  { %1630 = vmatprep.subr.mxu0 %v871_v17  ;;  %v1118_v13 = vld [vmem:[#allocation3 + $0x9c0] sm:$0xff]  ;;  %1703 = vmatprep.subr.mxu1 %v1119_v36  ;;  %v1103_v33 = vld [vmem:[#allocation3 + $0x948] sm:$0xff] }
  0xa1   :  { %774 = vadd.xlane.f32.xlu0 %v773_v8  ;;  %1631 = vmatpush1.msra.mxu0 %v870_v49  ;;  %v854_v62 = vld [vmem:[#allocation3 + $0x180] sm:$0xff]  ;;  %v839_v20 = vld [vmem:[#allocation3 + $0x108] sm:$0xff] }
  0xa2   :  { %1632 = vmatprep.subr.mxu0 %v863_v63  ;;  %v1110_v35 = vld [vmem:[#allocation3 + $0x980] sm:$0xff]  ;;  %1704 = vmatpush1.msra.mxu1 %v1118_v13  ;;  %v1095_v48 = vld [vmem:[#allocation3 + $0x908] sm:$0xff] }
  0xa3   :  { %1633 = vmatpush1.msra.mxu0 %v862_v24  ;;  %1705 = vmatprep.subr.mxu1 %v1111_v41  ;;  %v846_v61 = vld [vmem:[#allocation3 + $0x140] sm:$0xff]  ;;  %v831_v43 = vld [vmem:[#allocation3 + $0xc8] sm:$0xff] }
  0xa4   :  { %1634 = vmatprep.subr.mxu0 %v855_v57  ;;  %v1102_v34 = vld [vmem:[#allocation3 + $0x940] sm:$0xff]  ;;  %1706 = vmatpush1.msra.mxu1 %v1110_v35  ;;  %v1087_v52 = vld [vmem:[#allocation3 + $0x8c8] sm:$0xff] }
  0xa5   :  { %1635 = vmatpush1.msra.mxu0 %v854_v62  ;;  %1707 = vmatprep.subr.mxu1 %v1103_v33  ;;  %v838_v29 = vld [vmem:[#allocation3 + $0x100] sm:$0xff]  ;;  %v823_v16 = vld [vmem:[#allocation3 + $0x88] sm:$0xff] }
  0xa6   :  { %1636 = vmatprep.subr.mxu0 %v847_v3  ;;  %v1094_v40 = vld [vmem:[#allocation3 + $0x900] sm:$0xff]  ;;  %1708 = vmatpush1.msra.mxu1 %v1102_v34  ;;  %v1079_v21 = vld [vmem:[#allocation3 + $0x888] sm:$0xff] }
  0xa7   :  { %1637 = vmatpush1.msra.mxu0 %v846_v61  ;;  %1709 = vmatprep.subr.mxu1 %v1095_v48  ;;  %v830_v0 = vld [vmem:[#allocation3 + $0xc0] sm:$0xff]  ;;  %v815_v28 = vld [vmem:[#allocation3 + $0x48] sm:$0xff] }
  0xa8   :  { %1638 = vmatprep.subr.mxu0 %v839_v20  ;;  %v1086_v58 = vld [vmem:[#allocation3 + $0x8c0] sm:$0xff]  ;;  %1710 = vmatpush1.msra.mxu1 %v1094_v40  ;;  %v1071_v8 = vld [vmem:[#allocation3 + $0x848] sm:$0xff] }
  0xa9   :  { %1639 = vmatpush1.msra.mxu0 %v838_v29  ;;  %1711 = vmatprep.subr.mxu1 %v1087_v52  ;;  %v822_v18 = vld [vmem:[#allocation3 + $0x80] sm:$0xff]  ;;  %v807_v59 = vld [vmem:[#allocation3 + $0x8] sm:$0xff] }
  0xaa   :  { %1640 = vmatprep.subr.mxu0 %v831_v43  ;;  %v1078_v32 = vld [vmem:[#allocation3 + $0x880] sm:$0xff]  ;;  %1712 = vmatpush1.msra.mxu1 %v1086_v58  ;;  %v1063_v6 = vld [vmem:[#allocation3 + $0x808] sm:$0xff] }
  0xab   :  { %1641 = vmatpush1.msra.mxu0 %v830_v0  ;;  %1713 = vmatprep.subr.mxu1 %v1079_v21  ;;  %v814_v5 = vld [vmem:[#allocation3 + $0x40] sm:$0xff]  ;;  %v1055_v23 = vld [vmem:[#allocation3 + $0x7c8] sm:$0xff] }
  0xac   :  { %1642 = vmatprep.subr.mxu0 %v823_v16  ;;  %v1070_v1 = vld [vmem:[#allocation3 + $0x840] sm:$0xff]  ;;  %1714 = vmatpush1.msra.mxu1 %v1078_v32  ;;  %v1311_v56 = vld [vmem:[#allocation3 + $0xfc8] sm:$0xff] }
  0xad   :  { %1643 = vmatpush1.msra.mxu0 %v822_v18  ;;  %1715 = vmatprep.subr.mxu1 %v1071_v8  ;;  %v806_v51 = vld [vmem:[#allocation3] sm:$0xff]  ;;  %v1047_v54 = vld [vmem:[#allocation3 + $0x788] sm:$0xff] }
  0xae   :  { %1644 = vmatprep.subr.mxu0 %v815_v28  ;;  %v1062_v4 = vld [vmem:[#allocation3 + $0x800] sm:$0xff]  ;;  %1716 = vmatpush1.msra.mxu1 %v1070_v1  ;;  %v1303_v25 = vld [vmem:[#allocation3 + $0xf88] sm:$0xff] }
  0xaf   :  { %1645 = vmatpush1.msra.mxu0 %v814_v5  ;;  %1717 = vmatprep.subr.mxu1 %v1063_v6  ;;  %v1054_v44 = vld [vmem:[#allocation3 + $0x7c0] sm:$0xff]  ;;  %v1039_v30 = vld [vmem:[#allocation3 + $0x748] sm:$0xff] }
  0xb0   :  { %1646 = vmatprep.subr.mxu0 %v807_v59  ;;  %v1310_v26 = vld [vmem:[#allocation3 + $0xfc0] sm:$0xff]  ;;  %1718 = vmatpush1.msra.mxu1 %v1062_v4  ;;  %v1295_v42 = vld [vmem:[#allocation3 + $0xf48] sm:$0xff] }
  0xb1   :  { %1647 = vmatpush1.msra.mxu0 %v806_v51  ;;  %1719 = vmatprep.subr.mxu1 %v1311_v56  ;;  %v1046_v39 = vld [vmem:[#allocation3 + $0x780] sm:$0xff]  ;;  %v1031_v37 = vld [vmem:[#allocation3 + $0x708] sm:$0xff] }
  0xb2   :  { %1648 = vmatprep.subr.mxu0 %v1055_v23  ;;  %v1302_v7 = vld [vmem:[#allocation3 + $0xf80] sm:$0xff]  ;;  %1720 = vmatpush2.msra.mxu1 %v1310_v26  ;;  %v1287_v47 = vld [vmem:[#allocation3 + $0xf08] sm:$0xff] }
  0xb3   :  { %1649 = vmatpush2.msra.mxu0 %v1054_v44  ;;  %1721 = vmatprep.subr.mxu1 %v1303_v25  ;;  %v1038_v2 = vld [vmem:[#allocation3 + $0x740] sm:$0xff]  ;;  %v1023_v46 = vld [vmem:[#allocation3 + $0x6c8] sm:$0xff] }
  0xb4   :  { %1650 = vmatprep.subr.mxu0 %v1047_v54  ;;  %v1294_v60 = vld [vmem:[#allocation3 + $0xf40] sm:$0xff]  ;;  %1722 = vmatpush2.msra.mxu1 %v1302_v7  ;;  %v1279_v55 = vld [vmem:[#allocation3 + $0xec8] sm:$0xff] }
  0xb5   :  { %1651 = vmatpush2.msra.mxu0 %v1046_v39  ;;  %1723 = vmatprep.subr.mxu1 %v1295_v42  ;;  %v1030_v31 = vld [vmem:[#allocation3 + $0x700] sm:$0xff]  ;;  %v1015_v9 = vld [vmem:[#allocation3 + $0x688] sm:$0xff] }
  0xb6   :  { %1652 = vmatprep.subr.mxu0 %v1039_v30  ;;  %v1286_v11 = vld [vmem:[#allocation3 + $0xf00] sm:$0xff]  ;;  %1724 = vmatpush2.msra.mxu1 %v1294_v60  ;;  %v1271_v19 = vld [vmem:[#allocation3 + $0xe88] sm:$0xff] }
  0xb7   :  { %1653 = vmatpush2.msra.mxu0 %v1038_v2  ;;  %1725 = vmatprep.subr.mxu1 %v1287_v47  ;;  %v1022_v38 = vld [vmem:[#allocation3 + $0x6c0] sm:$0xff]  ;;  %v1007_v20 = vld [vmem:[#allocation3 + $0x648] sm:$0xff] }
  0xb8   :  { %1654 = vmatprep.subr.mxu0 %v1031_v37  ;;  %v1278_v10 = vld [vmem:[#allocation3 + $0xec0] sm:$0xff]  ;;  %1726 = vmatpush2.msra.mxu1 %v1286_v11  ;;  %v1263_v48 = vld [vmem:[#allocation3 + $0xe48] sm:$0xff] }
  0xb9   :  { %1655 = vmatpush2.msra.mxu0 %v1030_v31  ;;  %1727 = vmatprep.subr.mxu1 %v1279_v55  ;;  %v1014_v17 = vld [vmem:[#allocation3 + $0x680] sm:$0xff]  ;;  %v999_v40 = vld [vmem:[#allocation3 + $0x608] sm:$0xff] }
  0xba   :  { %1656 = vmatprep.subr.mxu0 %v1023_v46  ;;  %v1270_v14 = vld [vmem:[#allocation3 + $0xe80] sm:$0xff]  ;;  %1728 = vmatpush2.msra.mxu1 %v1278_v10  ;;  %v1255_v43 = vld [vmem:[#allocation3 + $0xe08] sm:$0xff] }
  0xbb   :  { %1657 = vmatpush2.msra.mxu0 %v1022_v38  ;;  %1729 = vmatprep.subr.mxu1 %v1271_v19  ;;  %v1262_v29 = vld [vmem:[#allocation3 + $0xe40] sm:$0xff]  ;;  %v991_v58 = vld [vmem:[#allocation3 + $0x5c8] sm:$0xff] }
  0xbc   :  { %1658 = vmatprep.subr.mxu0 %v1015_v9  ;;  %1730 = vmatpush2.msra.mxu1 %v1270_v14  ;;  %v998_v52 = vld [vmem:[#allocation3 + $0x600] sm:$0xff]  ;;  %v1247_v16 = vld [vmem:[#allocation3 + $0xdc8] sm:$0xff]  ;;  %v929_v9 = vld [vmem:[#allocation3 + $0x3d8] sm:$0xff] }
  0xbd   :  { %1659 = vmatpush2.msra.mxu0 %v1014_v17  ;;  %1731 = vmatprep.subr.mxu1 %v1263_v48  ;;  %v1254_v0 = vld [vmem:[#allocation3 + $0xe00] sm:$0xff]  ;;  %v983_v32 = vld [vmem:[#allocation3 + $0x588] sm:$0xff]  ;;  %v904_v48 = vld [vmem:[#allocation3 + $0x310] sm:$0xff] }
  0xbe   :  { %1660 = vmatprep.subr.mxu0 %v1007_v20  ;;  %1732 = vmatpush2.msra.mxu1 %v1262_v29  ;;  %v990_v21 = vld [vmem:[#allocation3 + $0x5c0] sm:$0xff]  ;;  %v1239_v28 = vld [vmem:[#allocation3 + $0xd88] sm:$0xff]  ;;  %v897_v29 = vld [vmem:[#allocation3 + $0x2d8] sm:$0xff] }
  0xbf   :  { %1733 = vmatprep.subr.mxu1 %v1255_v43  ;;  %v1246_v18 = vld [vmem:[#allocation3 + $0xdc0] sm:$0xff]  ;;  %v975_v1 = vld [vmem:[#allocation3 + $0x548] sm:$0xff]  ;;  %v896_v43 = vld [vmem:[#allocation3 + $0x2d0] sm:$0xff] }
  0xc0   :  { %1734 = vmatpush2.msra.mxu1 %v1254_v0  ;;  %v982_v8 = vld [vmem:[#allocation3 + $0x580] sm:$0xff]  ;;  %v1231_v59 = vld [vmem:[#allocation3 + $0xd48] sm:$0xff]  ;;  %v889_v0 = vld [vmem:[#allocation3 + $0x298] sm:$0xff] }
  0xc1   :  { %1735 = vmatprep.subr.mxu1 %v1247_v16  ;;  %v1238_v5 = vld [vmem:[#allocation3 + $0xd80] sm:$0xff]  ;;  %v967_v4 = vld [vmem:[#allocation3 + $0x508] sm:$0xff]  ;;  %v888_v16 = vld [vmem:[#allocation3 + $0x290] sm:$0xff] }
  0xc2   :  { %1736 = vmatpush2.msra.mxu1 %v1246_v18  ;;  %v974_v6 = vld [vmem:[#allocation3 + $0x540] sm:$0xff]  ;;  %v1223_v23 = vld [vmem:[#allocation3 + $0xd08] sm:$0xff]  ;;  %v881_v18 = vld [vmem:[#allocation3 + $0x258] sm:$0xff] }
  0xc3   :  { %1737 = vmatprep.subr.mxu1 %v1239_v28  ;;  %v1230_v51 = vld [vmem:[#allocation3 + $0xd40] sm:$0xff]  ;;  %v959_v26 = vld [vmem:[#allocation3 + $0x4c8] sm:$0xff]  ;;  %v880_v28 = vld [vmem:[#allocation3 + $0x250] sm:$0xff] }
  0xc4   :  { %1738 = vmatpush2.msra.mxu1 %v1238_v5  ;;  %v966_v56 = vld [vmem:[#allocation3 + $0x500] sm:$0xff]  ;;  %v1215_v54 = vld [vmem:[#allocation3 + $0xcc8] sm:$0xff]  ;;  %v873_v5 = vld [vmem:[#allocation3 + $0x218] sm:$0xff] }
  0xc5   :  { %1739 = vmatprep.subr.mxu1 %v1231_v59  ;;  %v1222_v44 = vld [vmem:[#allocation3 + $0xd00] sm:$0xff]  ;;  %v951_v7 = vld [vmem:[#allocation3 + $0x488] sm:$0xff]  ;;  %v872_v59 = vld [vmem:[#allocation3 + $0x210] sm:$0xff] }
  0xc6   :  { %1740 = vmatpush2.msra.mxu1 %v1230_v51  ;;  %v958_v25 = vld [vmem:[#allocation3 + $0x4c0] sm:$0xff]  ;;  %v1207_v30 = vld [vmem:[#allocation3 + $0xc88] sm:$0xff]  ;;  %v865_v51 = vld [vmem:[#allocation3 + $0x1d8] sm:$0xff] }
  0xc7   :  { %1741 = vmatprep.subr.mxu1 %v1223_v23  ;;  %v1214_v39 = vld [vmem:[#allocation3 + $0xcc0] sm:$0xff]  ;;  %v943_v60 = vld [vmem:[#allocation3 + $0x448] sm:$0xff]  ;;  %v864_v23 = vld [vmem:[#allocation3 + $0x1d0] sm:$0xff] }
  0xc8   :  { %1742 = vmatpush2.msra.mxu1 %v1222_v44  ;;  %v950_v42 = vld [vmem:[#allocation3 + $0x480] sm:$0xff]  ;;  %v1199_v37 = vld [vmem:[#allocation3 + $0xc48] sm:$0xff]  ;;  %v857_v44 = vld [vmem:[#allocation3 + $0x198] sm:$0xff] }
  0xc9   :  { %1743 = vmatprep.subr.mxu1 %v1215_v54  ;;  %v1206_v2 = vld [vmem:[#allocation3 + $0xc80] sm:$0xff]  ;;  %v935_v11 = vld [vmem:[#allocation3 + $0x408] sm:$0xff]  ;;  %v856_v54 = vld [vmem:[#allocation3 + $0x190] sm:$0xff] }
  0xca   :  { %1744 = vmatpush2.msra.mxu1 %v1214_v39  ;;  %v942_v47 = vld [vmem:[#allocation3 + $0x440] sm:$0xff]  ;;  %v1191_v46 = vld [vmem:[#allocation3 + $0xc08] sm:$0xff]  ;;  %v849_v39 = vld [vmem:[#allocation3 + $0x158] sm:$0xff] }
  0xcb   :  { %1745 = vmatprep.subr.mxu1 %v1207_v30  ;;  %v1198_v31 = vld [vmem:[#allocation3 + $0xc40] sm:$0xff]  ;;  %v1439_v10 = vld [vmem:[#allocation3 + $0x13c8] sm:$0xff]  ;;  %v848_v30 = vld [vmem:[#allocation3 + $0x150] sm:$0xff] }
  0xcc   :  { %1746 = vmatpush2.msra.mxu1 %v1206_v2  ;;  %v934_v55 = vld [vmem:[#allocation3 + $0x400] sm:$0xff]  ;;  %v841_v2 = vld [vmem:[#allocation3 + $0x118] sm:$0xff] }
  0xcd   :  { %1747 = vmatprep.subr.mxu1 %v1199_v37  ;;  %v1190_v38 = vld [vmem:[#allocation3 + $0xc00] sm:$0xff]  ;;  %v840_v37 = vld [vmem:[#allocation3 + $0x110] sm:$0xff] }
  0xce   :  { %1748 = vmatpush2.msra.mxu1 %v1198_v31  ;;  %v1414_v20 = vld [vmem:[#allocation3 + $0x1300] sm:$0xff]  ;;  %v833_v31 = vld [vmem:[#allocation3 + $0xd8] sm:$0xff] }
  0xcf   :  { %1749 = vmatprep.subr.mxu1 %v1191_v46  ;;  %v832_v46 = vld [vmem:[#allocation3 + $0xd0] sm:$0xff] }
  0xd0   :  { %1750 = vmatpush2.msra.mxu1 %v1190_v38  ;;  %v825_v38 = vld [vmem:[#allocation3 + $0x98] sm:$0xff] }
  0xd1   :  { %1829 = vmatprep.subr.mxu1 %v929_v9  ;;  %v824_v9 = vld [vmem:[#allocation3 + $0x90] sm:$0xff] }
 0x12a   :  { %v775_v49 = vpop.xlane.xlu0 %774 }
 0x12b   :  { %v777_v27 = vmul.f32 0.0013020834, %v775_v49 }
 0x12d   :  { %v3266_v63 = vsub.f32 %v3242_v15, %v777_v27  ;;  %v3269_v36 = vsub.f32 %v3245_v12, %v777_v27  ;;  %v3272_v24 = vsub.f32 %v3247_v53, %v777_v27  ;;  %v3275_v13 = vsub.f32 %v3252_v50, %v777_v27 }
 0x12e   :  { %v3282_v62 = vsub.f32 %v3257_v22, %v777_v27  ;;  %v3287_v35 = vsub.f32 %v3260_v45, %v777_v27  ;;  %v1006_v45 = vld [vmem:[#allocation3 + $0x640] sm:$0xff] }
 0x12f   :  { %v784_v57 = vmul.f32 %v3266_v63, %v3266_v63  ;;  %v785_v41 = vmul.f32 %v3269_v36, %v3269_v36  ;;  %v786_v15 = vmul.f32 %v3272_v24, %v3272_v24  ;;  %v787_v53 = vmul.f32 %v3275_v13, %v3275_v13  ;;  %1661 = vmatpush2.msra.mxu0 %v1006_v45  ;;  %v1407_v45 = vld [vmem:[#allocation3 + $0x12c8] sm:$0xff] }
 0x130   :  { %v788_v3 = vmul.f32 %v3282_v62, %v3282_v62  ;;  %v789_v61 = vmul.f32 %v3287_v35, %v3287_v35  ;;  %1662 = vmatprep.subr.mxu0 %v999_v40  ;;  %v1406_v40 = vld [vmem:[#allocation3 + $0x12c0] sm:$0xff] }
 0x131   :  { %v790_v12 = vadd.f32 %v785_v41, %v784_v57  ;;  %1663 = vmatpush2.msra.mxu0 %v998_v52  ;;  %v1399_v52 = vld [vmem:[#allocation3 + $0x1288] sm:$0xff] }
 0x132   :  { %1664 = vmatprep.subr.mxu0 %v991_v58  ;;  %v1398_v58 = vld [vmem:[#allocation3 + $0x1280] sm:$0xff] }
 0x133   :  { %v791_v50 = vadd.f32 %v790_v12, %v786_v15  ;;  %1665 = vmatpush2.msra.mxu0 %v990_v21  ;;  %v1438_v12 = vld [vmem:[#allocation3 + $0x13c0] sm:$0xff]  ;;  %v1391_v21 = vld [vmem:[#allocation3 + $0x1248] sm:$0xff] }
 0x134   :  { %1666 = vmatprep.subr.mxu0 %v983_v32  ;;  %v1390_v32 = vld [vmem:[#allocation3 + $0x1240] sm:$0xff] }
 0x135   :  { %v792_v33 = vadd.f32 %v791_v50, %v787_v53  ;;  %1667 = vmatpush2.msra.mxu0 %v982_v8  ;;  %v928_v53 = vld [vmem:[#allocation3 + $0x3d0] sm:$0xff]  ;;  %v1383_v8 = vld [vmem:[#allocation3 + $0x1208] sm:$0xff] }
 0x136   :  { %1668 = vmatprep.subr.mxu0 %v975_v1  ;;  %v920_v50 = vld [vmem:[#allocation3 + $0x390] sm:$0xff]  ;;  %v1382_v1 = vld [vmem:[#allocation3 + $0x1200] sm:$0xff] }
 0x137   :  { %v793_v22 = vadd.f32 %v792_v33, %v788_v3  ;;  %1669 = vmatpush2.msra.mxu0 %v974_v6  ;;  %v1423_v3 = vld [vmem:[#allocation3 + $0x1348] sm:$0xff]  ;;  %v913_v33 = vld [vmem:[#allocation3 + $0x358] sm:$0xff] }
 0x138   :  { %1670 = vmatprep.subr.mxu0 %v967_v4  ;;  %v1375_v6 = vld [vmem:[#allocation3 + $0x11c8] sm:$0xff]  ;;  %v1374_v4 = vld [vmem:[#allocation3 + $0x11c0] sm:$0xff] }
 0x139   :  { %v794_v34 = vadd.f32 %v793_v22, %v789_v61  ;;  %1671 = vmatpush2.msra.mxu0 %v966_v56  ;;  %v1422_v61 = vld [vmem:[#allocation3 + $0x1340] sm:$0xff]  ;;  %v912_v22 = vld [vmem:[#allocation3 + $0x350] sm:$0xff]  ;;  %v1367_v56 = vld [vmem:[#allocation3 + $0x1188] sm:$0xff] }
 0x13a   :  { %1672 = vmatprep.subr.mxu0 %v959_v26  ;;  %v1366_v26 = vld [vmem:[#allocation3 + $0x1180] sm:$0xff] }
 0x13b   :  { %795 = vadd.xlane.f32.xlu0 %v794_v34  ;;  %1673 = vmatpush2.msra.mxu0 %v958_v25  ;;  %v1415_v34 = vld [vmem:[#allocation3 + $0x1308] sm:$0xff] }
 0x13c   :  { %1674 = vmatprep.subr.mxu0 %v951_v7  ;;  %v1359_v25 = vld [vmem:[#allocation3 + $0x1148] sm:$0xff]  ;;  %v1358_v7 = vld [vmem:[#allocation3 + $0x1140] sm:$0xff] }
 0x13d   :  { %1675 = vmatpush2.msra.mxu0 %v950_v42  ;;  %v1351_v42 = vld [vmem:[#allocation3 + $0x1108] sm:$0xff] }
 0x13e   :  { %1676 = vmatprep.subr.mxu0 %v943_v60  ;;  %v1350_v60 = vld [vmem:[#allocation3 + $0x1100] sm:$0xff] }
 0x13f   :  { %1677 = vmatpush2.msra.mxu0 %v942_v47  ;;  %v1343_v47 = vld [vmem:[#allocation3 + $0x10c8] sm:$0xff] }
 0x140   :  { %1678 = vmatprep.subr.mxu0 %v935_v11  ;;  %v1342_v11 = vld [vmem:[#allocation3 + $0x10c0] sm:$0xff] }
 0x141   :  { %1679 = vmatpush2.msra.mxu0 %v934_v55  ;;  %v1335_v55 = vld [vmem:[#allocation3 + $0x1088] sm:$0xff] }
 0x142   :  { %1758 = vmatprep.subr.mxu0 %v1439_v10  ;;  %v1334_v10 = vld [vmem:[#allocation3 + $0x1080] sm:$0xff] }
 0x1c4   :  { %v796_v19 = vpop.xlane.xlu0 %795 }
 0x1c5   :  { %v797_v17 = vmul.f32 0.0013020834, %v796_v19  ;;  %v1327_v19 = vld [vmem:[#allocation3 + $0x1048] sm:$0xff] }
 0x1c7   :  { %v798_v14 = vadd.f32 1e-06, %v797_v17  ;;  %v817_v17 = vld [vmem:[#allocation3 + $0x58] sm:$0xff] }
 0x1c9   :  { %2497 = vrsqrt.f32 %v798_v14  ;;  %v1326_v14 = vld [vmem:[#allocation3 + $0x1040] sm:$0xff] }
 0x1d6   :  { %v3295_v49 = vpop.eup %2497 }
 0x1d7   :  { %v3299_v27 = vmul.f32 %v3295_v49, %v3269_v36  ;;  %v3303_v57 = vmul.f32 %v3295_v49, %v3275_v13  ;;  %v3307_v41 = vmul.f32 %v3295_v49, %v3266_v63  ;;  %v3311_v15 = vmul.f32 %v3295_v49, %v3272_v24  ;;  %v1431_v36 = vld [vmem:[#allocation3 + $0x1388] sm:$0xff]  ;;  %v921_v63 = vld [vmem:[#allocation3 + $0x398] sm:$0xff]  ;;  %v1430_v24 = vld [vmem:[#allocation3 + $0x1380] sm:$0xff] }
 0x1d8   :  { %v3319_v13 = vmul.f32 %v3295_v49, %v3287_v35  ;;  %v905_v35 = vld [vmem:[#allocation3 + $0x318] sm:$0xff] }
 0x1d9   :  { %1680 = vmatprep.mubr.f32.mxu0 %v3299_v27  ;;  %1751 = vmatprep.mubr.f32.mxu1 %v3303_v57 }
 0x1da   :  { %1681 = vmatmul.mubr.f32.vlgmr.msra.gmra.mxu0 %v3307_v41  ;;  %1752 = vmatmul.mubr.f32.vlgmr.msra.gmra.mxu1 %v3311_v15 }
 0x1db   :  { %1759 = vmatpush1.msra.mxu0 %v1438_v12  ;;  %1830 = vmatpush1.msra.mxu1 %v928_v53  ;;  %v816_v12 = vld [vmem:[#allocation3 + $0x50] sm:$0xff]  ;;  %v1319_v53 = vld [vmem:[#allocation3 + $0x1008] sm:$0xff] }
 0x1dc   :  { %1760 = vmatprep.subr.mxu0 %v1431_v36  ;;  %1822 = vmatprep.mubr.f32.mxu0 %v3319_v13  ;;  %v809_v36 = vld [vmem:[#allocation3 + $0x18] sm:$0xff] }
 0x1dd   :  { %1831 = vmatprep.subr.mxu1 %v921_v63  ;;  %1893 = vmatprep.mubr.f32.mxu1 %v3299_v27  ;;  %v1318_v63 = vld [vmem:[#allocation3 + $0x1000] sm:$0xff] }
 0x1de   :  { %1761 = vmatpush1.msra.mxu0 %v1430_v24  ;;  %1832 = vmatpush1.msra.mxu1 %v920_v50  ;;  %v808_v24 = vld [vmem:[#allocation3 + $0x10] sm:$0xff]  ;;  %v1567_v50 = vld [vmem:[#allocation3 + $0x17c8] sm:$0xff] }
 0x1df   :  { %1762 = vmatprep.subr.mxu0 %v1423_v3  ;;  %1833 = vmatprep.subr.mxu1 %v913_v33  ;;  %v1057_v3 = vld [vmem:[#allocation3 + $0x7d8] sm:$0xff]  ;;  %v1566_v33 = vld [vmem:[#allocation3 + $0x17c0] sm:$0xff] }
 0x1e0   :  { %1763 = vmatpush1.msra.mxu0 %v1422_v61  ;;  %1834 = vmatpush1.msra.mxu1 %v912_v22  ;;  %v1056_v61 = vld [vmem:[#allocation3 + $0x7d0] sm:$0xff]  ;;  %v1559_v22 = vld [vmem:[#allocation3 + $0x1788] sm:$0xff] }
 0x1e1   :  { %1764 = vmatprep.subr.mxu0 %v1415_v34  ;;  %1835 = vmatprep.subr.mxu1 %v905_v35  ;;  %v1049_v34 = vld [vmem:[#allocation3 + $0x798] sm:$0xff]  ;;  %v1558_v35 = vld [vmem:[#allocation3 + $0x1780] sm:$0xff] }
 0x1e2   :  { %1765 = vmatpush1.msra.mxu0 %v1414_v20  ;;  %1836 = vmatpush1.msra.mxu1 %v904_v48  ;;  %v1048_v20 = vld [vmem:[#allocation3 + $0x790] sm:$0xff]  ;;  %v1551_v48 = vld [vmem:[#allocation3 + $0x1748] sm:$0xff] }
 0x1e3   :  { %1766 = vmatprep.subr.mxu0 %v1407_v45  ;;  %1837 = vmatprep.subr.mxu1 %v897_v29  ;;  %v1041_v45 = vld [vmem:[#allocation3 + $0x758] sm:$0xff]  ;;  %v1550_v29 = vld [vmem:[#allocation3 + $0x1740] sm:$0xff] }
 0x1e4   :  { %1767 = vmatpush1.msra.mxu0 %v1406_v40  ;;  %1838 = vmatpush1.msra.mxu1 %v896_v43  ;;  %v1040_v40 = vld [vmem:[#allocation3 + $0x750] sm:$0xff]  ;;  %v1543_v43 = vld [vmem:[#allocation3 + $0x1708] sm:$0xff] }
 0x1e5   :  { %1768 = vmatprep.subr.mxu0 %v1399_v52  ;;  %1839 = vmatprep.subr.mxu1 %v889_v0  ;;  %v1033_v52 = vld [vmem:[#allocation3 + $0x718] sm:$0xff]  ;;  %v1542_v0 = vld [vmem:[#allocation3 + $0x1700] sm:$0xff] }
 0x1e6   :  { %1769 = vmatpush1.msra.mxu0 %v1398_v58  ;;  %1840 = vmatpush1.msra.mxu1 %v888_v16  ;;  %v1032_v58 = vld [vmem:[#allocation3 + $0x710] sm:$0xff]  ;;  %v1535_v16 = vld [vmem:[#allocation3 + $0x16c8] sm:$0xff] }
 0x1e7   :  { %1770 = vmatprep.subr.mxu0 %v1391_v21  ;;  %1841 = vmatprep.subr.mxu1 %v881_v18  ;;  %v1025_v21 = vld [vmem:[#allocation3 + $0x6d8] sm:$0xff]  ;;  %v1534_v18 = vld [vmem:[#allocation3 + $0x16c0] sm:$0xff] }
 0x1e8   :  { %1771 = vmatpush1.msra.mxu0 %v1390_v32  ;;  %1842 = vmatpush1.msra.mxu1 %v880_v28  ;;  %v1024_v32 = vld [vmem:[#allocation3 + $0x6d0] sm:$0xff]  ;;  %v1527_v28 = vld [vmem:[#allocation3 + $0x1688] sm:$0xff] }
 0x1e9   :  { %1772 = vmatprep.subr.mxu0 %v1383_v8  ;;  %1843 = vmatprep.subr.mxu1 %v873_v5  ;;  %v1017_v8 = vld [vmem:[#allocation3 + $0x698] sm:$0xff]  ;;  %v1526_v5 = vld [vmem:[#allocation3 + $0x1680] sm:$0xff] }
 0x1ea   :  { %1773 = vmatpush1.msra.mxu0 %v1382_v1  ;;  %1844 = vmatpush1.msra.mxu1 %v872_v59  ;;  %v1016_v1 = vld [vmem:[#allocation3 + $0x690] sm:$0xff]  ;;  %v1519_v59 = vld [vmem:[#allocation3 + $0x1648] sm:$0xff] }
 0x1eb   :  { %1774 = vmatprep.subr.mxu0 %v1375_v6  ;;  %1845 = vmatprep.subr.mxu1 %v865_v51  ;;  %v1009_v6 = vld [vmem:[#allocation3 + $0x658] sm:$0xff]  ;;  %v1518_v51 = vld [vmem:[#allocation3 + $0x1640] sm:$0xff] }
 0x1ec   :  { %1775 = vmatpush1.msra.mxu0 %v1374_v4  ;;  %1846 = vmatpush1.msra.mxu1 %v864_v23  ;;  %v1008_v4 = vld [vmem:[#allocation3 + $0x650] sm:$0xff]  ;;  %v1511_v23 = vld [vmem:[#allocation3 + $0x1608] sm:$0xff] }
 0x1ed   :  { %1776 = vmatprep.subr.mxu0 %v1367_v56  ;;  %1847 = vmatprep.subr.mxu1 %v857_v44  ;;  %v1001_v56 = vld [vmem:[#allocation3 + $0x618] sm:$0xff]  ;;  %v1510_v44 = vld [vmem:[#allocation3 + $0x1600] sm:$0xff] }
 0x1ee   :  { %1777 = vmatpush1.msra.mxu0 %v1366_v26  ;;  %1848 = vmatpush1.msra.mxu1 %v856_v54  ;;  %v1000_v26 = vld [vmem:[#allocation3 + $0x610] sm:$0xff]  ;;  %v1503_v54 = vld [vmem:[#allocation3 + $0x15c8] sm:$0xff] }
 0x1ef   :  { %1778 = vmatprep.subr.mxu0 %v1359_v25  ;;  %1849 = vmatprep.subr.mxu1 %v849_v39  ;;  %v993_v25 = vld [vmem:[#allocation3 + $0x5d8] sm:$0xff]  ;;  %v1502_v39 = vld [vmem:[#allocation3 + $0x15c0] sm:$0xff] }
 0x1f0   :  { %1779 = vmatpush1.msra.mxu0 %v1358_v7  ;;  %1850 = vmatpush1.msra.mxu1 %v848_v30  ;;  %v992_v7 = vld [vmem:[#allocation3 + $0x5d0] sm:$0xff]  ;;  %v1495_v30 = vld [vmem:[#allocation3 + $0x1588] sm:$0xff] }
 0x1f1   :  { %1780 = vmatprep.subr.mxu0 %v1351_v42  ;;  %1851 = vmatprep.subr.mxu1 %v841_v2  ;;  %v985_v42 = vld [vmem:[#allocation3 + $0x598] sm:$0xff]  ;;  %v1494_v2 = vld [vmem:[#allocation3 + $0x1580] sm:$0xff] }
 0x1f2   :  { %1781 = vmatpush1.msra.mxu0 %v1350_v60  ;;  %1852 = vmatpush1.msra.mxu1 %v840_v37  ;;  %v984_v60 = vld [vmem:[#allocation3 + $0x590] sm:$0xff]  ;;  %v1487_v37 = vld [vmem:[#allocation3 + $0x1548] sm:$0xff] }
 0x1f3   :  { %1782 = vmatprep.subr.mxu0 %v1343_v47  ;;  %1853 = vmatprep.subr.mxu1 %v833_v31  ;;  %v977_v47 = vld [vmem:[#allocation3 + $0x558] sm:$0xff]  ;;  %v1486_v31 = vld [vmem:[#allocation3 + $0x1540] sm:$0xff] }
 0x1f4   :  { %1783 = vmatpush1.msra.mxu0 %v1342_v11  ;;  %1854 = vmatpush1.msra.mxu1 %v832_v46  ;;  %v976_v11 = vld [vmem:[#allocation3 + $0x550] sm:$0xff]  ;;  %v1479_v46 = vld [vmem:[#allocation3 + $0x1508] sm:$0xff] }
 0x1f5   :  { %1784 = vmatprep.subr.mxu0 %v1335_v55  ;;  %1855 = vmatprep.subr.mxu1 %v825_v38  ;;  %v969_v55 = vld [vmem:[#allocation3 + $0x518] sm:$0xff]  ;;  %v1478_v38 = vld [vmem:[#allocation3 + $0x1500] sm:$0xff] }
 0x1f6   :  { %1785 = vmatpush1.msra.mxu0 %v1334_v10  ;;  %1856 = vmatpush1.msra.mxu1 %v824_v9  ;;  %v968_v10 = vld [vmem:[#allocation3 + $0x510] sm:$0xff]  ;;  %v1471_v9 = vld [vmem:[#allocation3 + $0x14c8] sm:$0xff] }
 0x1f7   :  { %1786 = vmatprep.subr.mxu0 %v1327_v19  ;;  %1857 = vmatprep.subr.mxu1 %v817_v17  ;;  %v961_v19 = vld [vmem:[#allocation3 + $0x4d8] sm:$0xff]  ;;  %v1470_v17 = vld [vmem:[#allocation3 + $0x14c0] sm:$0xff] }
 0x1f8   :  { %1787 = vmatpush1.msra.mxu0 %v1326_v14  ;;  %1858 = vmatpush1.msra.mxu1 %v816_v12  ;;  %v960_v14 = vld [vmem:[#allocation3 + $0x4d0] sm:$0xff]  ;;  %v1463_v12 = vld [vmem:[#allocation3 + $0x1488] sm:$0xff] }
 0x1f9   :  { %1788 = vmatprep.subr.mxu0 %v1319_v53  ;;  %1859 = vmatprep.subr.mxu1 %v809_v36  ;;  %v953_v53 = vld [vmem:[#allocation3 + $0x498] sm:$0xff]  ;;  %v1462_v36 = vld [vmem:[#allocation3 + $0x1480] sm:$0xff] }
 0x1fa   :  { %1789 = vmatpush1.msra.mxu0 %v1318_v63  ;;  %1860 = vmatpush1.msra.mxu1 %v808_v24  ;;  %v952_v63 = vld [vmem:[#allocation3 + $0x490] sm:$0xff]  ;;  %v1455_v24 = vld [vmem:[#allocation3 + $0x1448] sm:$0xff] }
 0x1fb   :  { %1790 = vmatprep.subr.mxu0 %v1567_v50  ;;  %1861 = vmatprep.subr.mxu1 %v1057_v3  ;;  %v945_v50 = vld [vmem:[#allocation3 + $0x458] sm:$0xff]  ;;  %v1454_v3 = vld [vmem:[#allocation3 + $0x1440] sm:$0xff] }
 0x1fc   :  { %1791 = vmatpush2.msra.mxu0 %v1566_v33  ;;  %1862 = vmatpush2.msra.mxu1 %v1056_v61  ;;  %v944_v33 = vld [vmem:[#allocation3 + $0x450] sm:$0xff]  ;;  %v1447_v61 = vld [vmem:[#allocation3 + $0x1408] sm:$0xff] }
 0x1fd   :  { %1792 = vmatprep.subr.mxu0 %v1559_v22  ;;  %1863 = vmatprep.subr.mxu1 %v1049_v34  ;;  %v937_v22 = vld [vmem:[#allocation3 + $0x418] sm:$0xff]  ;;  %v1446_v34 = vld [vmem:[#allocation3 + $0x1400] sm:$0xff] }
 0x1fe   :  { %1793 = vmatpush2.msra.mxu0 %v1558_v35  ;;  %1864 = vmatpush2.msra.mxu1 %v1048_v20  ;;  %v936_v35 = vld [vmem:[#allocation3 + $0x410] sm:$0xff]  ;;  %v3325_v20 = vmul.f32 %v3295_v49, %v3282_v62  ;;  %v1169_v49 = vld [vmem:[#allocation3 + $0xb58] sm:$0xff] }
 0x1ff   :  { %1794 = vmatprep.subr.mxu0 %v1551_v48  ;;  %1865 = vmatprep.subr.mxu1 %v1041_v45  ;;  %v1185_v48 = vld [vmem:[#allocation3 + $0xbd8] sm:$0xff]  ;;  %v1432_v62 = vld [vmem:[#allocation3 + $0x1390] sm:$0xff] }
 0x200   :  { %1795 = vmatpush2.msra.mxu0 %v1550_v29  ;;  %1866 = vmatpush2.msra.mxu1 %v1040_v40  ;;  %v1441_v45 = vld [vmem:[#allocation3 + $0x13d8] sm:$0xff]  ;;  %v1184_v29 = vld [vmem:[#allocation3 + $0xbd0] sm:$0xff] }
 0x201   :  { %1796 = vmatprep.subr.mxu0 %v1543_v43  ;;  %1867 = vmatprep.subr.mxu1 %v1033_v52  ;;  %v1440_v40 = vld [vmem:[#allocation3 + $0x13d0] sm:$0xff]  ;;  %v1177_v43 = vld [vmem:[#allocation3 + $0xb98] sm:$0xff] }
 0x202   :  { %1797 = vmatpush2.msra.mxu0 %v1542_v0  ;;  %1868 = vmatpush2.msra.mxu1 %v1032_v58  ;;  %v1433_v52 = vld [vmem:[#allocation3 + $0x1398] sm:$0xff]  ;;  %v1176_v0 = vld [vmem:[#allocation3 + $0xb90] sm:$0xff] }
 0x203   :  { %1798 = vmatprep.subr.mxu0 %v1535_v16  ;;  %1869 = vmatprep.subr.mxu1 %v1025_v21  ;;  %v1425_v58 = vld [vmem:[#allocation3 + $0x1358] sm:$0xff]  ;;  %v1168_v16 = vld [vmem:[#allocation3 + $0xb50] sm:$0xff] }
 0x204   :  { %1799 = vmatpush2.msra.mxu0 %v1534_v18  ;;  %1870 = vmatpush2.msra.mxu1 %v1024_v32  ;;  %v1424_v21 = vld [vmem:[#allocation3 + $0x1350] sm:$0xff]  ;;  %v1161_v18 = vld [vmem:[#allocation3 + $0xb18] sm:$0xff] }
 0x205   :  { %1800 = vmatprep.subr.mxu0 %v1527_v28  ;;  %1871 = vmatprep.subr.mxu1 %v1017_v8  ;;  %v1417_v32 = vld [vmem:[#allocation3 + $0x1318] sm:$0xff]  ;;  %v1160_v28 = vld [vmem:[#allocation3 + $0xb10] sm:$0xff] }
 0x206   :  { %1801 = vmatpush2.msra.mxu0 %v1526_v5  ;;  %1872 = vmatpush2.msra.mxu1 %v1016_v1  ;;  %v1416_v8 = vld [vmem:[#allocation3 + $0x1310] sm:$0xff]  ;;  %v1153_v5 = vld [vmem:[#allocation3 + $0xad8] sm:$0xff] }
 0x207   :  { %1802 = vmatprep.subr.mxu0 %v1519_v59  ;;  %1873 = vmatprep.subr.mxu1 %v1009_v6  ;;  %v1409_v1 = vld [vmem:[#allocation3 + $0x12d8] sm:$0xff]  ;;  %v1152_v59 = vld [vmem:[#allocation3 + $0xad0] sm:$0xff] }
 0x208   :  { %1803 = vmatpush2.msra.mxu0 %v1518_v51  ;;  %1874 = vmatpush2.msra.mxu1 %v1008_v4  ;;  %v1408_v6 = vld [vmem:[#allocation3 + $0x12d0] sm:$0xff]  ;;  %v1145_v51 = vld [vmem:[#allocation3 + $0xa98] sm:$0xff] }
 0x209   :  { %1804 = vmatprep.subr.mxu0 %v1511_v23  ;;  %1875 = vmatprep.subr.mxu1 %v1001_v56  ;;  %v1401_v4 = vld [vmem:[#allocation3 + $0x1298] sm:$0xff]  ;;  %v1144_v23 = vld [vmem:[#allocation3 + $0xa90] sm:$0xff] }
 0x20a   :  { %1805 = vmatpush2.msra.mxu0 %v1510_v44  ;;  %1876 = vmatpush2.msra.mxu1 %v1000_v26  ;;  %v1400_v56 = vld [vmem:[#allocation3 + $0x1290] sm:$0xff]  ;;  %v1137_v44 = vld [vmem:[#allocation3 + $0xa58] sm:$0xff] }
 0x20b   :  { %1806 = vmatprep.subr.mxu0 %v1503_v54  ;;  %1877 = vmatprep.subr.mxu1 %v993_v25  ;;  %v1393_v26 = vld [vmem:[#allocation3 + $0x1258] sm:$0xff]  ;;  %v1136_v54 = vld [vmem:[#allocation3 + $0xa50] sm:$0xff] }
 0x20c   :  { %1807 = vmatpush2.msra.mxu0 %v1502_v39  ;;  %1878 = vmatpush2.msra.mxu1 %v992_v7  ;;  %v1392_v25 = vld [vmem:[#allocation3 + $0x1250] sm:$0xff]  ;;  %v1129_v39 = vld [vmem:[#allocation3 + $0xa18] sm:$0xff] }
 0x20d   :  { %1808 = vmatprep.subr.mxu0 %v1495_v30  ;;  %1879 = vmatprep.subr.mxu1 %v985_v42  ;;  %v1385_v7 = vld [vmem:[#allocation3 + $0x1218] sm:$0xff]  ;;  %v1128_v30 = vld [vmem:[#allocation3 + $0xa10] sm:$0xff] }
 0x20e   :  { %1809 = vmatpush2.msra.mxu0 %v1494_v2  ;;  %1880 = vmatpush2.msra.mxu1 %v984_v60  ;;  %v1384_v42 = vld [vmem:[#allocation3 + $0x1210] sm:$0xff]  ;;  %v1121_v2 = vld [vmem:[#allocation3 + $0x9d8] sm:$0xff] }
 0x20f   :  { %1810 = vmatprep.subr.mxu0 %v1487_v37  ;;  %1881 = vmatprep.subr.mxu1 %v977_v47  ;;  %v1377_v60 = vld [vmem:[#allocation3 + $0x11d8] sm:$0xff]  ;;  %v1120_v37 = vld [vmem:[#allocation3 + $0x9d0] sm:$0xff] }
 0x210   :  { %1811 = vmatpush2.msra.mxu0 %v1486_v31  ;;  %1882 = vmatpush2.msra.mxu1 %v976_v11  ;;  %v1376_v47 = vld [vmem:[#allocation3 + $0x11d0] sm:$0xff]  ;;  %v1113_v31 = vld [vmem:[#allocation3 + $0x998] sm:$0xff] }
 0x211   :  { %1812 = vmatprep.subr.mxu0 %v1479_v46  ;;  %1883 = vmatprep.subr.mxu1 %v969_v55  ;;  %v1369_v11 = vld [vmem:[#allocation3 + $0x1198] sm:$0xff]  ;;  %v1112_v46 = vld [vmem:[#allocation3 + $0x990] sm:$0xff] }
 0x212   :  { %1813 = vmatpush2.msra.mxu0 %v1478_v38  ;;  %1884 = vmatpush2.msra.mxu1 %v968_v10  ;;  %v1368_v55 = vld [vmem:[#allocation3 + $0x1190] sm:$0xff]  ;;  %v1105_v38 = vld [vmem:[#allocation3 + $0x958] sm:$0xff] }
 0x213   :  { %1814 = vmatprep.subr.mxu0 %v1471_v9  ;;  %1885 = vmatprep.subr.mxu1 %v961_v19  ;;  %v1361_v10 = vld [vmem:[#allocation3 + $0x1158] sm:$0xff]  ;;  %v1104_v9 = vld [vmem:[#allocation3 + $0x950] sm:$0xff] }
 0x214   :  { %1815 = vmatpush2.msra.mxu0 %v1470_v17  ;;  %1886 = vmatpush2.msra.mxu1 %v960_v14  ;;  %v1360_v19 = vld [vmem:[#allocation3 + $0x1150] sm:$0xff]  ;;  %v1097_v17 = vld [vmem:[#allocation3 + $0x918] sm:$0xff] }
 0x215   :  { %1816 = vmatprep.subr.mxu0 %v1463_v12  ;;  %1887 = vmatprep.subr.mxu1 %v953_v53  ;;  %v1353_v14 = vld [vmem:[#allocation3 + $0x1118] sm:$0xff]  ;;  %v1096_v12 = vld [vmem:[#allocation3 + $0x910] sm:$0xff] }
 0x216   :  { %1817 = vmatpush2.msra.mxu0 %v1462_v36  ;;  %1888 = vmatpush2.msra.mxu1 %v952_v63  ;;  %v1352_v53 = vld [vmem:[#allocation3 + $0x1110] sm:$0xff]  ;;  %v1089_v36 = vld [vmem:[#allocation3 + $0x8d8] sm:$0xff] }
 0x217   :  { %1818 = vmatprep.subr.mxu0 %v1455_v24  ;;  %1889 = vmatprep.subr.mxu1 %v945_v50  ;;  %v1345_v63 = vld [vmem:[#allocation3 + $0x10d8] sm:$0xff]  ;;  %v1088_v24 = vld [vmem:[#allocation3 + $0x8d0] sm:$0xff] }
 0x218   :  { %1819 = vmatpush2.msra.mxu0 %v1454_v3  ;;  %1890 = vmatpush2.msra.mxu1 %v944_v33  ;;  %v1344_v50 = vld [vmem:[#allocation3 + $0x10d0] sm:$0xff]  ;;  %v1081_v3 = vld [vmem:[#allocation3 + $0x898] sm:$0xff] }
 0x219   :  { %1820 = vmatprep.subr.mxu0 %v1447_v61  ;;  %1891 = vmatprep.subr.mxu1 %v937_v22  ;;  %v1337_v33 = vld [vmem:[#allocation3 + $0x1098] sm:$0xff]  ;;  %v1080_v61 = vld [vmem:[#allocation3 + $0x890] sm:$0xff] }
 0x21a   :  { %1821 = vmatpush2.msra.mxu0 %v1446_v34  ;;  %1892 = vmatpush2.msra.mxu1 %v936_v35  ;;  %v1336_v22 = vld [vmem:[#allocation3 + $0x1090] sm:$0xff]  ;;  %v1073_v34 = vld [vmem:[#allocation3 + $0x858] sm:$0xff] }
 0x21b   :  { %1823 = vmatmul.mubr.f32.vlgmr.msra.gmra.mxu0 %v3325_v20  ;;  %1894 = vmatmul.mubr.f32.vlgmr.msra.gmra.mxu1 %v3307_v41  ;;  %v1329_v35 = vld [vmem:[#allocation3 + $0x1058] sm:$0xff] }
 0x21c   :  { %1900 = vmatprep.subr.mxu0 %v1185_v48  ;;  %1971 = vmatprep.subr.mxu1 %v1441_v45  ;;  %v1072_v48 = vld [vmem:[#allocation3 + $0x850] sm:$0xff] }
 0x21d   :  { %1901 = vmatpush1.msra.mxu0 %v1184_v29  ;;  %1964 = vmatprep.mubr.f32.mxu0 %v3303_v57  ;;  %v1328_v45 = vld [vmem:[#allocation3 + $0x1050] sm:$0xff]  ;;  %v1065_v29 = vld [vmem:[#allocation3 + $0x818] sm:$0xff] }
 0x21e   :  { %1972 = vmatpush1.msra.mxu1 %v1440_v40  ;;  %2035 = vmatprep.mubr.f32.mxu1 %v3319_v13  ;;  %v1321_v40 = vld [vmem:[#allocation3 + $0x1018] sm:$0xff] }
 0x21f   :  { %1902 = vmatprep.subr.mxu0 %v1177_v43  ;;  %1973 = vmatprep.subr.mxu1 %v1433_v52  ;;  %v1064_v43 = vld [vmem:[#allocation3 + $0x810] sm:$0xff] }
 0x220   :  { %1903 = vmatpush1.msra.mxu0 %v1176_v0  ;;  %1974 = vmatpush1.msra.mxu1 %v1432_v62  ;;  %v1320_v52 = vld [vmem:[#allocation3 + $0x1010] sm:$0xff]  ;;  %v1313_v0 = vld [vmem:[#allocation3 + $0xfd8] sm:$0xff] }
 0x221   :  { %1904 = vmatprep.subr.mxu0 %v1169_v49  ;;  %1975 = vmatprep.subr.mxu1 %v1425_v58  ;;  %v1569_v62 = vld [vmem:[#allocation3 + $0x17d8] sm:$0xff]  ;;  %v1312_v49 = vld [vmem:[#allocation3 + $0xfd0] sm:$0xff] }
 0x222   :  { %1905 = vmatpush1.msra.mxu0 %v1168_v16  ;;  %1976 = vmatpush1.msra.mxu1 %v1424_v21  ;;  %v1568_v58 = vld [vmem:[#allocation3 + $0x17d0] sm:$0xff]  ;;  %v1305_v16 = vld [vmem:[#allocation3 + $0xf98] sm:$0xff] }
 0x223   :  { %1906 = vmatprep.subr.mxu0 %v1161_v18  ;;  %1977 = vmatprep.subr.mxu1 %v1417_v32  ;;  %v1561_v21 = vld [vmem:[#allocation3 + $0x1798] sm:$0xff]  ;;  %v1304_v18 = vld [vmem:[#allocation3 + $0xf90] sm:$0xff] }
 0x224   :  { %1907 = vmatpush1.msra.mxu0 %v1160_v28  ;;  %1978 = vmatpush1.msra.mxu1 %v1416_v8  ;;  %v1560_v32 = vld [vmem:[#allocation3 + $0x1790] sm:$0xff]  ;;  %v1297_v28 = vld [vmem:[#allocation3 + $0xf58] sm:$0xff] }
 0x225   :  { %1908 = vmatprep.subr.mxu0 %v1153_v5  ;;  %1979 = vmatprep.subr.mxu1 %v1409_v1  ;;  %v1553_v8 = vld [vmem:[#allocation3 + $0x1758] sm:$0xff]  ;;  %v1296_v5 = vld [vmem:[#allocation3 + $0xf50] sm:$0xff] }
 0x226   :  { %1909 = vmatpush1.msra.mxu0 %v1152_v59  ;;  %1980 = vmatpush1.msra.mxu1 %v1408_v6  ;;  %v1552_v1 = vld [vmem:[#allocation3 + $0x1750] sm:$0xff]  ;;  %v1289_v59 = vld [vmem:[#allocation3 + $0xf18] sm:$0xff] }
 0x227   :  { %1910 = vmatprep.subr.mxu0 %v1145_v51  ;;  %1981 = vmatprep.subr.mxu1 %v1401_v4  ;;  %v1545_v6 = vld [vmem:[#allocation3 + $0x1718] sm:$0xff]  ;;  %v1288_v51 = vld [vmem:[#allocation3 + $0xf10] sm:$0xff] }
 0x228   :  { %1911 = vmatpush1.msra.mxu0 %v1144_v23  ;;  %1982 = vmatpush1.msra.mxu1 %v1400_v56  ;;  %v1544_v4 = vld [vmem:[#allocation3 + $0x1710] sm:$0xff]  ;;  %v1281_v23 = vld [vmem:[#allocation3 + $0xed8] sm:$0xff] }
 0x229   :  { %1912 = vmatprep.subr.mxu0 %v1137_v44  ;;  %1983 = vmatprep.subr.mxu1 %v1393_v26  ;;  %v1537_v56 = vld [vmem:[#allocation3 + $0x16d8] sm:$0xff]  ;;  %v1280_v44 = vld [vmem:[#allocation3 + $0xed0] sm:$0xff] }
 0x22a   :  { %1913 = vmatpush1.msra.mxu0 %v1136_v54  ;;  %1984 = vmatpush1.msra.mxu1 %v1392_v25  ;;  %v1536_v26 = vld [vmem:[#allocation3 + $0x16d0] sm:$0xff]  ;;  %v1273_v54 = vld [vmem:[#allocation3 + $0xe98] sm:$0xff] }
 0x22b   :  { %1914 = vmatprep.subr.mxu0 %v1129_v39  ;;  %1985 = vmatprep.subr.mxu1 %v1385_v7  ;;  %v1529_v25 = vld [vmem:[#allocation3 + $0x1698] sm:$0xff]  ;;  %v1272_v39 = vld [vmem:[#allocation3 + $0xe90] sm:$0xff] }
 0x22c   :  { %1915 = vmatpush1.msra.mxu0 %v1128_v30  ;;  %1986 = vmatpush1.msra.mxu1 %v1384_v42  ;;  %v1528_v7 = vld [vmem:[#allocation3 + $0x1690] sm:$0xff]  ;;  %v1265_v30 = vld [vmem:[#allocation3 + $0xe58] sm:$0xff] }
 0x22d   :  { %1916 = vmatprep.subr.mxu0 %v1121_v2  ;;  %1987 = vmatprep.subr.mxu1 %v1377_v60  ;;  %v1521_v42 = vld [vmem:[#allocation3 + $0x1658] sm:$0xff]  ;;  %v1264_v2 = vld [vmem:[#allocation3 + $0xe50] sm:$0xff] }
 0x22e   :  { %1917 = vmatpush1.msra.mxu0 %v1120_v37  ;;  %1988 = vmatpush1.msra.mxu1 %v1376_v47  ;;  %v1520_v60 = vld [vmem:[#allocation3 + $0x1650] sm:$0xff]  ;;  %v1257_v37 = vld [vmem:[#allocation3 + $0xe18] sm:$0xff] }
 0x22f   :  { %1918 = vmatprep.subr.mxu0 %v1113_v31  ;;  %1989 = vmatprep.subr.mxu1 %v1369_v11  ;;  %v1513_v47 = vld [vmem:[#allocation3 + $0x1618] sm:$0xff]  ;;  %v1256_v31 = vld [vmem:[#allocation3 + $0xe10] sm:$0xff] }
 0x230   :  { %1919 = vmatpush1.msra.mxu0 %v1112_v46  ;;  %1990 = vmatpush1.msra.mxu1 %v1368_v55  ;;  %v1512_v11 = vld [vmem:[#allocation3 + $0x1610] sm:$0xff]  ;;  %v1249_v46 = vld [vmem:[#allocation3 + $0xdd8] sm:$0xff] }
 0x231   :  { %1920 = vmatprep.subr.mxu0 %v1105_v38  ;;  %1991 = vmatprep.subr.mxu1 %v1361_v10  ;;  %v1505_v55 = vld [vmem:[#allocation3 + $0x15d8] sm:$0xff]  ;;  %v1248_v38 = vld [vmem:[#allocation3 + $0xdd0] sm:$0xff] }
 0x232   :  { %1921 = vmatpush1.msra.mxu0 %v1104_v9  ;;  %1992 = vmatpush1.msra.mxu1 %v1360_v19  ;;  %v1504_v10 = vld [vmem:[#allocation3 + $0x15d0] sm:$0xff]  ;;  %v1241_v9 = vld [vmem:[#allocation3 + $0xd98] sm:$0xff] }
 0x233   :  { %1922 = vmatprep.subr.mxu0 %v1097_v17  ;;  %1993 = vmatprep.subr.mxu1 %v1353_v14  ;;  %v1497_v19 = vld [vmem:[#allocation3 + $0x1598] sm:$0xff]  ;;  %v1240_v17 = vld [vmem:[#allocation3 + $0xd90] sm:$0xff] }
 0x234   :  { %1923 = vmatpush1.msra.mxu0 %v1096_v12  ;;  %1994 = vmatpush1.msra.mxu1 %v1352_v53  ;;  %v1496_v14 = vld [vmem:[#allocation3 + $0x1590] sm:$0xff]  ;;  %v1233_v12 = vld [vmem:[#allocation3 + $0xd58] sm:$0xff] }
 0x235   :  { %1924 = vmatprep.subr.mxu0 %v1089_v36  ;;  %1995 = vmatprep.subr.mxu1 %v1345_v63  ;;  %v1489_v53 = vld [vmem:[#allocation3 + $0x1558] sm:$0xff]  ;;  %v1232_v36 = vld [vmem:[#allocation3 + $0xd50] sm:$0xff] }
 0x236   :  { %1925 = vmatpush1.msra.mxu0 %v1088_v24  ;;  %1996 = vmatpush1.msra.mxu1 %v1344_v50  ;;  %v1488_v63 = vld [vmem:[#allocation3 + $0x1550] sm:$0xff]  ;;  %v1225_v24 = vld [vmem:[#allocation3 + $0xd18] sm:$0xff] }
 0x237   :  { %1926 = vmatprep.subr.mxu0 %v1081_v3  ;;  %1997 = vmatprep.subr.mxu1 %v1337_v33  ;;  %v1481_v50 = vld [vmem:[#allocation3 + $0x1518] sm:$0xff]  ;;  %v1224_v3 = vld [vmem:[#allocation3 + $0xd10] sm:$0xff] }
 0x238   :  { %1927 = vmatpush1.msra.mxu0 %v1080_v61  ;;  %1998 = vmatpush1.msra.mxu1 %v1336_v22  ;;  %v1480_v33 = vld [vmem:[#allocation3 + $0x1510] sm:$0xff]  ;;  %v1217_v61 = vld [vmem:[#allocation3 + $0xcd8] sm:$0xff] }
 0x239   :  { %1928 = vmatprep.subr.mxu0 %v1073_v34  ;;  %1999 = vmatprep.subr.mxu1 %v1329_v35  ;;  %v1473_v22 = vld [vmem:[#allocation3 + $0x14d8] sm:$0xff]  ;;  %v1216_v34 = vld [vmem:[#allocation3 + $0xcd0] sm:$0xff] }
 0x23a   :  { %1929 = vmatpush1.msra.mxu0 %v1072_v48  ;;  %2000 = vmatpush1.msra.mxu1 %v1328_v45  ;;  %v1472_v35 = vld [vmem:[#allocation3 + $0x14d0] sm:$0xff]  ;;  %v1209_v48 = vld [vmem:[#allocation3 + $0xc98] sm:$0xff] }
 0x23b   :  { %1930 = vmatprep.subr.mxu0 %v1065_v29  ;;  %2001 = vmatprep.subr.mxu1 %v1321_v40  ;;  %v1465_v45 = vld [vmem:[#allocation3 + $0x1498] sm:$0xff]  ;;  %v1208_v29 = vld [vmem:[#allocation3 + $0xc90] sm:$0xff] }
 0x23c   :  { %1931 = vmatpush1.msra.mxu0 %v1064_v43  ;;  %2002 = vmatpush1.msra.mxu1 %v1320_v52  ;;  %v1464_v40 = vld [vmem:[#allocation3 + $0x1490] sm:$0xff]  ;;  %v1201_v43 = vld [vmem:[#allocation3 + $0xc58] sm:$0xff] }
 0x23d   :  { %1932 = vmatprep.subr.mxu0 %v1313_v0  ;;  %2003 = vmatprep.subr.mxu1 %v1569_v62  ;;  %v1457_v52 = vld [vmem:[#allocation3 + $0x1458] sm:$0xff]  ;;  %v1200_v0 = vld [vmem:[#allocation3 + $0xc50] sm:$0xff] }
 0x23e   :  { %1933 = vmatpush2.msra.mxu0 %v1312_v49  ;;  %2004 = vmatpush2.msra.mxu1 %v1568_v58  ;;  %v1456_v62 = vld [vmem:[#allocation3 + $0x1450] sm:$0xff]  ;;  %v1193_v49 = vld [vmem:[#allocation3 + $0xc18] sm:$0xff] }
 0x23f   :  { %1934 = vmatprep.subr.mxu0 %v1305_v16  ;;  %2005 = vmatprep.subr.mxu1 %v1561_v21  ;;  %v1449_v58 = vld [vmem:[#allocation3 + $0x1418] sm:$0xff]  ;;  %v1192_v16 = vld [vmem:[#allocation3 + $0xc10] sm:$0xff] }
 0x240   :  { %1935 = vmatpush2.msra.mxu0 %v1304_v18  ;;  %2006 = vmatpush2.msra.mxu1 %v1560_v32  ;;  %v1448_v21 = vld [vmem:[#allocation3 + $0x1410] sm:$0xff]  ;;  %v931_v18 = vld [vmem:[#allocation3 + $0x3e8] sm:$0xff] }
 0x241   :  { %1936 = vmatprep.subr.mxu0 %v1297_v28  ;;  %2007 = vmatprep.subr.mxu1 %v1553_v8  ;;  %v1187_v32 = vld [vmem:[#allocation3 + $0xbe8] sm:$0xff]  ;;  %v930_v28 = vld [vmem:[#allocation3 + $0x3e0] sm:$0xff] }
 0x242   :  { %1937 = vmatpush2.msra.mxu0 %v1296_v5  ;;  %2008 = vmatpush2.msra.mxu1 %v1552_v1  ;;  %v1186_v8 = vld [vmem:[#allocation3 + $0xbe0] sm:$0xff]  ;;  %v923_v5 = vld [vmem:[#allocation3 + $0x3a8] sm:$0xff] }
 0x243   :  { %1938 = vmatprep.subr.mxu0 %v1289_v59  ;;  %2009 = vmatprep.subr.mxu1 %v1545_v6  ;;  %v1179_v1 = vld [vmem:[#allocation3 + $0xba8] sm:$0xff]  ;;  %v922_v59 = vld [vmem:[#allocation3 + $0x3a0] sm:$0xff] }
 0x244   :  { %1939 = vmatpush2.msra.mxu0 %v1288_v51  ;;  %2010 = vmatpush2.msra.mxu1 %v1544_v4  ;;  %v1178_v6 = vld [vmem:[#allocation3 + $0xba0] sm:$0xff]  ;;  %v915_v51 = vld [vmem:[#allocation3 + $0x368] sm:$0xff] }
 0x245   :  { %1940 = vmatprep.subr.mxu0 %v1281_v23  ;;  %2011 = vmatprep.subr.mxu1 %v1537_v56  ;;  %v1171_v4 = vld [vmem:[#allocation3 + $0xb68] sm:$0xff]  ;;  %v914_v23 = vld [vmem:[#allocation3 + $0x360] sm:$0xff] }
 0x246   :  { %1941 = vmatpush2.msra.mxu0 %v1280_v44  ;;  %2012 = vmatpush2.msra.mxu1 %v1536_v26  ;;  %v1170_v56 = vld [vmem:[#allocation3 + $0xb60] sm:$0xff]  ;;  %v907_v44 = vld [vmem:[#allocation3 + $0x328] sm:$0xff] }
 0x247   :  { %1942 = vmatprep.subr.mxu0 %v1273_v54  ;;  %2013 = vmatprep.subr.mxu1 %v1529_v25  ;;  %v1163_v26 = vld [vmem:[#allocation3 + $0xb28] sm:$0xff]  ;;  %v906_v54 = vld [vmem:[#allocation3 + $0x320] sm:$0xff] }
 0x248   :  { %1943 = vmatpush2.msra.mxu0 %v1272_v39  ;;  %2014 = vmatpush2.msra.mxu1 %v1528_v7  ;;  %v1162_v25 = vld [vmem:[#allocation3 + $0xb20] sm:$0xff]  ;;  %v899_v39 = vld [vmem:[#allocation3 + $0x2e8] sm:$0xff] }
 0x249   :  { %1944 = vmatprep.subr.mxu0 %v1265_v30  ;;  %2015 = vmatprep.subr.mxu1 %v1521_v42  ;;  %v1155_v7 = vld [vmem:[#allocation3 + $0xae8] sm:$0xff]  ;;  %v898_v30 = vld [vmem:[#allocation3 + $0x2e0] sm:$0xff] }
 0x24a   :  { %1945 = vmatpush2.msra.mxu0 %v1264_v2  ;;  %2016 = vmatpush2.msra.mxu1 %v1520_v60  ;;  %v1154_v42 = vld [vmem:[#allocation3 + $0xae0] sm:$0xff]  ;;  %v891_v2 = vld [vmem:[#allocation3 + $0x2a8] sm:$0xff] }
 0x24b   :  { %1946 = vmatprep.subr.mxu0 %v1257_v37  ;;  %2017 = vmatprep.subr.mxu1 %v1513_v47  ;;  %v1147_v60 = vld [vmem:[#allocation3 + $0xaa8] sm:$0xff]  ;;  %v890_v37 = vld [vmem:[#allocation3 + $0x2a0] sm:$0xff] }
 0x24c   :  { %1947 = vmatpush2.msra.mxu0 %v1256_v31  ;;  %2018 = vmatpush2.msra.mxu1 %v1512_v11  ;;  %v1146_v47 = vld [vmem:[#allocation3 + $0xaa0] sm:$0xff]  ;;  %v883_v31 = vld [vmem:[#allocation3 + $0x268] sm:$0xff] }
 0x24d   :  { %1948 = vmatprep.subr.mxu0 %v1249_v46  ;;  %2019 = vmatprep.subr.mxu1 %v1505_v55  ;;  %v1139_v11 = vld [vmem:[#allocation3 + $0xa68] sm:$0xff]  ;;  %v882_v46 = vld [vmem:[#allocation3 + $0x260] sm:$0xff] }
 0x24e   :  { %1949 = vmatpush2.msra.mxu0 %v1248_v38  ;;  %2020 = vmatpush2.msra.mxu1 %v1504_v10  ;;  %v1138_v55 = vld [vmem:[#allocation3 + $0xa60] sm:$0xff]  ;;  %v875_v38 = vld [vmem:[#allocation3 + $0x228] sm:$0xff] }
 0x24f   :  { %1950 = vmatprep.subr.mxu0 %v1241_v9  ;;  %2021 = vmatprep.subr.mxu1 %v1497_v19  ;;  %v1131_v10 = vld [vmem:[#allocation3 + $0xa28] sm:$0xff]  ;;  %v874_v9 = vld [vmem:[#allocation3 + $0x220] sm:$0xff] }
 0x250   :  { %1951 = vmatpush2.msra.mxu0 %v1240_v17  ;;  %2022 = vmatpush2.msra.mxu1 %v1496_v14  ;;  %v1130_v19 = vld [vmem:[#allocation3 + $0xa20] sm:$0xff]  ;;  %v867_v17 = vld [vmem:[#allocation3 + $0x1e8] sm:$0xff] }
 0x251   :  { %1952 = vmatprep.subr.mxu0 %v1233_v12  ;;  %2023 = vmatprep.subr.mxu1 %v1489_v53  ;;  %v1123_v14 = vld [vmem:[#allocation3 + $0x9e8] sm:$0xff]  ;;  %v866_v12 = vld [vmem:[#allocation3 + $0x1e0] sm:$0xff] }
 0x252   :  { %1953 = vmatpush2.msra.mxu0 %v1232_v36  ;;  %2024 = vmatpush2.msra.mxu1 %v1488_v63  ;;  %v1122_v53 = vld [vmem:[#allocation3 + $0x9e0] sm:$0xff]  ;;  %v859_v36 = vld [vmem:[#allocation3 + $0x1a8] sm:$0xff] }
 0x253   :  { %1954 = vmatprep.subr.mxu0 %v1225_v24  ;;  %2025 = vmatprep.subr.mxu1 %v1481_v50  ;;  %v1115_v63 = vld [vmem:[#allocation3 + $0x9a8] sm:$0xff]  ;;  %v858_v24 = vld [vmem:[#allocation3 + $0x1a0] sm:$0xff] }
 0x254   :  { %1955 = vmatpush2.msra.mxu0 %v1224_v3  ;;  %2026 = vmatpush2.msra.mxu1 %v1480_v33  ;;  %v1114_v50 = vld [vmem:[#allocation3 + $0x9a0] sm:$0xff]  ;;  %v851_v3 = vld [vmem:[#allocation3 + $0x168] sm:$0xff] }
 0x255   :  { %1956 = vmatprep.subr.mxu0 %v1217_v61  ;;  %2027 = vmatprep.subr.mxu1 %v1473_v22  ;;  %v1107_v33 = vld [vmem:[#allocation3 + $0x968] sm:$0xff]  ;;  %v850_v61 = vld [vmem:[#allocation3 + $0x160] sm:$0xff] }
 0x256   :  { %1957 = vmatpush2.msra.mxu0 %v1216_v34  ;;  %2028 = vmatpush2.msra.mxu1 %v1472_v35  ;;  %v1106_v22 = vld [vmem:[#allocation3 + $0x960] sm:$0xff]  ;;  %v843_v34 = vld [vmem:[#allocation3 + $0x128] sm:$0xff] }
 0x257   :  { %1958 = vmatprep.subr.mxu0 %v1209_v48  ;;  %2029 = vmatprep.subr.mxu1 %v1465_v45  ;;  %v1099_v35 = vld [vmem:[#allocation3 + $0x928] sm:$0xff]  ;;  %v842_v48 = vld [vmem:[#allocation3 + $0x120] sm:$0xff] }
 0x258   :  { %1959 = vmatpush2.msra.mxu0 %v1208_v29  ;;  %2030 = vmatpush2.msra.mxu1 %v1464_v40  ;;  %v1098_v45 = vld [vmem:[#allocation3 + $0x920] sm:$0xff]  ;;  %v835_v29 = vld [vmem:[#allocation3 + $0xe8] sm:$0xff] }
 0x259   :  { %1960 = vmatprep.subr.mxu0 %v1201_v43  ;;  %2031 = vmatprep.subr.mxu1 %v1457_v52  ;;  %v1091_v40 = vld [vmem:[#allocation3 + $0x8e8] sm:$0xff]  ;;  %v834_v43 = vld [vmem:[#allocation3 + $0xe0] sm:$0xff] }
 0x25a   :  { %1961 = vmatpush2.msra.mxu0 %v1200_v0  ;;  %2032 = vmatpush2.msra.mxu1 %v1456_v62  ;;  %v1090_v52 = vld [vmem:[#allocation3 + $0x8e0] sm:$0xff]  ;;  %v827_v0 = vld [vmem:[#allocation3 + $0xa8] sm:$0xff] }
 0x25b   :  { %1962 = vmatprep.subr.mxu0 %v1193_v49  ;;  %2033 = vmatprep.subr.mxu1 %v1449_v58  ;;  %v1083_v62 = vld [vmem:[#allocation3 + $0x8a8] sm:$0xff]  ;;  %v826_v49 = vld [vmem:[#allocation3 + $0xa0] sm:$0xff] }
 0x25c   :  { %1963 = vmatpush2.msra.mxu0 %v1192_v16  ;;  %2034 = vmatpush2.msra.mxu1 %v1448_v21  ;;  %v1082_v58 = vld [vmem:[#allocation3 + $0x8a0] sm:$0xff]  ;;  %v819_v16 = vld [vmem:[#allocation3 + $0x68] sm:$0xff] }
 0x25d   :  { %1965 = vmatmul.mubr.f32.vlgmr.msra.gmra.mxu0 %v3311_v15  ;;  %2036 = vmatmul.mubr.f32.vlgmr.msra.gmra.mxu1 %v3325_v20  ;;  %v1075_v21 = vld [vmem:[#allocation3 + $0x868] sm:$0xff] }
 0x25e   :  { %2042 = vmatprep.subr.mxu0 %v931_v18  ;;  %2113 = vmatprep.subr.mxu1 %v1187_v32  ;;  %v818_v18 = vld [vmem:[#allocation3 + $0x60] sm:$0xff] }
 0x25f   :  { %2043 = vmatpush1.msra.mxu0 %v930_v28  ;;  %2106 = vmatprep.mubr.f32.mxu0 %v3299_v27  ;;  %v1074_v32 = vld [vmem:[#allocation3 + $0x860] sm:$0xff]  ;;  %v811_v28 = vld [vmem:[#allocation3 + $0x28] sm:$0xff] }
 0x260   :  { %2114 = vmatpush1.msra.mxu1 %v1186_v8  ;;  %2177 = vmatprep.mubr.f32.mxu1 %v3303_v57  ;;  %v1067_v8 = vld [vmem:[#allocation3 + $0x828] sm:$0xff] }
 0x261   :  { %2044 = vmatprep.subr.mxu0 %v923_v5  ;;  %2115 = vmatprep.subr.mxu1 %v1179_v1  ;;  %v810_v5 = vld [vmem:[#allocation3 + $0x20] sm:$0xff] }
 0x262   :  { %2045 = vmatpush1.msra.mxu0 %v922_v59  ;;  %2116 = vmatpush1.msra.mxu1 %v1178_v6  ;;  %v1066_v1 = vld [vmem:[#allocation3 + $0x820] sm:$0xff]  ;;  %v1059_v59 = vld [vmem:[#allocation3 + $0x7e8] sm:$0xff] }
 0x263   :  { %2046 = vmatprep.subr.mxu0 %v915_v51  ;;  %2117 = vmatprep.subr.mxu1 %v1171_v4  ;;  %v1315_v6 = vld [vmem:[#allocation3 + $0xfe8] sm:$0xff]  ;;  %v1058_v51 = vld [vmem:[#allocation3 + $0x7e0] sm:$0xff] }
 0x264   :  { %2047 = vmatpush1.msra.mxu0 %v914_v23  ;;  %2118 = vmatpush1.msra.mxu1 %v1170_v56  ;;  %v1314_v4 = vld [vmem:[#allocation3 + $0xfe0] sm:$0xff]  ;;  %v1051_v23 = vld [vmem:[#allocation3 + $0x7a8] sm:$0xff] }
 0x265   :  { %2048 = vmatprep.subr.mxu0 %v907_v44  ;;  %2119 = vmatprep.subr.mxu1 %v1163_v26  ;;  %v1307_v56 = vld [vmem:[#allocation3 + $0xfa8] sm:$0xff]  ;;  %v1050_v44 = vld [vmem:[#allocation3 + $0x7a0] sm:$0xff] }
 0x266   :  { %2049 = vmatpush1.msra.mxu0 %v906_v54  ;;  %2120 = vmatpush1.msra.mxu1 %v1162_v25  ;;  %v1306_v26 = vld [vmem:[#allocation3 + $0xfa0] sm:$0xff]  ;;  %v1043_v54 = vld [vmem:[#allocation3 + $0x768] sm:$0xff] }
 0x267   :  { %2050 = vmatprep.subr.mxu0 %v899_v39  ;;  %2121 = vmatprep.subr.mxu1 %v1155_v7  ;;  %v1299_v25 = vld [vmem:[#allocation3 + $0xf68] sm:$0xff]  ;;  %v1042_v39 = vld [vmem:[#allocation3 + $0x760] sm:$0xff] }
 0x268   :  { %2051 = vmatpush1.msra.mxu0 %v898_v30  ;;  %2122 = vmatpush1.msra.mxu1 %v1154_v42  ;;  %v1298_v7 = vld [vmem:[#allocation3 + $0xf60] sm:$0xff]  ;;  %v1035_v30 = vld [vmem:[#allocation3 + $0x728] sm:$0xff] }
 0x269   :  { %2052 = vmatprep.subr.mxu0 %v891_v2  ;;  %2123 = vmatprep.subr.mxu1 %v1147_v60  ;;  %v1291_v42 = vld [vmem:[#allocation3 + $0xf28] sm:$0xff]  ;;  %v1034_v2 = vld [vmem:[#allocation3 + $0x720] sm:$0xff] }
 0x26a   :  { %2053 = vmatpush1.msra.mxu0 %v890_v37  ;;  %2124 = vmatpush1.msra.mxu1 %v1146_v47  ;;  %v1290_v60 = vld [vmem:[#allocation3 + $0xf20] sm:$0xff]  ;;  %v1027_v37 = vld [vmem:[#allocation3 + $0x6e8] sm:$0xff] }
 0x26b   :  { %2054 = vmatprep.subr.mxu0 %v883_v31  ;;  %2125 = vmatprep.subr.mxu1 %v1139_v11  ;;  %v1283_v47 = vld [vmem:[#allocation3 + $0xee8] sm:$0xff]  ;;  %v1026_v31 = vld [vmem:[#allocation3 + $0x6e0] sm:$0xff] }
 0x26c   :  { %2055 = vmatpush1.msra.mxu0 %v882_v46  ;;  %2126 = vmatpush1.msra.mxu1 %v1138_v55  ;;  %v1282_v11 = vld [vmem:[#allocation3 + $0xee0] sm:$0xff]  ;;  %v1019_v46 = vld [vmem:[#allocation3 + $0x6a8] sm:$0xff] }
 0x26d   :  { %2056 = vmatprep.subr.mxu0 %v875_v38  ;;  %2127 = vmatprep.subr.mxu1 %v1131_v10  ;;  %v1275_v55 = vld [vmem:[#allocation3 + $0xea8] sm:$0xff]  ;;  %v1018_v38 = vld [vmem:[#allocation3 + $0x6a0] sm:$0xff] }
 0x26e   :  { %2057 = vmatpush1.msra.mxu0 %v874_v9  ;;  %2128 = vmatpush1.msra.mxu1 %v1130_v19  ;;  %v1274_v10 = vld [vmem:[#allocation3 + $0xea0] sm:$0xff]  ;;  %v1011_v9 = vld [vmem:[#allocation3 + $0x668] sm:$0xff] }
 0x26f   :  { %2058 = vmatprep.subr.mxu0 %v867_v17  ;;  %2129 = vmatprep.subr.mxu1 %v1123_v14  ;;  %v1267_v19 = vld [vmem:[#allocation3 + $0xe68] sm:$0xff]  ;;  %v1010_v17 = vld [vmem:[#allocation3 + $0x660] sm:$0xff] }
 0x270   :  { %2059 = vmatpush1.msra.mxu0 %v866_v12  ;;  %2130 = vmatpush1.msra.mxu1 %v1122_v53  ;;  %v1266_v14 = vld [vmem:[#allocation3 + $0xe60] sm:$0xff]  ;;  %v1003_v12 = vld [vmem:[#allocation3 + $0x628] sm:$0xff] }
 0x271   :  { %2060 = vmatprep.subr.mxu0 %v859_v36  ;;  %2131 = vmatprep.subr.mxu1 %v1115_v63  ;;  %v1259_v53 = vld [vmem:[#allocation3 + $0xe28] sm:$0xff]  ;;  %v1002_v36 = vld [vmem:[#allocation3 + $0x620] sm:$0xff] }
 0x272   :  { %2061 = vmatpush1.msra.mxu0 %v858_v24  ;;  %2132 = vmatpush1.msra.mxu1 %v1114_v50  ;;  %v1258_v63 = vld [vmem:[#allocation3 + $0xe20] sm:$0xff]  ;;  %v995_v24 = vld [vmem:[#allocation3 + $0x5e8] sm:$0xff] }
 0x273   :  { %2062 = vmatprep.subr.mxu0 %v851_v3  ;;  %2133 = vmatprep.subr.mxu1 %v1107_v33  ;;  %v1251_v50 = vld [vmem:[#allocation3 + $0xde8] sm:$0xff]  ;;  %v994_v3 = vld [vmem:[#allocation3 + $0x5e0] sm:$0xff] }
 0x274   :  { %2063 = vmatpush1.msra.mxu0 %v850_v61  ;;  %2134 = vmatpush1.msra.mxu1 %v1106_v22  ;;  %v1250_v33 = vld [vmem:[#allocation3 + $0xde0] sm:$0xff]  ;;  %v987_v61 = vld [vmem:[#allocation3 + $0x5a8] sm:$0xff] }
 0x275   :  { %2064 = vmatprep.subr.mxu0 %v843_v34  ;;  %2135 = vmatprep.subr.mxu1 %v1099_v35  ;;  %v1243_v22 = vld [vmem:[#allocation3 + $0xda8] sm:$0xff]  ;;  %v986_v34 = vld [vmem:[#allocation3 + $0x5a0] sm:$0xff] }
 0x276   :  { %2065 = vmatpush1.msra.mxu0 %v842_v48  ;;  %2136 = vmatpush1.msra.mxu1 %v1098_v45  ;;  %v1242_v35 = vld [vmem:[#allocation3 + $0xda0] sm:$0xff]  ;;  %v979_v48 = vld [vmem:[#allocation3 + $0x568] sm:$0xff] }
 0x277   :  { %2066 = vmatprep.subr.mxu0 %v835_v29  ;;  %2137 = vmatprep.subr.mxu1 %v1091_v40  ;;  %v1235_v45 = vld [vmem:[#allocation3 + $0xd68] sm:$0xff]  ;;  %v978_v29 = vld [vmem:[#allocation3 + $0x560] sm:$0xff] }
 0x278   :  { %2067 = vmatpush1.msra.mxu0 %v834_v43  ;;  %2138 = vmatpush1.msra.mxu1 %v1090_v52  ;;  %v1234_v40 = vld [vmem:[#allocation3 + $0xd60] sm:$0xff]  ;;  %v971_v43 = vld [vmem:[#allocation3 + $0x528] sm:$0xff] }
 0x279   :  { %2068 = vmatprep.subr.mxu0 %v827_v0  ;;  %2139 = vmatprep.subr.mxu1 %v1083_v62  ;;  %v1227_v52 = vld [vmem:[#allocation3 + $0xd28] sm:$0xff]  ;;  %v970_v0 = vld [vmem:[#allocation3 + $0x520] sm:$0xff] }
 0x27a   :  { %2069 = vmatpush1.msra.mxu0 %v826_v49  ;;  %2140 = vmatpush1.msra.mxu1 %v1082_v58  ;;  %v1226_v62 = vld [vmem:[#allocation3 + $0xd20] sm:$0xff]  ;;  %v963_v49 = vld [vmem:[#allocation3 + $0x4e8] sm:$0xff] }
 0x27b   :  { %2070 = vmatprep.subr.mxu0 %v819_v16  ;;  %2141 = vmatprep.subr.mxu1 %v1075_v21  ;;  %v1219_v58 = vld [vmem:[#allocation3 + $0xce8] sm:$0xff]  ;;  %v962_v16 = vld [vmem:[#allocation3 + $0x4e0] sm:$0xff] }
 0x27c   :  { %2071 = vmatpush1.msra.mxu0 %v818_v18  ;;  %2142 = vmatpush1.msra.mxu1 %v1074_v32  ;;  %v1218_v21 = vld [vmem:[#allocation3 + $0xce0] sm:$0xff]  ;;  %v955_v18 = vld [vmem:[#allocation3 + $0x4a8] sm:$0xff] }
 0x27d   :  { %2072 = vmatprep.subr.mxu0 %v811_v28  ;;  %2143 = vmatprep.subr.mxu1 %v1067_v8  ;;  %v1211_v32 = vld [vmem:[#allocation3 + $0xca8] sm:$0xff]  ;;  %v954_v28 = vld [vmem:[#allocation3 + $0x4a0] sm:$0xff] }
 0x27e   :  { %2073 = vmatpush1.msra.mxu0 %v810_v5  ;;  %2144 = vmatpush1.msra.mxu1 %v1066_v1  ;;  %v1210_v8 = vld [vmem:[#allocation3 + $0xca0] sm:$0xff]  ;;  %v947_v5 = vld [vmem:[#allocation3 + $0x468] sm:$0xff] }
 0x27f   :  { %2074 = vmatprep.subr.mxu0 %v1059_v59  ;;  %2145 = vmatprep.subr.mxu1 %v1315_v6  ;;  %v1203_v1 = vld [vmem:[#allocation3 + $0xc68] sm:$0xff]  ;;  %v946_v59 = vld [vmem:[#allocation3 + $0x460] sm:$0xff] }
 0x280   :  { %2075 = vmatpush2.msra.mxu0 %v1058_v51  ;;  %2146 = vmatpush2.msra.mxu1 %v1314_v4  ;;  %v1202_v6 = vld [vmem:[#allocation3 + $0xc60] sm:$0xff]  ;;  %v939_v51 = vld [vmem:[#allocation3 + $0x428] sm:$0xff] }
 0x281   :  { %2076 = vmatprep.subr.mxu0 %v1051_v23  ;;  %2147 = vmatprep.subr.mxu1 %v1307_v56  ;;  %v1195_v4 = vld [vmem:[#allocation3 + $0xc28] sm:$0xff]  ;;  %v938_v23 = vld [vmem:[#allocation3 + $0x420] sm:$0xff] }
 0x282   :  { %2077 = vmatpush2.msra.mxu0 %v1050_v44  ;;  %2148 = vmatpush2.msra.mxu1 %v1306_v26  ;;  %v1194_v56 = vld [vmem:[#allocation3 + $0xc20] sm:$0xff]  ;;  %v1443_v44 = vld [vmem:[#allocation3 + $0x13e8] sm:$0xff]  ;;  %v933_v26 = vld [vmem:[#allocation3 + $0x3f8] sm:$0xff] }
 0x283   :  { %2078 = vmatprep.subr.mxu0 %v1043_v54  ;;  %2149 = vmatprep.subr.mxu1 %v1299_v25  ;;  %v1442_v54 = vld [vmem:[#allocation3 + $0x13e0] sm:$0xff]  ;;  %v932_v25 = vld [vmem:[#allocation3 + $0x3f0] sm:$0xff] }
 0x284   :  { %2079 = vmatpush2.msra.mxu0 %v1042_v39  ;;  %2150 = vmatpush2.msra.mxu1 %v1298_v7  ;;  %v1435_v39 = vld [vmem:[#allocation3 + $0x13a8] sm:$0xff]  ;;  %v925_v7 = vld [vmem:[#allocation3 + $0x3b8] sm:$0xff] }
 0x285   :  { %2080 = vmatprep.subr.mxu0 %v1035_v30  ;;  %2151 = vmatprep.subr.mxu1 %v1291_v42  ;;  %v1434_v30 = vld [vmem:[#allocation3 + $0x13a0] sm:$0xff]  ;;  %v924_v42 = vld [vmem:[#allocation3 + $0x3b0] sm:$0xff] }
 0x286   :  { %2081 = vmatpush2.msra.mxu0 %v1034_v2  ;;  %2152 = vmatpush2.msra.mxu1 %v1290_v60  ;;  %v1427_v2 = vld [vmem:[#allocation3 + $0x1368] sm:$0xff]  ;;  %v917_v60 = vld [vmem:[#allocation3 + $0x378] sm:$0xff] }
 0x287   :  { %2082 = vmatprep.subr.mxu0 %v1027_v37  ;;  %2153 = vmatprep.subr.mxu1 %v1283_v47  ;;  %v1426_v37 = vld [vmem:[#allocation3 + $0x1360] sm:$0xff]  ;;  %v916_v47 = vld [vmem:[#allocation3 + $0x370] sm:$0xff] }
 0x288   :  { %2083 = vmatpush2.msra.mxu0 %v1026_v31  ;;  %2154 = vmatpush2.msra.mxu1 %v1282_v11  ;;  %v1419_v31 = vld [vmem:[#allocation3 + $0x1328] sm:$0xff]  ;;  %v909_v11 = vld [vmem:[#allocation3 + $0x338] sm:$0xff] }
 0x289   :  { %2084 = vmatprep.subr.mxu0 %v1019_v46  ;;  %2155 = vmatprep.subr.mxu1 %v1275_v55  ;;  %v1418_v46 = vld [vmem:[#allocation3 + $0x1320] sm:$0xff]  ;;  %v908_v55 = vld [vmem:[#allocation3 + $0x330] sm:$0xff] }
 0x28a   :  { %2085 = vmatpush2.msra.mxu0 %v1018_v38  ;;  %2156 = vmatpush2.msra.mxu1 %v1274_v10  ;;  %v1411_v38 = vld [vmem:[#allocation3 + $0x12e8] sm:$0xff]  ;;  %v901_v10 = vld [vmem:[#allocation3 + $0x2f8] sm:$0xff] }
 0x28b   :  { %2086 = vmatprep.subr.mxu0 %v1011_v9  ;;  %2157 = vmatprep.subr.mxu1 %v1267_v19  ;;  %v900_v9 = vld [vmem:[#allocation3 + $0x2f0] sm:$0xff]  ;;  %v1403_v19 = vld [vmem:[#allocation3 + $0x12a8] sm:$0xff] }
 0x28c   :  { %2087 = vmatpush2.msra.mxu0 %v1010_v17  ;;  %2158 = vmatpush2.msra.mxu1 %v1266_v14  ;;  %v893_v17 = vld [vmem:[#allocation3 + $0x2b8] sm:$0xff]  ;;  %v1402_v14 = vld [vmem:[#allocation3 + $0x12a0] sm:$0xff] }
 0x28d   :  { %2088 = vmatprep.subr.mxu0 %v1003_v12  ;;  %2159 = vmatprep.subr.mxu1 %v1259_v53  ;;  %v892_v12 = vld [vmem:[#allocation3 + $0x2b0] sm:$0xff]  ;;  %v1395_v53 = vld [vmem:[#allocation3 + $0x1268] sm:$0xff] }
 0x28e   :  { %2089 = vmatpush2.msra.mxu0 %v1002_v36  ;;  %2160 = vmatpush2.msra.mxu1 %v1258_v63  ;;  %v885_v36 = vld [vmem:[#allocation3 + $0x278] sm:$0xff]  ;;  %v1394_v63 = vld [vmem:[#allocation3 + $0x1260] sm:$0xff] }
 0x28f   :  { %2090 = vmatprep.subr.mxu0 %v995_v24  ;;  %2161 = vmatprep.subr.mxu1 %v1251_v50  ;;  %v884_v24 = vld [vmem:[#allocation3 + $0x270] sm:$0xff]  ;;  %v1387_v50 = vld [vmem:[#allocation3 + $0x1228] sm:$0xff] }
 0x290   :  { %2091 = vmatpush2.msra.mxu0 %v994_v3  ;;  %2162 = vmatpush2.msra.mxu1 %v1250_v33  ;;  %v877_v3 = vld [vmem:[#allocation3 + $0x238] sm:$0xff]  ;;  %v1386_v33 = vld [vmem:[#allocation3 + $0x1220] sm:$0xff] }
 0x291   :  { %2092 = vmatprep.subr.mxu0 %v987_v61  ;;  %2163 = vmatprep.subr.mxu1 %v1243_v22  ;;  %v876_v61 = vld [vmem:[#allocation3 + $0x230] sm:$0xff]  ;;  %v1379_v22 = vld [vmem:[#allocation3 + $0x11e8] sm:$0xff] }
 0x292   :  { %2093 = vmatpush2.msra.mxu0 %v986_v34  ;;  %2164 = vmatpush2.msra.mxu1 %v1242_v35  ;;  %v869_v34 = vld [vmem:[#allocation3 + $0x1f8] sm:$0xff]  ;;  %v1378_v35 = vld [vmem:[#allocation3 + $0x11e0] sm:$0xff] }
 0x293   :  { %2094 = vmatprep.subr.mxu0 %v979_v48  ;;  %2165 = vmatprep.subr.mxu1 %v1235_v45  ;;  %v868_v48 = vld [vmem:[#allocation3 + $0x1f0] sm:$0xff]  ;;  %v1371_v45 = vld [vmem:[#allocation3 + $0x11a8] sm:$0xff] }
 0x294   :  { %2095 = vmatpush2.msra.mxu0 %v978_v29  ;;  %2166 = vmatpush2.msra.mxu1 %v1234_v40  ;;  %v861_v29 = vld [vmem:[#allocation3 + $0x1b8] sm:$0xff]  ;;  %v1370_v40 = vld [vmem:[#allocation3 + $0x11a0] sm:$0xff] }
 0x295   :  { %2096 = vmatprep.subr.mxu0 %v971_v43  ;;  %2167 = vmatprep.subr.mxu1 %v1227_v52  ;;  %v860_v43 = vld [vmem:[#allocation3 + $0x1b0] sm:$0xff]  ;;  %v1363_v52 = vld [vmem:[#allocation3 + $0x1168] sm:$0xff] }
 0x296   :  { %2097 = vmatpush2.msra.mxu0 %v970_v0  ;;  %2168 = vmatpush2.msra.mxu1 %v1226_v62  ;;  %v853_v0 = vld [vmem:[#allocation3 + $0x178] sm:$0xff]  ;;  %v1362_v62 = vld [vmem:[#allocation3 + $0x1160] sm:$0xff] }
 0x297   :  { %2098 = vmatprep.subr.mxu0 %v963_v49  ;;  %2169 = vmatprep.subr.mxu1 %v1219_v58  ;;  %v852_v49 = vld [vmem:[#allocation3 + $0x170] sm:$0xff]  ;;  %v1355_v58 = vld [vmem:[#allocation3 + $0x1128] sm:$0xff] }
 0x298   :  { %2099 = vmatpush2.msra.mxu0 %v962_v16  ;;  %2170 = vmatpush2.msra.mxu1 %v1218_v21  ;;  %v845_v16 = vld [vmem:[#allocation3 + $0x138] sm:$0xff]  ;;  %v1354_v21 = vld [vmem:[#allocation3 + $0x1120] sm:$0xff] }
 0x299   :  { %2100 = vmatprep.subr.mxu0 %v955_v18  ;;  %2171 = vmatprep.subr.mxu1 %v1211_v32  ;;  %v844_v18 = vld [vmem:[#allocation3 + $0x130] sm:$0xff]  ;;  %v1347_v32 = vld [vmem:[#allocation3 + $0x10e8] sm:$0xff] }
 0x29a   :  { %2101 = vmatpush2.msra.mxu0 %v954_v28  ;;  %2172 = vmatpush2.msra.mxu1 %v1210_v8  ;;  %v837_v28 = vld [vmem:[#allocation3 + $0xf8] sm:$0xff]  ;;  %v1346_v8 = vld [vmem:[#allocation3 + $0x10e0] sm:$0xff] }
 0x29b   :  { %2102 = vmatprep.subr.mxu0 %v947_v5  ;;  %2173 = vmatprep.subr.mxu1 %v1203_v1  ;;  %v836_v5 = vld [vmem:[#allocation3 + $0xf0] sm:$0xff]  ;;  %v1339_v1 = vld [vmem:[#allocation3 + $0x10a8] sm:$0xff] }
 0x29c   :  { %2103 = vmatpush2.msra.mxu0 %v946_v59  ;;  %2174 = vmatpush2.msra.mxu1 %v1202_v6  ;;  %v829_v59 = vld [vmem:[#allocation3 + $0xb8] sm:$0xff]  ;;  %v1338_v6 = vld [vmem:[#allocation3 + $0x10a0] sm:$0xff] }
 0x29d   :  { %2104 = vmatprep.subr.mxu0 %v939_v51  ;;  %2175 = vmatprep.subr.mxu1 %v1195_v4  ;;  %v828_v51 = vld [vmem:[#allocation3 + $0xb0] sm:$0xff]  ;;  %v1331_v4 = vld [vmem:[#allocation3 + $0x1068] sm:$0xff] }
 0x29e   :  { %2105 = vmatpush2.msra.mxu0 %v938_v23  ;;  %2176 = vmatpush2.msra.mxu1 %v1194_v56  ;;  %v821_v23 = vld [vmem:[#allocation3 + $0x78] sm:$0xff]  ;;  %v1330_v56 = vld [vmem:[#allocation3 + $0x1060] sm:$0xff] }
 0x29f   :  { %2107 = vmatmul.mubr.f32.vlgmr.msra.gmra.mxu0 %v3307_v41  ;;  %2178 = vmatmul.mubr.f32.vlgmr.msra.gmra.mxu1 %v3311_v15 }
 0x2a0   :  { %2184 = vmatprep.subr.mxu0 %v1443_v44  ;;  %2255 = vmatprep.subr.mxu1 %v933_v26  ;;  %v820_v44 = vld [vmem:[#allocation3 + $0x70] sm:$0xff]  ;;  %v1323_v26 = vld [vmem:[#allocation3 + $0x1028] sm:$0xff] }
 0x2a1   :  { %2185 = vmatpush1.msra.mxu0 %v1442_v54  ;;  %2248 = vmatprep.mubr.f32.mxu0 %v3319_v13  ;;  %v813_v54 = vld [vmem:[#allocation3 + $0x38] sm:$0xff] }
 0x2a2   :  { %2256 = vmatpush1.msra.mxu1 %v932_v25  ;;  %2319 = vmatprep.mubr.f32.mxu1 %v3299_v27  ;;  %v1410_v27 = vld [vmem:[#allocation3 + $0x12e0] sm:$0xff] }
 0x2a3   :  { %2186 = vmatprep.subr.mxu0 %v1435_v39  ;;  %2257 = vmatprep.subr.mxu1 %v925_v7  ;;  %v1322_v25 = vld [vmem:[#allocation3 + $0x1020] sm:$0xff]  ;;  %v812_v39 = vld [vmem:[#allocation3 + $0x30] sm:$0xff]  ;;  %v1571_v7 = vld [vmem:[#allocation3 + $0x17e8] sm:$0xff] }
 0x2a4   :  { %2187 = vmatpush1.msra.mxu0 %v1434_v30  ;;  %2258 = vmatpush1.msra.mxu1 %v924_v42  ;;  %v1061_v30 = vld [vmem:[#allocation3 + $0x7f8] sm:$0xff]  ;;  %v1570_v42 = vld [vmem:[#allocation3 + $0x17e0] sm:$0xff] }
 0x2a5   :  { %2188 = vmatprep.subr.mxu0 %v1427_v2  ;;  %2259 = vmatprep.subr.mxu1 %v917_v60  ;;  %v1060_v2 = vld [vmem:[#allocation3 + $0x7f0] sm:$0xff]  ;;  %v1563_v60 = vld [vmem:[#allocation3 + $0x17a8] sm:$0xff] }
 0x2a6   :  { %2189 = vmatpush1.msra.mxu0 %v1426_v37  ;;  %2260 = vmatpush1.msra.mxu1 %v916_v47  ;;  %v1053_v37 = vld [vmem:[#allocation3 + $0x7b8] sm:$0xff]  ;;  %v1562_v47 = vld [vmem:[#allocation3 + $0x17a0] sm:$0xff] }
 0x2a7   :  { %2190 = vmatprep.subr.mxu0 %v1419_v31  ;;  %2261 = vmatprep.subr.mxu1 %v909_v11  ;;  %v1052_v31 = vld [vmem:[#allocation3 + $0x7b0] sm:$0xff]  ;;  %v1555_v11 = vld [vmem:[#allocation3 + $0x1768] sm:$0xff] }
 0x2a8   :  { %2191 = vmatpush1.msra.mxu0 %v1418_v46  ;;  %2262 = vmatpush1.msra.mxu1 %v908_v55  ;;  %v1045_v46 = vld [vmem:[#allocation3 + $0x778] sm:$0xff]  ;;  %v1554_v55 = vld [vmem:[#allocation3 + $0x1760] sm:$0xff] }
 0x2a9   :  { %2192 = vmatprep.subr.mxu0 %v1411_v38  ;;  %2263 = vmatprep.subr.mxu1 %v901_v10  ;;  %v1044_v38 = vld [vmem:[#allocation3 + $0x770] sm:$0xff]  ;;  %v1547_v10 = vld [vmem:[#allocation3 + $0x1728] sm:$0xff] }
 0x2aa   :  { %2193 = vmatpush1.msra.mxu0 %v1410_v27  ;;  %2264 = vmatpush1.msra.mxu1 %v900_v9  ;;  %v1037_v27 = vld [vmem:[#allocation3 + $0x738] sm:$0xff]  ;;  %v1546_v9 = vld [vmem:[#allocation3 + $0x1720] sm:$0xff] }
 0x2ab   :  { %2194 = vmatprep.subr.mxu0 %v1403_v19  ;;  %2265 = vmatprep.subr.mxu1 %v893_v17  ;;  %v1036_v19 = vld [vmem:[#allocation3 + $0x730] sm:$0xff]  ;;  %v1576_v17 = vlaneseq }
 0x2ac   :  { %2195 = vmatpush1.msra.mxu0 %v1402_v14  ;;  %2266 = vmatpush1.msra.mxu1 %v892_v12  ;;  %v1539_v14 = vld [vmem:[#allocation3 + $0x16e8] sm:$0xff]  ;;  %v1029_v12 = vld [vmem:[#allocation3 + $0x6f8] sm:$0xff] }
 0x2ad   :  { %2196 = vmatprep.subr.mxu0 %v1395_v53  ;;  %2267 = vmatprep.subr.mxu1 %v885_v36  ;;  %v1538_v53 = vld [vmem:[#allocation3 + $0x16e0] sm:$0xff]  ;;  %v1028_v36 = vld [vmem:[#allocation3 + $0x6f0] sm:$0xff] }
 0x2ae   :  { %2197 = vmatpush1.msra.mxu0 %v1394_v63  ;;  %2268 = vmatpush1.msra.mxu1 %v884_v24  ;;  %v1531_v63 = vld [vmem:[#allocation3 + $0x16a8] sm:$0xff]  ;;  %v1021_v24 = vld [vmem:[#allocation3 + $0x6b8] sm:$0xff] }
 0x2af   :  { %2198 = vmatprep.subr.mxu0 %v1387_v50  ;;  %2269 = vmatprep.subr.mxu1 %v877_v3  ;;  %v1530_v50 = vld [vmem:[#allocation3 + $0x16a0] sm:$0xff]  ;;  %v1020_v3 = vld [vmem:[#allocation3 + $0x6b0] sm:$0xff] }
 0x2b0   :  { %2199 = vmatpush1.msra.mxu0 %v1386_v33  ;;  %2270 = vmatpush1.msra.mxu1 %v876_v61  ;;  %v3339_v33 = vshrl.u32 %v1576_v17, 7  ;;  %v1523_v61 = vld [vmem:[#allocation3 + $0x1668] sm:$0xff] }
 0x2b1   :  { %2200 = vmatprep.subr.mxu0 %v1379_v22  ;;  %2271 = vmatprep.subr.mxu1 %v869_v34  ;;  %v1013_v22 = vld [vmem:[#allocation3 + $0x678] sm:$0xff]  ;;  %v1522_v34 = vld [vmem:[#allocation3 + $0x1660] sm:$0xff] }
 0x2b2   :  { %2201 = vmatpush1.msra.mxu0 %v1378_v35  ;;  %2272 = vmatpush1.msra.mxu1 %v868_v48  ;;  %v1012_v35 = vld [vmem:[#allocation3 + $0x670] sm:$0xff]  ;;  %v1515_v48 = vld [vmem:[#allocation3 + $0x1628] sm:$0xff] }
 0x2b3   :  { %2202 = vmatprep.subr.mxu0 %v1371_v45  ;;  %2273 = vmatprep.subr.mxu1 %v861_v29  ;;  %v1005_v45 = vld [vmem:[#allocation3 + $0x638] sm:$0xff]  ;;  %v1514_v29 = vld [vmem:[#allocation3 + $0x1620] sm:$0xff] }
 0x2b4   :  { %2203 = vmatpush1.msra.mxu0 %v1370_v40  ;;  %2274 = vmatpush1.msra.mxu1 %v860_v43  ;;  %v1004_v40 = vld [vmem:[#allocation3 + $0x630] sm:$0xff]  ;;  %v1578_v43 = vsub.s32 0, %v3339_v33 }
 0x2b5   :  { %2204 = vmatprep.subr.mxu0 %v1363_v52  ;;  %2275 = vmatprep.subr.mxu1 %v853_v0  ;;  %v1507_v52 = vld [vmem:[#allocation3 + $0x15e8] sm:$0xff]  ;;  %v997_v0 = vld [vmem:[#allocation3 + $0x5f8] sm:$0xff] }
 0x2b6   :  { %2205 = vmatpush1.msra.mxu0 %v1362_v62  ;;  %2276 = vmatpush1.msra.mxu1 %v852_v49  ;;  %v3342_v62 = vld [vmem:[#allocation6] sm:$0xff] }
 0x2b7   :  { %2206 = vmatprep.subr.mxu0 %v1355_v58  ;;  %2277 = vmatprep.subr.mxu1 %v845_v16  ;;  %v1506_v49 = vld [vmem:[#allocation3 + $0x15e0] sm:$0xff]  ;;  %v996_v58 = vld [vmem:[#allocation3 + $0x5f0] sm:$0xff]  ;;  %v1582_v16 = vsub.s32 1, %v3339_v33 }
 0x2b8   :  { %2207 = vmatpush1.msra.mxu0 %v1354_v21  ;;  %2278 = vmatpush1.msra.mxu1 %v844_v18  ;;  %v1499_v21 = vld [vmem:[#allocation3 + $0x15a8] sm:$0xff]  ;;  %v989_v18 = vld [vmem:[#allocation3 + $0x5b8] sm:$0xff] }
 0x2b9   :  { %2208 = vmatprep.subr.mxu0 %v1347_v32  ;;  %2279 = vmatprep.subr.mxu1 %v837_v28  ;;  %v1682_v32 = vpop.f32.mrf.mxu0  ;;  %v1498_v28 = vld [vmem:[#allocation3 + $0x15a0] sm:$0xff] }
 0x2ba   :  { %2209 = vmatpush1.msra.mxu0 %v1346_v8  ;;  %2280 = vmatpush1.msra.mxu1 %v836_v5  ;;  %v988_v8 = vld [vmem:[#allocation3 + $0x5b0] sm:$0xff]  ;;  %v1579_v5 = vrot.slane %v3342_v62, %v1578_v43  ;;  %v1429_v43 = vld [vmem:[#allocation3 + $0x1378] sm:$0xff] }
 0x2bb   :  { %2210 = vmatprep.subr.mxu0 %v1339_v1  ;;  %2281 = vmatprep.subr.mxu1 %v829_v59  ;;  %v1491_v1 = vld [vmem:[#allocation3 + $0x1568] sm:$0xff]  ;;  %v981_v59 = vld [vmem:[#allocation3 + $0x578] sm:$0xff] }
 0x2bc   :  { %2211 = vmatpush1.msra.mxu0 %v1338_v6  ;;  %2282 = vmatpush1.msra.mxu1 %v828_v51  ;;  %v1490_v6 = vld [vmem:[#allocation3 + $0x1560] sm:$0xff]  ;;  %v980_v51 = vld [vmem:[#allocation3 + $0x570] sm:$0xff] }
 0x2bd   :  { %2212 = vmatprep.subr.mxu0 %v1331_v4  ;;  %2283 = vmatprep.subr.mxu1 %v821_v23  ;;  %v1583_v4 = vrot.slane %v3342_v62, %v1582_v16  ;;  %v1483_v23 = vld [vmem:[#allocation3 + $0x1528] sm:$0xff]  ;;  %v1420_v16 = vld [vmem:[#allocation3 + $0x1330] sm:$0xff] }
 0x2be   :  { %2213 = vmatpush1.msra.mxu0 %v1330_v56  ;;  %2284 = vmatpush1.msra.mxu1 %v820_v44  ;;  %v973_v56 = vld [vmem:[#allocation3 + $0x538] sm:$0xff]  ;;  %v1684_v44 = vpop.f32.mrf.mxu0 }
 0x2bf   :  { %2214 = vmatprep.subr.mxu0 %v1323_v26  ;;  %2285 = vmatprep.subr.mxu1 %v813_v54  ;;  %v1482_v26 = vld [vmem:[#allocation3 + $0x1520] sm:$0xff]  ;;  %v972_v54 = vld [vmem:[#allocation3 + $0x530] sm:$0xff] }
 0x2c0   :  { %2215 = vmatpush1.msra.mxu0 %v1322_v25  ;;  %2286 = vmatpush1.msra.mxu1 %v812_v39  ;;  %v1683_v25 = vadd.f32 %v1682_v32, %v1579_v5  ;;  %v1475_v39 = vld [vmem:[#allocation3 + $0x14e8] sm:$0xff]  ;;  %v1149_v32 = vld [vmem:[#allocation3 + $0xab8] sm:$0xff]  ;;  %v1404_v5 = vld [vmem:[#allocation3 + $0x12b0] sm:$0xff] }
 0x2c1   :  { %2216 = vmatprep.subr.mxu0 %v1571_v7  ;;  %2287 = vmatprep.subr.mxu1 %v1061_v30  ;;  %v965_v7 = vld [vmem:[#allocation3 + $0x4f8] sm:$0xff]  ;;  %v1753_v30 = vpop.f32.mrf.mxu1 }
 0x2c2   :  { %2217 = vmatpush2.msra.mxu0 %v1570_v42  ;;  %2288 = vmatpush2.msra.mxu1 %v1060_v2  ;;  %v1474_v42 = vld [vmem:[#allocation3 + $0x14e0] sm:$0xff]  ;;  %v964_v2 = vld [vmem:[#allocation3 + $0x4f0] sm:$0xff] }
 0x2c3   :  { %2218 = vmatprep.subr.mxu0 %v1563_v60  ;;  %2289 = vmatprep.subr.mxu1 %v1053_v37  ;;  %v1685_v60 = vadd.f32 %v1684_v44, %v1583_v4  ;;  %v1467_v37 = vld [vmem:[#allocation3 + $0x14a8] sm:$0xff]  ;;  %v1133_v4 = vld [vmem:[#allocation3 + $0xa38] sm:$0xff]  ;;  %v1388_v44 = vld [vmem:[#allocation3 + $0x1230] sm:$0xff] }
 0x2c4   :  { %2219 = vmatpush2.msra.mxu0 %v1562_v47  ;;  %2290 = vmatpush2.msra.mxu1 %v1052_v31  ;;  %v957_v47 = vld [vmem:[#allocation3 + $0x4b8] sm:$0xff]  ;;  %v1466_v31 = vld [vmem:[#allocation3 + $0x14a0] sm:$0xff] }
 0x2c5   :  { %2220 = vmatprep.subr.mxu0 %v1555_v11  ;;  %2291 = vmatprep.subr.mxu1 %v1045_v46  ;;  %v956_v11 = vld [vmem:[#allocation3 + $0x4b0] sm:$0xff]  ;;  %v1754_v46 = vadd.f32 %v1753_v30, %v1683_v25  ;;  %v1373_v30 = vld [vmem:[#allocation3 + $0x11b8] sm:$0xff] }
 0x2c6   :  { %2221 = vmatpush2.msra.mxu0 %v1554_v55  ;;  %2292 = vmatpush2.msra.mxu1 %v1044_v38  ;;  %v1459_v55 = vld [vmem:[#allocation3 + $0x1468] sm:$0xff]  ;;  %v949_v38 = vld [vmem:[#allocation3 + $0x478] sm:$0xff]  ;;  %v1124_v25 = vld [vmem:[#allocation3 + $0x9f0] sm:$0xff] }
 0x2c7   :  { %2222 = vmatprep.subr.mxu0 %v1547_v10  ;;  %2293 = vmatprep.subr.mxu1 %v1037_v27  ;;  %v1755_v10 = vpop.f32.mrf.mxu1  ;;  %v1458_v27 = vld [vmem:[#allocation3 + $0x1460] sm:$0xff] }
 0x2c8   :  { %2223 = vmatpush2.msra.mxu0 %v1546_v9  ;;  %2294 = vmatpush2.msra.mxu1 %v1036_v19  ;;  %v948_v9 = vld [vmem:[#allocation3 + $0x470] sm:$0xff]  ;;  %v1756_v17 = vadd.f32 %v1755_v10, %v1685_v60  ;;  %v1109_v60 = vld [vmem:[#allocation3 + $0x978] sm:$0xff] }
 0x2c9   :  { %2224 = vmatprep.subr.mxu0 %v1539_v14  ;;  %2295 = vmatprep.subr.mxu1 %v1029_v12  ;;  %v1451_v14 = vld [vmem:[#allocation3 + $0x1428] sm:$0xff]  ;;  %v941_v12 = vld [vmem:[#allocation3 + $0x438] sm:$0xff] }
 0x2ca   :  { %2225 = vmatpush2.msra.mxu0 %v1538_v53  ;;  %2296 = vmatpush2.msra.mxu1 %v1028_v36  ;;  %v1450_v36 = vld [vmem:[#allocation3 + $0x1420] sm:$0xff]  ;;  %v1093_v10 = vld [vmem:[#allocation3 + $0x8f8] sm:$0xff] }
 0x2cb   :  { %2226 = vmatprep.subr.mxu0 %v1531_v63  ;;  %2297 = vmatprep.subr.mxu1 %v1021_v24  ;;  %v940_v63 = vld [vmem:[#allocation3 + $0x430] sm:$0xff] }
 0x2cc   :  { %2227 = vmatpush2.msra.mxu0 %v1530_v50  ;;  %2298 = vmatpush2.msra.mxu1 %v1020_v3  ;;  %v1189_v3 = vld [vmem:[#allocation3 + $0xbf8] sm:$0xff] }
 0x2cd   :  { %2228 = vmatprep.subr.mxu0 %v1523_v61  ;;  %2299 = vmatprep.subr.mxu1 %v1013_v22  ;;  %v1445_v61 = vld [vmem:[#allocation3 + $0x13f8] sm:$0xff]  ;;  %v1188_v22 = vld [vmem:[#allocation3 + $0xbf0] sm:$0xff] }
 0x2ce   :  { %2229 = vmatpush2.msra.mxu0 %v1522_v34  ;;  %2300 = vmatpush2.msra.mxu1 %v1012_v35  ;;  %v1444_v34 = vld [vmem:[#allocation3 + $0x13f0] sm:$0xff]  ;;  %v1181_v35 = vld [vmem:[#allocation3 + $0xbb8] sm:$0xff] }
 0x2cf   :  { %2230 = vmatprep.subr.mxu0 %v1515_v48  ;;  %2301 = vmatprep.subr.mxu1 %v1005_v45  ;;  %v1437_v48 = vld [vmem:[#allocation3 + $0x13b8] sm:$0xff]  ;;  %v1180_v45 = vld [vmem:[#allocation3 + $0xbb0] sm:$0xff] }
 0x2d0   :  { %2231 = vmatpush2.msra.mxu0 %v1514_v29  ;;  %2302 = vmatpush2.msra.mxu1 %v1004_v40  ;;  %v1436_v29 = vld [vmem:[#allocation3 + $0x13b0] sm:$0xff]  ;;  %v1173_v40 = vld [vmem:[#allocation3 + $0xb78] sm:$0xff] }
 0x2d1   :  { %2232 = vmatprep.subr.mxu0 %v1507_v52  ;;  %2303 = vmatprep.subr.mxu1 %v997_v0  ;;  %v1172_v52 = vld [vmem:[#allocation3 + $0xb70] sm:$0xff] }
 0x2d2   :  { %2233 = vmatpush2.msra.mxu0 %v1506_v49  ;;  %2304 = vmatpush2.msra.mxu1 %v996_v58  ;;  %v1428_v0 = vld [vmem:[#allocation3 + $0x1370] sm:$0xff]  ;;  %v1421_v49 = vld [vmem:[#allocation3 + $0x1338] sm:$0xff] }
 0x2d3   :  { %2234 = vmatprep.subr.mxu0 %v1499_v21  ;;  %2305 = vmatprep.subr.mxu1 %v989_v18  ;;  %v1164_v58 = vld [vmem:[#allocation3 + $0xb30] sm:$0xff]  ;;  %v1413_v21 = vld [vmem:[#allocation3 + $0x12f8] sm:$0xff] }
 0x2d4   :  { %2235 = vmatpush2.msra.mxu0 %v1498_v28  ;;  %2306 = vmatpush2.msra.mxu1 %v988_v8  ;;  %v1412_v18 = vld [vmem:[#allocation3 + $0x12f0] sm:$0xff]  ;;  %v1405_v28 = vld [vmem:[#allocation3 + $0x12b8] sm:$0xff] }
 0x2d5   :  { %2236 = vmatprep.subr.mxu0 %v1491_v1  ;;  %2307 = vmatprep.subr.mxu1 %v981_v59  ;;  %v1148_v8 = vld [vmem:[#allocation3 + $0xab0] sm:$0xff]  ;;  %v1141_v1 = vld [vmem:[#allocation3 + $0xa78] sm:$0xff] }
 0x2d6   :  { %2237 = vmatpush2.msra.mxu0 %v1490_v6  ;;  %2308 = vmatpush2.msra.mxu1 %v980_v51  ;;  %v1397_v59 = vld [vmem:[#allocation3 + $0x1278] sm:$0xff]  ;;  %v1140_v6 = vld [vmem:[#allocation3 + $0xa70] sm:$0xff] }
 0x2d7   :  { %2238 = vmatprep.subr.mxu0 %v1483_v23  ;;  %2309 = vmatprep.subr.mxu1 %v973_v56  ;;  %v1396_v51 = vld [vmem:[#allocation3 + $0x1270] sm:$0xff]  ;;  %v1389_v23 = vld [vmem:[#allocation3 + $0x1238] sm:$0xff] }
 0x2d8   :  { %2239 = vmatpush2.msra.mxu0 %v1482_v26  ;;  %2310 = vmatpush2.msra.mxu1 %v972_v54  ;;  %v1132_v56 = vld [vmem:[#allocation3 + $0xa30] sm:$0xff]  ;;  %v1125_v26 = vld [vmem:[#allocation3 + $0x9f8] sm:$0xff] }
 0x2d9   :  { %2240 = vmatprep.subr.mxu0 %v1475_v39  ;;  %2311 = vmatprep.subr.mxu1 %v965_v7  ;;  %v1381_v54 = vld [vmem:[#allocation3 + $0x11f8] sm:$0xff]  ;;  %v1380_v39 = vld [vmem:[#allocation3 + $0x11f0] sm:$0xff] }
 0x2da   :  { %2241 = vmatpush2.msra.mxu0 %v1474_v42  ;;  %2312 = vmatpush2.msra.mxu1 %v964_v2  ;;  %v1117_v7 = vld [vmem:[#allocation3 + $0x9b8] sm:$0xff]  ;;  %v1116_v42 = vld [vmem:[#allocation3 + $0x9b0] sm:$0xff] }
 0x2db   :  { %2242 = vmatprep.subr.mxu0 %v1467_v37  ;;  %2313 = vmatprep.subr.mxu1 %v957_v47  ;;  %v1824_v19 = vpop.f32.mrf.mxu0  ;;  %v1372_v2 = vld [vmem:[#allocation3 + $0x11b0] sm:$0xff]  ;;  %v1365_v37 = vld [vmem:[#allocation3 + $0x1178] sm:$0xff] }
 0x2dc   :  { %2243 = vmatpush2.msra.mxu0 %v1466_v31  ;;  %2314 = vmatpush2.msra.mxu1 %v956_v11  ;;  %v1825_v53 = vadd.f32 %v1824_v19, %v1754_v46  ;;  %v1108_v47 = vld [vmem:[#allocation3 + $0x970] sm:$0xff]  ;;  %v1101_v11 = vld [vmem:[#allocation3 + $0x938] sm:$0xff] }
 0x2dd   :  { %2244 = vmatprep.subr.mxu0 %v1459_v55  ;;  %2315 = vmatprep.subr.mxu1 %v949_v38  ;;  %v1826_v24 = vpop.f32.mrf.mxu0  ;;  %v1364_v31 = vld [vmem:[#allocation3 + $0x1170] sm:$0xff]  ;;  %v1357_v46 = vld [vmem:[#allocation3 + $0x1138] sm:$0xff] }
 0x2de   :  { %2245 = vmatpush2.msra.mxu0 %v1458_v27  ;;  %2316 = vmatpush2.msra.mxu1 %v948_v9  ;;  %2468 = vst [vmem:[#allocation8] sm:$0xff] %v1825_v53  ;;  %v1827_v50 = vadd.f32 %v1826_v24, %v1756_v17  ;;  %v1100_v55 = vld [vmem:[#allocation3 + $0x930] sm:$0xff]  ;;  %v1349_v27 = vld [vmem:[#allocation3 + $0x10f8] sm:$0xff] }
 0x2df   :  { %2246 = vmatprep.subr.mxu0 %v1451_v14  ;;  %2317 = vmatprep.subr.mxu1 %v941_v12  ;;  %v1356_v38 = vld [vmem:[#allocation3 + $0x1130] sm:$0xff]  ;;  %v1085_v17 = vld [vmem:[#allocation3 + $0x8b8] sm:$0xff] }
 0x2e0   :  { %2247 = vmatpush2.msra.mxu0 %v1450_v36  ;;  %2318 = vmatpush2.msra.mxu1 %v940_v63  ;;  %2469 = vst [vmem:[#allocation8 + $0x8] sm:$0xff] %v1827_v50  ;;  %v1092_v9 = vld [vmem:[#allocation3 + $0x8f0] sm:$0xff]  ;;  %v1341_v14 = vld [vmem:[#allocation3 + $0x10b8] sm:$0xff] }
 0x2e1   :  { %2249 = vmatmul.mubr.f32.vlgmr.msra.gmra.mxu0 %v3325_v20  ;;  %2320 = vmatmul.mubr.f32.vlgmr.msra.gmra.mxu1 %v3307_v41  ;;  %v1165_v41 = vld [vmem:[#allocation3 + $0xb38] sm:$0xff]  ;;  %v1348_v19 = vld [vmem:[#allocation3 + $0x10f0] sm:$0xff] }
 0x2e2   :  { %2326 = vmatprep.subr.mxu0 %v1189_v3  ;;  %2397 = vmatprep.subr.mxu1 %v1445_v61  ;;  %v1084_v12 = vld [vmem:[#allocation3 + $0x8b0] sm:$0xff]  ;;  %v1077_v36 = vld [vmem:[#allocation3 + $0x878] sm:$0xff] }
 0x2e3   :  { %2327 = vmatpush1.msra.mxu0 %v1188_v22  ;;  %2390 = vmatprep.mubr.f32.mxu0 %v3303_v57  ;;  %v1157_v57 = vld [vmem:[#allocation3 + $0xaf8] sm:$0xff]  ;;  %v1340_v53 = vld [vmem:[#allocation3 + $0x10b0] sm:$0xff] }
 0x2e4   :  { %2398 = vmatpush1.msra.mxu1 %v1444_v34  ;;  %2461 = vmatprep.mubr.f32.mxu1 %v3319_v13  ;;  %v1156_v13 = vld [vmem:[#allocation3 + $0xaf0] sm:$0xff]  ;;  %v1333_v63 = vld [vmem:[#allocation3 + $0x1078] sm:$0xff] }
 0x2e5   :  { %2328 = vmatprep.subr.mxu0 %v1181_v35  ;;  %2399 = vmatprep.subr.mxu1 %v1437_v48  ;;  %v1076_v24 = vld [vmem:[#allocation3 + $0x870] sm:$0xff]  ;;  %v1069_v3 = vld [vmem:[#allocation3 + $0x838] sm:$0xff] }
 0x2e6   :  { %2329 = vmatpush1.msra.mxu0 %v1180_v45  ;;  %2400 = vmatpush1.msra.mxu1 %v1436_v29  ;;  %v1332_v50 = vld [vmem:[#allocation3 + $0x1070] sm:$0xff]  ;;  %v1325_v61 = vld [vmem:[#allocation3 + $0x1038] sm:$0xff] }
 0x2e7   :  { %2330 = vmatprep.subr.mxu0 %v1173_v40  ;;  %2401 = vmatprep.subr.mxu1 %v1429_v43  ;;  %v1068_v22 = vld [vmem:[#allocation3 + $0x830] sm:$0xff]  ;;  %v1317_v35 = vld [vmem:[#allocation3 + $0xff8] sm:$0xff] }
 0x2e8   :  { %2331 = vmatpush1.msra.mxu0 %v1172_v52  ;;  %2402 = vmatpush1.msra.mxu1 %v1428_v0  ;;  %v1324_v34 = vld [vmem:[#allocation3 + $0x1030] sm:$0xff]  ;;  %v1573_v48 = vld [vmem:[#allocation3 + $0x17f8] sm:$0xff] }
 0x2e9   :  { %2332 = vmatprep.subr.mxu0 %v1165_v41  ;;  %2403 = vmatprep.subr.mxu1 %v1421_v49  ;;  %v1316_v45 = vld [vmem:[#allocation3 + $0xff0] sm:$0xff]  ;;  %v1309_v40 = vld [vmem:[#allocation3 + $0xfb8] sm:$0xff] }
 0x2ea   :  { %2333 = vmatpush1.msra.mxu0 %v1164_v58  ;;  %2404 = vmatpush1.msra.mxu1 %v1420_v16  ;;  %v1572_v29 = vld [vmem:[#allocation3 + $0x17f0] sm:$0xff]  ;;  %v1565_v43 = vld [vmem:[#allocation3 + $0x17b8] sm:$0xff] }
 0x2eb   :  { %2334 = vmatprep.subr.mxu0 %v1157_v57  ;;  %2405 = vmatprep.subr.mxu1 %v1413_v21  ;;  %v1308_v52 = vld [vmem:[#allocation3 + $0xfb0] sm:$0xff]  ;;  %v1301_v41 = vld [vmem:[#allocation3 + $0xf78] sm:$0xff] }
 0x2ec   :  { %2335 = vmatpush1.msra.mxu0 %v1156_v13  ;;  %2406 = vmatpush1.msra.mxu1 %v1412_v18  ;;  %v1564_v0 = vld [vmem:[#allocation3 + $0x17b0] sm:$0xff]  ;;  %v1557_v49 = vld [vmem:[#allocation3 + $0x1778] sm:$0xff] }
 0x2ed   :  { %2336 = vmatprep.subr.mxu0 %v1149_v32  ;;  %2407 = vmatprep.subr.mxu1 %v1405_v28  ;;  %v1300_v58 = vld [vmem:[#allocation3 + $0xf70] sm:$0xff]  ;;  %v1293_v57 = vld [vmem:[#allocation3 + $0xf38] sm:$0xff] }
 0x2ee   :  { %2337 = vmatpush1.msra.mxu0 %v1148_v8  ;;  %2408 = vmatpush1.msra.mxu1 %v1404_v5  ;;  %v1556_v16 = vld [vmem:[#allocation3 + $0x1770] sm:$0xff]  ;;  %v1549_v21 = vld [vmem:[#allocation3 + $0x1738] sm:$0xff] }
 0x2ef   :  { %2338 = vmatprep.subr.mxu0 %v1141_v1  ;;  %2409 = vmatprep.subr.mxu1 %v1397_v59  ;;  %v1292_v13 = vld [vmem:[#allocation3 + $0xf30] sm:$0xff]  ;;  %v1285_v32 = vld [vmem:[#allocation3 + $0xef8] sm:$0xff] }
 0x2f0   :  { %2339 = vmatpush1.msra.mxu0 %v1140_v6  ;;  %2410 = vmatpush1.msra.mxu1 %v1396_v51  ;;  %v1548_v18 = vld [vmem:[#allocation3 + $0x1730] sm:$0xff]  ;;  %v1541_v28 = vld [vmem:[#allocation3 + $0x16f8] sm:$0xff] }
 0x2f1   :  { %2340 = vmatprep.subr.mxu0 %v1133_v4  ;;  %2411 = vmatprep.subr.mxu1 %v1389_v23  ;;  %v1284_v8 = vld [vmem:[#allocation3 + $0xef0] sm:$0xff]  ;;  %v1277_v1 = vld [vmem:[#allocation3 + $0xeb8] sm:$0xff] }
 0x2f2   :  { %2341 = vmatpush1.msra.mxu0 %v1132_v56  ;;  %2412 = vmatpush1.msra.mxu1 %v1388_v44  ;;  %v1540_v5 = vld [vmem:[#allocation3 + $0x16f0] sm:$0xff]  ;;  %v1533_v59 = vld [vmem:[#allocation3 + $0x16b8] sm:$0xff] }
 0x2f3   :  { %2342 = vmatprep.subr.mxu0 %v1125_v26  ;;  %2413 = vmatprep.subr.mxu1 %v1381_v54  ;;  %v1276_v6 = vld [vmem:[#allocation3 + $0xeb0] sm:$0xff]  ;;  %v1269_v4 = vld [vmem:[#allocation3 + $0xe78] sm:$0xff] }
 0x2f4   :  { %2343 = vmatpush1.msra.mxu0 %v1124_v25  ;;  %2414 = vmatpush1.msra.mxu1 %v1380_v39  ;;  %v1532_v51 = vld [vmem:[#allocation3 + $0x16b0] sm:$0xff]  ;;  %v1525_v23 = vld [vmem:[#allocation3 + $0x1678] sm:$0xff] }
 0x2f5   :  { %2344 = vmatprep.subr.mxu0 %v1117_v7  ;;  %2415 = vmatprep.subr.mxu1 %v1373_v30  ;;  %v1268_v56 = vld [vmem:[#allocation3 + $0xe70] sm:$0xff]  ;;  %v1261_v26 = vld [vmem:[#allocation3 + $0xe38] sm:$0xff] }
 0x2f6   :  { %2345 = vmatpush1.msra.mxu0 %v1116_v42  ;;  %2416 = vmatpush1.msra.mxu1 %v1372_v2  ;;  %v1524_v44 = vld [vmem:[#allocation3 + $0x1670] sm:$0xff]  ;;  %v1517_v54 = vld [vmem:[#allocation3 + $0x1638] sm:$0xff] }
 0x2f7   :  { %2346 = vmatprep.subr.mxu0 %v1109_v60  ;;  %2417 = vmatprep.subr.mxu1 %v1365_v37  ;;  %v1260_v25 = vld [vmem:[#allocation3 + $0xe30] sm:$0xff]  ;;  %v1253_v7 = vld [vmem:[#allocation3 + $0xdf8] sm:$0xff] }
 0x2f8   :  { %2347 = vmatpush1.msra.mxu0 %v1108_v47  ;;  %2418 = vmatpush1.msra.mxu1 %v1364_v31  ;;  %v1516_v39 = vld [vmem:[#allocation3 + $0x1630] sm:$0xff]  ;;  %v1509_v30 = vld [vmem:[#allocation3 + $0x15f8] sm:$0xff] }
 0x2f9   :  { %2348 = vmatprep.subr.mxu0 %v1101_v11  ;;  %2419 = vmatprep.subr.mxu1 %v1357_v46  ;;  %v1252_v42 = vld [vmem:[#allocation3 + $0xdf0] sm:$0xff]  ;;  %v1245_v60 = vld [vmem:[#allocation3 + $0xdb8] sm:$0xff]  ;;  %v1586_v11 = vsub.s32 2, %v3339_v33 }
 0x2fa   :  { %2349 = vmatpush1.msra.mxu0 %v1100_v55  ;;  %2420 = vmatpush1.msra.mxu1 %v1356_v38  ;;  %v1508_v2 = vld [vmem:[#allocation3 + $0x15f0] sm:$0xff]  ;;  %v1501_v37 = vld [vmem:[#allocation3 + $0x15b8] sm:$0xff] }
 0x2fb   :  { %2350 = vmatprep.subr.mxu0 %v1093_v10  ;;  %2421 = vmatprep.subr.mxu1 %v1349_v27  ;;  %v1244_v47 = vld [vmem:[#allocation3 + $0xdb0] sm:$0xff]  ;;  %v1237_v46 = vld [vmem:[#allocation3 + $0xd78] sm:$0xff]  ;;  %v1590_v27 = vsub.s32 3, %v3339_v33 }
 0x2fc   :  { %2351 = vmatpush1.msra.mxu0 %v1092_v9  ;;  %2422 = vmatpush1.msra.mxu1 %v1348_v19  ;;  %v1500_v31 = vld [vmem:[#allocation3 + $0x15b0] sm:$0xff]  ;;  %v1493_v55 = vld [vmem:[#allocation3 + $0x1578] sm:$0xff] }
 0x2fd   :  { %2352 = vmatprep.subr.mxu0 %v1085_v17  ;;  %2423 = vmatprep.subr.mxu1 %v1341_v14  ;;  %v1236_v38 = vld [vmem:[#allocation3 + $0xd70] sm:$0xff]  ;;  %v1229_v9 = vld [vmem:[#allocation3 + $0xd38] sm:$0xff]  ;;  %v1895_v17 = vpop.f32.mrf.mxu1 }
 0x2fe   :  { %2353 = vmatpush1.msra.mxu0 %v1084_v12  ;;  %2424 = vmatpush1.msra.mxu1 %v1340_v53  ;;  %v1492_v10 = vld [vmem:[#allocation3 + $0x1570] sm:$0xff]  ;;  %v1485_v19 = vld [vmem:[#allocation3 + $0x1538] sm:$0xff]  ;;  %v1587_v53 = vrot.slane %v3342_v62, %v1586_v11 }
 0x2ff   :  { %2354 = vmatprep.subr.mxu0 %v1077_v36  ;;  %2425 = vmatprep.subr.mxu1 %v1333_v63  ;;  %v1228_v14 = vld [vmem:[#allocation3 + $0xd30] sm:$0xff]  ;;  %v1221_v36 = vld [vmem:[#allocation3 + $0xcf8] sm:$0xff] }
 0x300   :  { %2355 = vmatpush1.msra.mxu0 %v1076_v24  ;;  %2426 = vmatpush1.msra.mxu1 %v1332_v50  ;;  %v1484_v12 = vld [vmem:[#allocation3 + $0x1530] sm:$0xff]  ;;  %v1477_v63 = vld [vmem:[#allocation3 + $0x14f8] sm:$0xff] }
 0x301   :  { %2356 = vmatprep.subr.mxu0 %v1069_v3  ;;  %2427 = vmatprep.subr.mxu1 %v1325_v61  ;;  %v1220_v24 = vld [vmem:[#allocation3 + $0xcf0] sm:$0xff]  ;;  %v1591_v3 = vrot.slane %v3342_v62, %v1590_v27  ;;  %v1213_v61 = vld [vmem:[#allocation3 + $0xcb8] sm:$0xff] }
 0x302   :  { %2357 = vmatpush1.msra.mxu0 %v1068_v22  ;;  %2428 = vmatpush1.msra.mxu1 %v1324_v34  ;;  %v1476_v50 = vld [vmem:[#allocation3 + $0x14f0] sm:$0xff]  ;;  %v1469_v22 = vld [vmem:[#allocation3 + $0x14b8] sm:$0xff]  ;;  %v1897_v34 = vpop.f32.mrf.mxu1 }
 0x303   :  { %2358 = vmatprep.subr.mxu0 %v1317_v35  ;;  %2429 = vmatprep.subr.mxu1 %v1573_v48  ;;  %v1212_v35 = vld [vmem:[#allocation3 + $0xcb0] sm:$0xff] }
 0x304   :  { %2359 = vmatpush2.msra.mxu0 %v1316_v45  ;;  %2430 = vmatpush2.msra.mxu1 %v1572_v29  ;;  %v1468_v48 = vld [vmem:[#allocation3 + $0x14b0] sm:$0xff]  ;;  %v1896_v45 = vadd.f32 %v1895_v17, %v1587_v53  ;;  %v1205_v29 = vld [vmem:[#allocation3 + $0xc78] sm:$0xff] }
 0x305   :  { %2360 = vmatprep.subr.mxu0 %v1309_v40  ;;  %2431 = vmatprep.subr.mxu1 %v1565_v43  ;;  %v1461_v40 = vld [vmem:[#allocation3 + $0x1478] sm:$0xff]  ;;  %v1204_v43 = vld [vmem:[#allocation3 + $0xc70] sm:$0xff] }
 0x306   :  { %2361 = vmatpush2.msra.mxu0 %v1308_v52  ;;  %2432 = vmatpush2.msra.mxu1 %v1564_v0  ;;  %v1460_v52 = vld [vmem:[#allocation3 + $0x1470] sm:$0xff] }
 0x307   :  { %2362 = vmatprep.subr.mxu0 %v1301_v41  ;;  %2433 = vmatprep.subr.mxu1 %v1557_v49  ;;  %v1898_v49 = vadd.f32 %v1897_v34, %v1591_v3 }
 0x308   :  { %2363 = vmatpush2.msra.mxu0 %v1300_v58  ;;  %2434 = vmatpush2.msra.mxu1 %v1556_v16  ;;  %v1197_v58 = vld [vmem:[#allocation3 + $0xc38] sm:$0xff] }
 0x309   :  { %2364 = vmatprep.subr.mxu0 %v1293_v57  ;;  %2435 = vmatprep.subr.mxu1 %v1549_v21  ;;  %v1453_v16 = vld [vmem:[#allocation3 + $0x1438] sm:$0xff]  ;;  %v1196_v21 = vld [vmem:[#allocation3 + $0xc30] sm:$0xff] }
 0x30a   :  { %2365 = vmatpush2.msra.mxu0 %v1292_v13  ;;  %2436 = vmatpush2.msra.mxu1 %v1548_v18  ;;  %v1452_v13 = vld [vmem:[#allocation3 + $0x1430] sm:$0xff] }
 0x30b   :  { %2366 = vmatprep.subr.mxu0 %v1285_v32  ;;  %2437 = vmatprep.subr.mxu1 %v1541_v28 }
 0x30c   :  { %2367 = vmatpush2.msra.mxu0 %v1284_v8  ;;  %2438 = vmatpush2.msra.mxu1 %v1540_v5 }
 0x30d   :  { %2368 = vmatprep.subr.mxu0 %v1277_v1  ;;  %2439 = vmatprep.subr.mxu1 %v1533_v59  ;;  %v1594_v1 = vsub.s32 4, %v3339_v33  ;;  %v1598_v59 = vsub.s32 5, %v3339_v33 }
 0x30e   :  { %2369 = vmatpush2.msra.mxu0 %v1276_v6  ;;  %2440 = vmatpush2.msra.mxu1 %v1532_v51 }
 0x30f   :  { %2370 = vmatprep.subr.mxu0 %v1269_v4  ;;  %2441 = vmatprep.subr.mxu1 %v1525_v23  ;;  %v1595_v51 = vrot.slane %v3342_v62, %v1594_v1  ;;  %v1599_v4 = vrot.slane %v3342_v62, %v1598_v59 }
 0x310   :  { %2371 = vmatpush2.msra.mxu0 %v1268_v56  ;;  %2442 = vmatpush2.msra.mxu1 %v1524_v44 }
 0x311   :  { %2372 = vmatprep.subr.mxu0 %v1261_v26  ;;  %2443 = vmatprep.subr.mxu1 %v1517_v54 }
 0x312   :  { %2373 = vmatpush2.msra.mxu0 %v1260_v25  ;;  %2444 = vmatpush2.msra.mxu1 %v1516_v39 }
 0x313   :  { %2374 = vmatprep.subr.mxu0 %v1253_v7  ;;  %2445 = vmatprep.subr.mxu1 %v1509_v30 }
 0x314   :  { %2375 = vmatpush2.msra.mxu0 %v1252_v42  ;;  %2446 = vmatpush2.msra.mxu1 %v1508_v2  ;;  %v1602_v42 = vsub.s32 6, %v3339_v33  ;;  %v1606_v2 = vsub.s32 7, %v3339_v33 }
 0x315   :  { %2376 = vmatprep.subr.mxu0 %v1245_v60  ;;  %2447 = vmatprep.subr.mxu1 %v1501_v37 }
 0x316   :  { %2377 = vmatpush2.msra.mxu0 %v1244_v47  ;;  %2448 = vmatpush2.msra.mxu1 %v1500_v31  ;;  %v1603_v37 = vrot.slane %v3342_v62, %v1602_v42  ;;  %v1607_v47 = vrot.slane %v3342_v62, %v1606_v2 }
 0x317   :  { %2378 = vmatprep.subr.mxu0 %v1237_v46  ;;  %2449 = vmatprep.subr.mxu1 %v1493_v55 }
 0x318   :  { %2379 = vmatpush2.msra.mxu0 %v1236_v38  ;;  %2450 = vmatpush2.msra.mxu1 %v1492_v10 }
 0x319   :  { %2380 = vmatprep.subr.mxu0 %v1229_v9  ;;  %2451 = vmatprep.subr.mxu1 %v1485_v19 }
 0x31a   :  { %2381 = vmatpush2.msra.mxu0 %v1228_v14  ;;  %2452 = vmatpush2.msra.mxu1 %v1484_v12 }
 0x31b   :  { %2382 = vmatprep.subr.mxu0 %v1221_v36  ;;  %2453 = vmatprep.subr.mxu1 %v1477_v63 }
 0x31c   :  { %2383 = vmatpush2.msra.mxu0 %v1220_v24  ;;  %2454 = vmatpush2.msra.mxu1 %v1476_v50 }
 0x31d   :  { %2384 = vmatprep.subr.mxu0 %v1213_v61  ;;  %2455 = vmatprep.subr.mxu1 %v1469_v22  ;;  %v1966_v0 = vpop.f32.mrf.mxu0  ;;  %v2037_v41 = vpop.f32.mrf.mxu1 }
 0x31e   :  { %2385 = vmatpush2.msra.mxu0 %v1212_v35  ;;  %2456 = vmatpush2.msra.mxu1 %v1468_v48  ;;  %v1967_v57 = vadd.f32 %v1966_v0, %v1896_v45 }
 0x31f   :  { %2386 = vmatprep.subr.mxu0 %v1205_v29  ;;  %2457 = vmatprep.subr.mxu1 %v1461_v40  ;;  %v1968_v18 = vpop.f32.mrf.mxu0  ;;  %v2039_v8 = vpop.f32.mrf.mxu1 }
 0x320   :  { %2387 = vmatpush2.msra.mxu0 %v1204_v43  ;;  %2458 = vmatpush2.msra.mxu1 %v1460_v52  ;;  %v2038_v32 = vadd.f32 %v2037_v41, %v1967_v57  ;;  %v1969_v28 = vadd.f32 %v1968_v18, %v1898_v49 }
 0x321   :  { %2388 = vmatprep.subr.mxu0 %v1197_v58  ;;  %2459 = vmatprep.subr.mxu1 %v1453_v16 }
 0x322   :  { %2389 = vmatpush2.msra.mxu0 %v1196_v21  ;;  %2460 = vmatpush2.msra.mxu1 %v1452_v13  ;;  %2470 = vst [vmem:[#allocation8 + $0x10] sm:$0xff] %v2038_v32  ;;  %v2040_v5 = vadd.f32 %v2039_v8, %v1969_v28 }
 0x323   :  { %2391 = vmatmul.mubr.f32.vlgmr.msra.gmra.mxu0 %v3311_v15  ;;  %2462 = vmatmul.mubr.f32.vlgmr.msra.gmra.mxu1 %v3325_v20 }
 0x324   :  { %2471 = vst [vmem:[#allocation8 + $0x18] sm:$0xff] %v2040_v5 }
 0x35f   :  { %v2108_v6 = vpop.f32.mrf.mxu0  ;;  %v2179_v44 = vpop.f32.mrf.mxu1 }
 0x360   :  { %v2109_v56 = vadd.f32 %v2108_v6, %v1595_v51 }
 0x361   :  { %v2110_v23 = vpop.f32.mrf.mxu0  ;;  %v2181_v25 = vpop.f32.mrf.mxu1 }
 0x362   :  { %v2111_v26 = vadd.f32 %v2110_v23, %v1599_v4  ;;  %v2180_v54 = vadd.f32 %v2179_v44, %v2109_v56 }
 0x364   :  { %v2182_v15 = vadd.f32 %v2181_v25, %v2111_v26 }
 0x3a1   :  { %v2250_v39 = vpop.f32.mrf.mxu0  ;;  %v2321_v60 = vpop.f32.mrf.mxu1 }
 0x3a2   :  { %v2251_v7 = vadd.f32 %v2250_v39, %v2180_v54  ;;  %v2322_v11 = vadd.f32 %v2321_v60, %v1603_v37 }
 0x3a3   :  { %v2252_v20 = vpop.f32.mrf.mxu0  ;;  %v2323_v31 = vpop.f32.mrf.mxu1 }
 0x3a4   :  { %2472 = vst [vmem:[#allocation8 + $0x20] sm:$0xff] %v2251_v7  ;;  %v2253_v30 = vadd.f32 %v2252_v20, %v2182_v15  ;;  %v2324_v38 = vadd.f32 %v2323_v31, %v1607_v47 }
 0x3a6   :  { %2473 = vst [vmem:[#allocation8 + $0x28] sm:$0xff] %v2253_v30 }
 0x3e3   :  { %v2392_v46 = vpop.f32.mrf.mxu0  ;;  %v2463_v55 = vpop.f32.mrf.mxu1 }
 0x3e4   :  { %v2393_v10 = vadd.f32 %v2392_v46, %v2322_v11 }
 0x3e5   :  { %v2394_v27 = vpop.f32.mrf.mxu0  ;;  %v2465_v17 = vpop.f32.mrf.mxu1 }
 0x3e6   :  { %v2464_v9 = vadd.f32 %v2463_v55, %v2393_v10  ;;  %v2395_v19 = vadd.f32 %v2394_v27, %v2324_v38 }
 0x3e8   :  { %2474 = vst [vmem:[#allocation8 + $0x30] sm:$0xff] %v2464_v9  ;;  %v2466_v14 = vadd.f32 %v2465_v17, %v2395_v19 }
 0x3ea   :  { %2475 = vst [vmem:[#allocation8 + $0x38] sm:$0xff] %v2466_v14 }
 0x3eb   :  { %2550 = shalt.err (!%p2547_p0)
}
 0x3ec   :  { %2485 = dma.vmem_to_hbm [thread:$0]  %s2483_s4, 1024, %s3371_s3, [#allocation5]  }
 0x3ed   :  { %2563 = dma.done.wait [#allocation5], 1024  }
 0x3ee   :  { %2564 = vsyncadd [#allocation5], 4294966272 }
 0x3ef   :  { %2489 = vsyncpa [#allocation4], 1 }
 0x3f0   :  { %2490 = vsyncpa [#allocation7], 1 }
 0x3f1   :  { %2491 = vsyncpa [#allocation5], 1 }

</bundles_post_ra>
